<compile_context>
chip_gen: v5e
topology: v5e:2x2
jax: 0.10.0
libtpu: 0.0.40
codegen_flags: <defaults>
</compile_context>

<pallas_src>
import numpy as np

import jax
import jax.numpy as jnp
from jax.experimental import pallas as pl
from jax.experimental.pallas import tpu as pltpu


# ----------------------------- Pallas kernels ------------------------------

def _conv_block_kernel(x_ref, w_ref, b_ref, s_ref, p_ref, o_ref):
    """Fused conv(3x3 / 1x1) + bias + ReLU + (2x2 maxpool) + zero-pad.

    Per grid step (one image):
      x_ref: [Hp, Cin*Wp]          bf16  padded input, channel-major lanes
      w_ref: [kh, Cin*Wp, Cout*W]  bf16  banded conv weights (one per dy tap)
      b_ref: [1, Cout*W]           f32   bias broadcast over width
      s_ref: [2, Cout*W, Ns]       f32   lane (width) pool/pad selection
      p_ref: [2, Hs, Ho]           f32   row (height) pool/pad selection
      o_ref: [Hs, Ns]              bf16  output, already padded for next layer
    """
    kh = w_ref.shape[0]
    ho = p_ref.shape[2]                     # conv output rows (pre-pool)

    # conv: accumulate the kh row taps; width taps + channel contraction are
    # folded into the banded weight matrices (lane-dense MXU matmuls).
    acc = jnp.dot(x_ref[0:ho, :], w_ref[0], preferred_element_type=jnp.float32)
    for dy in range(1, kh):
        acc = acc + jnp.dot(x_ref[dy:dy + ho, :], w_ref[dy],
                            preferred_element_type=jnp.float32)

    y = jnp.maximum(acc + b_ref[...], 0.0)  # bias + ReLU in f32

    # fused 2x2 max-pool (or identity) + zero-padding for the next layer,
    # expressed as max over two 0/1 selection matmuls: columns, then rows.
    t = jnp.maximum(jnp.dot(y, s_ref[0], preferred_element_type=jnp.float32),
                    jnp.dot(y, s_ref[1], preferred_element_type=jnp.float32))
    z = jnp.maximum(jnp.dot(p_ref[0], t, preferred_element_type=jnp.float32),
                    jnp.dot(p_ref[1], t, preferred_element_type=jnp.float32))
    o_ref[...] = z.astype(o_ref.dtype)


def _fc_logsoftmax_kernel(x_ref, w_ref, b_ref, o_ref):
    # x: [B, F] bf16, w: [F, C] f32, b: [1, C] f32 -> o: [B, C] f32
    x = x_ref[...].astype(jnp.float32)
    z = jnp.dot(x, w_ref[...], preferred_element_type=jnp.float32) + b_ref[...]
    m = jnp.max(z, axis=-1, keepdims=True)
    lse = jnp.log(jnp.sum(jnp.exp(z - m), axis=-1, keepdims=True)) + m
    o_ref[...] = z - lse


# ------------------------------ call wrappers -------------------------------

def _conv_block(x, wb, bias, s2, p2):
    B, hp, k = x.shape
    kh, _, n = wb.shape
    _, hs, ho = p2.shape
    ns = s2.shape[2]
    return pl.pallas_call(
        _conv_block_kernel,
        out_shape=jax.ShapeDtypeStruct((B, hs, ns), jnp.bfloat16),
        grid=(B,),
        in_specs=[
            pl.BlockSpec((None, hp, k), lambda b: (b, 0, 0)),     # per-image
            pl.BlockSpec((kh, k, n), lambda b: (0, 0, 0)),        # resident
            pl.BlockSpec((1, n), lambda b: (0, 0)),               # resident
            pl.BlockSpec((2, n, ns), lambda b: (0, 0, 0)),        # resident
            pl.BlockSpec((2, hs, ho), lambda b: (0, 0, 0)),       # resident
        ],
        out_specs=pl.BlockSpec((None, hs, ns), lambda b: (b, 0, 0)),
        compiler_params=pltpu.CompilerParams(
            dimension_semantics=("parallel",)),
    )(x, wb, bias, s2, p2)


def _fc_logsoftmax(x, w, b):
    B = x.shape[0]
    C = w.shape[1]
    return pl.pallas_call(
        _fc_logsoftmax_kernel,
        out_shape=jax.ShapeDtypeStruct((B, C), jnp.float32),
    )(x, w, b)


# --------------------------- parameter construction -------------------------

def _init_conv(key, cout, cin, k):
    kw_, kb_ = jax.random.split(key)
    bound = 1.0 / float(np.sqrt(cin * k * k))
    w = jax.random.uniform(kw_, (cout, cin, k, k), jnp.float32, -bound, bound)
    b = jax.random.uniform(kb_, (cout,), jnp.float32, -bound, bound)
    return w, b


def _init_linear(key, fin, fout):
    kw_, kb_ = jax.random.split(key)
    bound = 1.0 / float(np.sqrt(fin))
    w = jax.random.uniform(kw_, (fin, fout), jnp.float32, -bound, bound)
    b = jax.random.uniform(kb_, (fout,), jnp.float32, -bound, bound)
    return w, b


def init_params(key):
    keys = jax.random.split(key, 7)
    return {
        "c1a": _init_conv(keys[0], 8, 1, 3),
        "c1b": _init_conv(keys[1], 8, 8, 3),
        "c2a": _init_conv(keys[2], 16, 8, 3),
        "c2b": _init_conv(keys[3], 16, 16, 3),
        "c3a": _init_conv(keys[4], 16, 16, 3),
        "c3b": _init_conv(keys[5], 16, 16, 1),
        "fc": _init_linear(keys[6], 16 * 3 * 3, 10),
    }


def _banded_weights(w_oihw, W, pad):
    """[Cout,Cin,kh,kw] -> [kh, Cin*(W+2*pad), Cout*W] banded matmul weights."""
    cout, cin, kh, kw = w_oihw.shape
    wp = W + 2 * pad
    p = np.arange(wp)
    wo = np.arange(W)
    dx = np.arange(kw)
    # sel[dx, p, w] = 1 iff padded input column p == output column w + dx
    sel = (p[None, :, None] == (wo[None, None, :] + dx[:, None, None]))
    sel = jnp.asarray(sel.astype(np.float32))
    taps = []
    for dy in range(kh):
        wt = jnp.transpose(w_oihw[:, :, dy, :], (1, 2, 0))       # [Cin, kw, Cout]
        m = jnp.einsum("cdo,dpw->cpow", wt, sel)                 # [Cin,Wp,Cout,W]
        taps.append(m.reshape(cin * wp, cout * W))
    return jnp.stack(taps, axis=0)


def _pool_mats(C, W, H, pad_next):
    """0/1 matrices: 2x2 max-pool + zero-pad border for the next layer."""
    w2, h2 = W // 2, H // 2
    ws, hs = w2 + 2 * pad_next, h2 + 2 * pad_next
    se = np.zeros((C * W, C * ws), np.float32)
    so = np.zeros((C * W, C * ws), np.float32)
    for c in range(C):
        for j in range(w2):
            se[c * W + 2 * j, c * ws + pad_next + j] = 1.0
            so[c * W + 2 * j + 1, c * ws + pad_next + j] = 1.0
    pe = np.zeros((hs, H), np.float32)
    po = np.zeros((hs, H), np.float32)
    for i in range(h2):
        pe[pad_next + i, 2 * i] = 1.0
        po[pad_next + i, 2 * i + 1] = 1.0
    return se, so, pe, po


def _pad_mats(C, W, H, pad_next):
    """0/1 matrices: identity + zero-pad border for the next layer."""
    ws, hs = W + 2 * pad_next, H + 2 * pad_next
    s = np.zeros((C * W, C * ws), np.float32)
    for c in range(C):
        for j in range(W):
            s[c * W + j, c * ws + pad_next + j] = 1.0
    p = np.zeros((hs, H), np.float32)
    for i in range(H):
        p[pad_next + i, i] = 1.0
    return s, s, p, p


_LAYER_CFG = (
    # name,  H,  W, pad_in, pool, pad_next
    ("c1a", 28, 28, 1, False, 1),
    ("c1b", 28, 28, 1, True, 1),
    ("c2a", 14, 14, 1, False, 1),
    ("c2b", 14, 14, 1, True, 1),
    ("c3a", 7, 7, 1, False, 0),
    ("c3b", 7, 7, 0, True, 0),
)


def pack_params(params):
    """Convert PyTorch-layout params into kernel-ready packed tensors."""
    convs = []
    for name, H, W, pad_in, pool, pad_next in _LAYER_CFG:
        w, b = params[name]
        cout = w.shape[0]
        wb = _banded_weights(w, W, pad_in).astype(jnp.bfloat16)
        bias = jnp.repeat(b, W).reshape(1, cout * W).astype(jnp.float32)
        if pool:
            se, so, pe, po = _pool_mats(cout, W, H, pad_next)
        else:
            se, so, pe, po = _pad_mats(cout, W, H, pad_next)
        s2 = jnp.asarray(np.stack([se, so], axis=0))
        p2 = jnp.asarray(np.stack([pe, po], axis=0))
        convs.append((wb, bias, s2, p2))

    # Fold PyTorch's NCHW flatten order into the FC weight: our pooled
    # activation flattens as h*48 + c*3 + w, PyTorch flattens as c*9 + h*3 + w.
    w_fc, b_fc = params["fc"]                          # [144, 10], [10]
    idx = np.arange(16 * 3 * 3)
    h, rem = idx // 48, idx % 48
    c, wcol = rem // 3, rem % 3
    w_fc_perm = w_fc[c * 9 + h * 3 + wcol, :]
    return {"convs": tuple(convs),
            "fc_w": w_fc_perm.astype(jnp.float32),
            "fc_b": b_fc.reshape(1, 10).astype(jnp.float32)}


# ------------------------------- forward pass --------------------------------

@jax.jit
def model_reducing_params_forward(packed, x_nchw):
    # x_nchw: [B, 1, 28, 28] float32 (PyTorch layout)
    B = x_nchw.shape[0]
    # channel-major flattened, spatially padded, bf16 activation layout
    x = jnp.pad(x_nchw[:, 0, :, :], ((0, 0), (1, 1), (1, 1)))
    x = x.astype(jnp.bfloat16)                        # [B, 30, 1*30]
    for wb, bias, s2, p2 in packed["convs"]:
        x = _conv_block(x, wb, bias, s2, p2)          # fused conv/relu/pool/pad
    x = x.reshape(B, 16 * 3 * 3)                      # [B,3,48] -> [B,144] (contiguous)
    return _fc_logsoftmax(x, packed["fc_w"], packed["fc_b"])   # [B, 10]


# ----------------------------------- main ------------------------------------

if __name__ == "__main__":
    key = jax.random.PRNGKey(0)
    k_params, k_x = jax.random.split(key)

    params = init_params(k_params)
    packed = pack_params(params)
    x = jax.random.normal(k_x, (2, 1, 28, 28), dtype=jnp.float32)

    out = model_reducing_params_forward(packed, x)
    out = jax.block_until_ready(out)

    assert out.shape == (2, 10), out.shape
    assert bool(jnp.all(jnp.isfinite(out)))
    # log_softmax rows should exponentiate-sum to ~1
    row_sums = jnp.sum(jnp.exp(out), axis=1)
    assert bool(jnp.all(jnp.abs(row_sums - 1.0) < 1e-3)), row_sums

    print("KERNEL_OK")
</pallas_src>

<mosaic_0001>
module attributes {stable_mosaic.version = 11 : i64} {
  func.func @_conv_block_kernel(%arg0: i32, %arg1: memref<1x30x240xbf16, #tpu.memory_space<vmem>>, %arg2: memref<3x240x224xbf16, #tpu.memory_space<vmem>>, %arg3: memref<1x224xf32, #tpu.memory_space<vmem>>, %arg4: memref<2x224x128xf32, #tpu.memory_space<vmem>>, %arg5: memref<2x16x28xf32, #tpu.memory_space<vmem>>, %arg6: memref<1x16x128xbf16, #tpu.memory_space<vmem>>) attributes {dimension_semantics = [#tpu.dimension_semantics<parallel>], iteration_bounds = array<i64: 2>, scalar_prefetch = 0 : i64, scratch_operands = 0 : i64, tpu.core_type = #tpu.core_type<tc>, window_params = [{transform_indices = @transform_0, window_bounds = array<i64: 1, 30, 240>}, {pipeline_mode = #tpu.pipeline_mode<synchronous>, transform_indices = @transform_1, window_bounds = array<i64: 3, 240, 224>}, {pipeline_mode = #tpu.pipeline_mode<synchronous>, transform_indices = @transform_2, window_bounds = array<i64: 1, 224>}, {pipeline_mode = #tpu.pipeline_mode<synchronous>, transform_indices = @transform_3, window_bounds = array<i64: 2, 224, 128>}, {pipeline_mode = #tpu.pipeline_mode<synchronous>, transform_indices = @transform_4, window_bounds = array<i64: 2, 16, 28>}, {transform_indices = @transform_5, window_bounds = array<i64: 1, 16, 128>}]} {
    %c0 = arith.constant 0 : index
    %c0_0 = arith.constant 0 : index
    %c0_1 = arith.constant 0 : index
    %0 = vector.load %arg1[%c0, %c0_0, %c0_1] : memref<1x30x240xbf16, #tpu.memory_space<vmem>>, vector<1x28x240xbf16>
    %1 = vector.shape_cast %0 : vector<1x28x240xbf16> to vector<28x240xbf16>
    %c0_2 = arith.constant 0 : index
    %c0_3 = arith.constant 0 : index
    %c0_4 = arith.constant 0 : index
    %2 = vector.load %arg2[%c0_2, %c0_3, %c0_4] : memref<3x240x224xbf16, #tpu.memory_space<vmem>>, vector<1x240x224xbf16>
    %3 = vector.shape_cast %2 : vector<1x240x224xbf16> to vector<240x224xbf16>
    %cst = arith.constant dense<0.000000e+00> : vector<28x224xf32>
    %4 = tpu.matmul %1, %3, %cst {dimension_numbers = #tpu.dot_dimension_numbers<[1], [0], [0], [1], [0, 0, 1, 1], [], []>} : vector<28x240xbf16>, vector<240x224xbf16>, vector<28x224xf32> -> vector<28x224xf32>
    %c0_5 = arith.constant 0 : index
    %c1 = arith.constant 1 : index
    %c0_6 = arith.constant 0 : index
    %5 = vector.load %arg1[%c0_5, %c1, %c0_6] : memref<1x30x240xbf16, #tpu.memory_space<vmem>>, vector<1x28x240xbf16>
    %6 = vector.shape_cast %5 : vector<1x28x240xbf16> to vector<28x240xbf16>
    %c1_7 = arith.constant 1 : index
    %c0_8 = arith.constant 0 : index
    %c0_9 = arith.constant 0 : index
    %7 = vector.load %arg2[%c1_7, %c0_8, %c0_9] : memref<3x240x224xbf16, #tpu.memory_space<vmem>>, vector<1x240x224xbf16>
    %8 = vector.shape_cast %7 : vector<1x240x224xbf16> to vector<240x224xbf16>
    %cst_10 = arith.constant dense<0.000000e+00> : vector<28x224xf32>
    %9 = tpu.matmul %6, %8, %cst_10 {dimension_numbers = #tpu.dot_dimension_numbers<[1], [0], [0], [1], [0, 0, 1, 1], [], []>} : vector<28x240xbf16>, vector<240x224xbf16>, vector<28x224xf32> -> vector<28x224xf32>
    %10 = arith.addf %4, %9 : vector<28x224xf32>
    %c0_11 = arith.constant 0 : index
    %c2 = arith.constant 2 : index
    %c0_12 = arith.constant 0 : index
    %11 = vector.load %arg1[%c0_11, %c2, %c0_12] : memref<1x30x240xbf16, #tpu.memory_space<vmem>>, vector<1x28x240xbf16>
    %12 = vector.shape_cast %11 : vector<1x28x240xbf16> to vector<28x240xbf16>
    %c2_13 = arith.constant 2 : index
    %c0_14 = arith.constant 0 : index
    %c0_15 = arith.constant 0 : index
    %13 = vector.load %arg2[%c2_13, %c0_14, %c0_15] : memref<3x240x224xbf16, #tpu.memory_space<vmem>>, vector<1x240x224xbf16>
    %14 = vector.shape_cast %13 : vector<1x240x224xbf16> to vector<240x224xbf16>
    %cst_16 = arith.constant dense<0.000000e+00> : vector<28x224xf32>
    %15 = tpu.matmul %12, %14, %cst_16 {dimension_numbers = #tpu.dot_dimension_numbers<[1], [0], [0], [1], [0, 0, 1, 1], [], []>} : vector<28x240xbf16>, vector<240x224xbf16>, vector<28x224xf32> -> vector<28x224xf32>
    %16 = arith.addf %10, %15 : vector<28x224xf32>
    %c0_17 = arith.constant 0 : index
    %c0_18 = arith.constant 0 : index
    %17 = vector.load %arg3[%c0_17, %c0_18] : memref<1x224xf32, #tpu.memory_space<vmem>>, vector<1x224xf32>
    %18 = vector.broadcast %17 : vector<1x224xf32> to vector<28x224xf32>
    %19 = arith.addf %16, %18 : vector<28x224xf32>
    %cst_19 = arith.constant 0.000000e+00 : f32
    %20 = vector.broadcast %cst_19 : f32 to vector<28x224xf32>
    %21 = arith.maximumf %19, %20 : vector<28x224xf32>
    %c0_20 = arith.constant 0 : index
    %c0_21 = arith.constant 0 : index
    %c0_22 = arith.constant 0 : index
    %22 = vector.load %arg4[%c0_20, %c0_21, %c0_22] : memref<2x224x128xf32, #tpu.memory_space<vmem>>, vector<1x224x128xf32>
    %23 = vector.shape_cast %22 : vector<1x224x128xf32> to vector<224x128xf32>
    %cst_23 = arith.constant dense<0.000000e+00> : vector<28x128xf32>
    %24 = tpu.matmul %21, %23, %cst_23 {dimension_numbers = #tpu.dot_dimension_numbers<[1], [0], [0], [1], [0, 0, 1, 1], [], []>} : vector<28x224xf32>, vector<224x128xf32>, vector<28x128xf32> -> vector<28x128xf32>
    %c1_24 = arith.constant 1 : index
    %c0_25 = arith.constant 0 : index
    %c0_26 = arith.constant 0 : index
    %25 = vector.load %arg4[%c1_24, %c0_25, %c0_26] : memref<2x224x128xf32, #tpu.memory_space<vmem>>, vector<1x224x128xf32>
    %26 = vector.shape_cast %25 : vector<1x224x128xf32> to vector<224x128xf32>
    %cst_27 = arith.constant dense<0.000000e+00> : vector<28x128xf32>
    %27 = tpu.matmul %21, %26, %cst_27 {dimension_numbers = #tpu.dot_dimension_numbers<[1], [0], [0], [1], [0, 0, 1, 1], [], []>} : vector<28x224xf32>, vector<224x128xf32>, vector<28x128xf32> -> vector<28x128xf32>
    %28 = arith.maximumf %24, %27 : vector<28x128xf32>
    %c0_28 = arith.constant 0 : index
    %c0_29 = arith.constant 0 : index
    %c0_30 = arith.constant 0 : index
    %29 = vector.load %arg5[%c0_28, %c0_29, %c0_30] : memref<2x16x28xf32, #tpu.memory_space<vmem>>, vector<1x16x28xf32>
    %30 = vector.shape_cast %29 : vector<1x16x28xf32> to vector<16x28xf32>
    %cst_31 = arith.constant dense<0.000000e+00> : vector<16x128xf32>
    %31 = tpu.matmul %30, %28, %cst_31 {dimension_numbers = #tpu.dot_dimension_numbers<[1], [0], [0], [1], [0, 0, 1, 1], [], []>} : vector<16x28xf32>, vector<28x128xf32>, vector<16x128xf32> -> vector<16x128xf32>
    %c1_32 = arith.constant 1 : index
    %c0_33 = arith.constant 0 : index
    %c0_34 = arith.constant 0 : index
    %32 = vector.load %arg5[%c1_32, %c0_33, %c0_34] : memref<2x16x28xf32, #tpu.memory_space<vmem>>, vector<1x16x28xf32>
    %33 = vector.shape_cast %32 : vector<1x16x28xf32> to vector<16x28xf32>
    %cst_35 = arith.constant dense<0.000000e+00> : vector<16x128xf32>
    %34 = tpu.matmul %33, %28, %cst_35 {dimension_numbers = #tpu.dot_dimension_numbers<[1], [0], [0], [1], [0, 0, 1, 1], [], []>} : vector<16x28xf32>, vector<28x128xf32>, vector<16x128xf32> -> vector<16x128xf32>
    %35 = arith.maximumf %31, %34 : vector<16x128xf32>
    %36 = arith.truncf %35 : vector<16x128xf32> to vector<16x128xbf16>
    %c0_36 = arith.constant 0 : index
    %c0_37 = arith.constant 0 : index
    %c0_38 = arith.constant 0 : index
    %37 = vector.load %arg6[%c0_36, %c0_37, %c0_38] : memref<1x16x128xbf16, #tpu.memory_space<vmem>>, vector<1x16x128xbf16>
    %38 = vector.shape_cast %37 : vector<1x16x128xbf16> to vector<16x128xbf16>
    %39 = vector.shape_cast %36 : vector<16x128xbf16> to vector<1x16x128xbf16>
    tpu.vector_store %arg6[%c0_36, %c0_37, %c0_38], %39 {strides = array<i32>} : memref<1x16x128xbf16, #tpu.memory_space<vmem>>, vector<1x16x128xbf16>,
    return
  }
  func.func @transform_0(%arg0: i32) -> (i32, i32, i32) {
    %c0_i32 = arith.constant 0 : i32
    %c0_i32_0 = arith.constant 0 : i32
    %c0_i32_1 = arith.constant 0 : i32
    return %arg0, %c0_i32, %c0_i32_0 : i32, i32, i32
  }
  func.func @transform_1(%arg0: i32) -> (i32, i32, i32) {
    %c0_i32 = arith.constant 0 : i32
    %c0_i32_0 = arith.constant 0 : i32
    %c0_i32_1 = arith.constant 0 : i32
    %c0_i32_2 = arith.constant 0 : i32
    return %c0_i32, %c0_i32_0, %c0_i32_1 : i32, i32, i32
  }
  func.func @transform_2(%arg0: i32) -> (i32, i32) {
    %c0_i32 = arith.constant 0 : i32
    %c0_i32_0 = arith.constant 0 : i32
    %c0_i32_1 = arith.constant 0 : i32
    return %c0_i32, %c0_i32_0 : i32, i32
  }
  func.func @transform_3(%arg0: i32) -> (i32, i32, i32) {
    %c0_i32 = arith.constant 0 : i32
    %c0_i32_0 = arith.constant 0 : i32
    %c0_i32_1 = arith.constant 0 : i32
    %c0_i32_2 = arith.constant 0 : i32
    return %c0_i32, %c0_i32_0, %c0_i32_1 : i32, i32, i32
  }
  func.func @transform_4(%arg0: i32) -> (i32, i32, i32) {
    %c0_i32 = arith.constant 0 : i32
    %c0_i32_0 = arith.constant 0 : i32
    %c0_i32_1 = arith.constant 0 : i32
    %c0_i32_2 = arith.constant 0 : i32
    return %c0_i32, %c0_i32_0, %c0_i32_1 : i32, i32, i32
  }
  func.func @transform_5(%arg0: i32) -> (i32, i32, i32) {
    %c0_i32 = arith.constant 0 : i32
    %c0_i32_0 = arith.constant 0 : i32
    %c0_i32_1 = arith.constant 0 : i32
    return %arg0, %c0_i32, %c0_i32_0 : i32, i32, i32
  }
}

module attributes {stable_mosaic.version = 11 : i64} {
  func.func @_conv_block_kernel(%arg0: i32, %arg1: memref<1x30x30xbf16, #tpu.memory_space<vmem>>, %arg2: memref<3x30x224xbf16, #tpu.memory_space<vmem>>, %arg3: memref<1x224xf32, #tpu.memory_space<vmem>>, %arg4: memref<2x224x240xf32, #tpu.memory_space<vmem>>, %arg5: memref<2x30x28xf32, #tpu.memory_space<vmem>>, %arg6: memref<1x30x240xbf16, #tpu.memory_space<vmem>>) attributes {dimension_semantics = [#tpu.dimension_semantics<parallel>], iteration_bounds = array<i64: 2>, scalar_prefetch = 0 : i64, scratch_operands = 0 : i64, tpu.core_type = #tpu.core_type<tc>, window_params = [{transform_indices = @transform_0, window_bounds = array<i64: 1, 30, 30>}, {pipeline_mode = #tpu.pipeline_mode<synchronous>, transform_indices = @transform_1, window_bounds = array<i64: 3, 30, 224>}, {pipeline_mode = #tpu.pipeline_mode<synchronous>, transform_indices = @transform_2, window_bounds = array<i64: 1, 224>}, {pipeline_mode = #tpu.pipeline_mode<synchronous>, transform_indices = @transform_3, window_bounds = array<i64: 2, 224, 240>}, {pipeline_mode = #tpu.pipeline_mode<synchronous>, transform_indices = @transform_4, window_bounds = array<i64: 2, 30, 28>}, {transform_indices = @transform_5, window_bounds = array<i64: 1, 30, 240>}]} {
    %c0 = arith.constant 0 : index
    %c0_0 = arith.constant 0 : index
    %c0_1 = arith.constant 0 : index
    %0 = vector.load %arg1[%c0, %c0_0, %c0_1] : memref<1x30x30xbf16, #tpu.memory_space<vmem>>, vector<1x28x30xbf16>
    %1 = vector.shape_cast %0 : vector<1x28x30xbf16> to vector<28x30xbf16>
    %c0_2 = arith.constant 0 : index
    %c0_3 = arith.constant 0 : index
    %c0_4 = arith.constant 0 : index
    %2 = vector.load %arg2[%c0_2, %c0_3, %c0_4] : memref<3x30x224xbf16, #tpu.memory_space<vmem>>, vector<1x30x224xbf16>
    %3 = vector.shape_cast %2 : vector<1x30x224xbf16> to vector<30x224xbf16>
    %cst = arith.constant dense<0.000000e+00> : vector<28x224xf32>
    %4 = tpu.matmul %1, %3, %cst {dimension_numbers = #tpu.dot_dimension_numbers<[1], [0], [0], [1], [0, 0, 1, 1], [], []>} : vector<28x30xbf16>, vector<30x224xbf16>, vector<28x224xf32> -> vector<28x224xf32>
    %c0_5 = arith.constant 0 : index
    %c1 = arith.constant 1 : index
    %c0_6 = arith.constant 0 : index
    %5 = vector.load %arg1[%c0_5, %c1, %c0_6] : memref<1x30x30xbf16, #tpu.memory_space<vmem>>, vector<1x28x30xbf16>
    %6 = vector.shape_cast %5 : vector<1x28x30xbf16> to vector<28x30xbf16>
    %c1_7 = arith.constant 1 : index
    %c0_8 = arith.constant 0 : index
    %c0_9 = arith.constant 0 : index
    %7 = vector.load %arg2[%c1_7, %c0_8, %c0_9] : memref<3x30x224xbf16, #tpu.memory_space<vmem>>, vector<1x30x224xbf16>
    %8 = vector.shape_cast %7 : vector<1x30x224xbf16> to vector<30x224xbf16>
    %cst_10 = arith.constant dense<0.000000e+00> : vector<28x224xf32>
    %9 = tpu.matmul %6, %8, %cst_10 {dimension_numbers = #tpu.dot_dimension_numbers<[1], [0], [0], [1], [0, 0, 1, 1], [], []>} : vector<28x30xbf16>, vector<30x224xbf16>, vector<28x224xf32> -> vector<28x224xf32>
    %10 = arith.addf %4, %9 : vector<28x224xf32>
    %c0_11 = arith.constant 0 : index
    %c2 = arith.constant 2 : index
    %c0_12 = arith.constant 0 : index
    %11 = vector.load %arg1[%c0_11, %c2, %c0_12] : memref<1x30x30xbf16, #tpu.memory_space<vmem>>, vector<1x28x30xbf16>
    %12 = vector.shape_cast %11 : vector<1x28x30xbf16> to vector<28x30xbf16>
    %c2_13 = arith.constant 2 : index
    %c0_14 = arith.constant 0 : index
    %c0_15 = arith.constant 0 : index
    %13 = vector.load %arg2[%c2_13, %c0_14, %c0_15] : memref<3x30x224xbf16, #tpu.memory_space<vmem>>, vector<1x30x224xbf16>
    %14 = vector.shape_cast %13 : vector<1x30x224xbf16> to vector<30x224xbf16>
    %cst_16 = arith.constant dense<0.000000e+00> : vector<28x224xf32>
    %15 = tpu.matmul %12, %14, %cst_16 {dimension_numbers = #tpu.dot_dimension_numbers<[1], [0], [0], [1], [0, 0, 1, 1], [], []>} : vector<28x30xbf16>, vector<30x224xbf16>, vector<28x224xf32> -> vector<28x224xf32>
    %16 = arith.addf %10, %15 : vector<28x224xf32>
    %c0_17 = arith.constant 0 : index
    %c0_18 = arith.constant 0 : index
    %17 = vector.load %arg3[%c0_17, %c0_18] : memref<1x224xf32, #tpu.memory_space<vmem>>, vector<1x224xf32>
    %18 = vector.broadcast %17 : vector<1x224xf32> to vector<28x224xf32>
    %19 = arith.addf %16, %18 : vector<28x224xf32>
    %cst_19 = arith.constant 0.000000e+00 : f32
    %20 = vector.broadcast %cst_19 : f32 to vector<28x224xf32>
    %21 = arith.maximumf %19, %20 : vector<28x224xf32>
    %c0_20 = arith.constant 0 : index
    %c0_21 = arith.constant 0 : index
    %c0_22 = arith.constant 0 : index
    %22 = vector.load %arg4[%c0_20, %c0_21, %c0_22] : memref<2x224x240xf32, #tpu.memory_space<vmem>>, vector<1x224x240xf32>
    %23 = vector.shape_cast %22 : vector<1x224x240xf32> to vector<224x240xf32>
    %cst_23 = arith.constant dense<0.000000e+00> : vector<28x240xf32>
    %24 = tpu.matmul %21, %23, %cst_23 {dimension_numbers = #tpu.dot_dimension_numbers<[1], [0], [0], [1], [0, 0, 1, 1], [], []>} : vector<28x224xf32>, vector<224x240xf32>, vector<28x240xf32> -> vector<28x240xf32>
    %c1_24 = arith.constant 1 : index
    %c0_25 = arith.constant 0 : index
    %c0_26 = arith.constant 0 : index
    %25 = vector.load %arg4[%c1_24, %c0_25, %c0_26] : memref<2x224x240xf32, #tpu.memory_space<vmem>>, vector<1x224x240xf32>
    %26 = vector.shape_cast %25 : vector<1x224x240xf32> to vector<224x240xf32>
    %cst_27 = arith.constant dense<0.000000e+00> : vector<28x240xf32>
    %27 = tpu.matmul %21, %26, %cst_27 {dimension_numbers = #tpu.dot_dimension_numbers<[1], [0], [0], [1], [0, 0, 1, 1], [], []>} : vector<28x224xf32>, vector<224x240xf32>, vector<28x240xf32> -> vector<28x240xf32>
    %28 = arith.maximumf %24, %27 : vector<28x240xf32>
    %c0_28 = arith.constant 0 : index
    %c0_29 = arith.constant 0 : index
    %c0_30 = arith.constant 0 : index
    %29 = vector.load %arg5[%c0_28, %c0_29, %c0_30] : memref<2x30x28xf32, #tpu.memory_space<vmem>>, vector<1x30x28xf32>
    %30 = vector.shape_cast %29 : vector<1x30x28xf32> to vector<30x28xf32>
    %cst_31 = arith.constant dense<0.000000e+00> : vector<30x240xf32>
    %31 = tpu.matmul %30, %28, %cst_31 {dimension_numbers = #tpu.dot_dimension_numbers<[1], [0], [0], [1], [0, 0, 1, 1], [], []>} : vector<30x28xf32>, vector<28x240xf32>, vector<30x240xf32> -> vector<30x240xf32>
    %c1_32 = arith.constant 1 : index
    %c0_33 = arith.constant 0 : index
    %c0_34 = arith.constant 0 : index
    %32 = vector.load %arg5[%c1_32, %c0_33, %c0_34] : memref<2x30x28xf32, #tpu.memory_space<vmem>>, vector<1x30x28xf32>
    %33 = vector.shape_cast %32 : vector<1x30x28xf32> to vector<30x28xf32>
    %cst_35 = arith.constant dense<0.000000e+00> : vector<30x240xf32>
    %34 = tpu.matmul %33, %28, %cst_35 {dimension_numbers = #tpu.dot_dimension_numbers<[1], [0], [0], [1], [0, 0, 1, 1], [], []>} : vector<30x28xf32>, vector<28x240xf32>, vector<30x240xf32> -> vector<30x240xf32>
    %35 = arith.maximumf %31, %34 : vector<30x240xf32>
    %36 = arith.truncf %35 : vector<30x240xf32> to vector<30x240xbf16>
    %c0_36 = arith.constant 0 : index
    %c0_37 = arith.constant 0 : index
    %c0_38 = arith.constant 0 : index
    %37 = vector.load %arg6[%c0_36, %c0_37, %c0_38] : memref<1x30x240xbf16, #tpu.memory_space<vmem>>, vector<1x30x240xbf16>
    %38 = vector.shape_cast %37 : vector<1x30x240xbf16> to vector<30x240xbf16>
    %39 = vector.shape_cast %36 : vector<30x240xbf16> to vector<1x30x240xbf16>
    tpu.vector_store %arg6[%c0_36, %c0_37, %c0_38], %39 {strides = array<i32>} : memref<1x30x240xbf16, #tpu.memory_space<vmem>>, vector<1x30x240xbf16>,
    return
  }
  func.func @transform_0(%arg0: i32) -> (i32, i32, i32) {
    %c0_i32 = arith.constant 0 : i32
    %c0_i32_0 = arith.constant 0 : i32
    %c0_i32_1 = arith.constant 0 : i32
    return %arg0, %c0_i32, %c0_i32_0 : i32, i32, i32
  }
  func.func @transform_1(%arg0: i32) -> (i32, i32, i32) {
    %c0_i32 = arith.constant 0 : i32
    %c0_i32_0 = arith.constant 0 : i32
    %c0_i32_1 = arith.constant 0 : i32
    %c0_i32_2 = arith.constant 0 : i32
    return %c0_i32, %c0_i32_0, %c0_i32_1 : i32, i32, i32
  }
  func.func @transform_2(%arg0: i32) -> (i32, i32) {
    %c0_i32 = arith.constant 0 : i32
    %c0_i32_0 = arith.constant 0 : i32
    %c0_i32_1 = arith.constant 0 : i32
    return %c0_i32, %c0_i32_0 : i32, i32
  }
  func.func @transform_3(%arg0: i32) -> (i32, i32, i32) {
    %c0_i32 = arith.constant 0 : i32
    %c0_i32_0 = arith.constant 0 : i32
    %c0_i32_1 = arith.constant 0 : i32
    %c0_i32_2 = arith.constant 0 : i32
    return %c0_i32, %c0_i32_0, %c0_i32_1 : i32, i32, i32
  }
  func.func @transform_4(%arg0: i32) -> (i32, i32, i32) {
    %c0_i32 = arith.constant 0 : i32
    %c0_i32_0 = arith.constant 0 : i32
    %c0_i32_1 = arith.constant 0 : i32
    %c0_i32_2 = arith.constant 0 : i32
    return %c0_i32, %c0_i32_0, %c0_i32_1 : i32, i32, i32
  }
  func.func @transform_5(%arg0: i32) -> (i32, i32, i32) {
    %c0_i32 = arith.constant 0 : i32
    %c0_i32_0 = arith.constant 0 : i32
    %c0_i32_1 = arith.constant 0 : i32
    return %arg0, %c0_i32, %c0_i32_0 : i32, i32, i32
  }
}

module attributes {stable_mosaic.version = 11 : i64} {
  func.func @_conv_block_kernel(%arg0: i32, %arg1: memref<1x16x128xbf16, #tpu.memory_space<vmem>>, %arg2: memref<3x128x224xbf16, #tpu.memory_space<vmem>>, %arg3: memref<1x224xf32, #tpu.memory_space<vmem>>, %arg4: memref<2x224x256xf32, #tpu.memory_space<vmem>>, %arg5: memref<2x16x14xf32, #tpu.memory_space<vmem>>, %arg6: memref<1x16x256xbf16, #tpu.memory_space<vmem>>) attributes {dimension_semantics = [#tpu.dimension_semantics<parallel>], iteration_bounds = array<i64: 2>, scalar_prefetch = 0 : i64, scratch_operands = 0 : i64, tpu.core_type = #tpu.core_type<tc>, window_params = [{transform_indices = @transform_0, window_bounds = array<i64: 1, 16, 128>}, {pipeline_mode = #tpu.pipeline_mode<synchronous>, transform_indices = @transform_1, window_bounds = array<i64: 3, 128, 224>}, {pipeline_mode = #tpu.pipeline_mode<synchronous>, transform_indices = @transform_2, window_bounds = array<i64: 1, 224>}, {pipeline_mode = #tpu.pipeline_mode<synchronous>, transform_indices = @transform_3, window_bounds = array<i64: 2, 224, 256>}, {pipeline_mode = #tpu.pipeline_mode<synchronous>, transform_indices = @transform_4, window_bounds = array<i64: 2, 16, 14>}, {transform_indices = @transform_5, window_bounds = array<i64: 1, 16, 256>}]} {
    %c0 = arith.constant 0 : index
    %c0_0 = arith.constant 0 : index
    %c0_1 = arith.constant 0 : index
    %0 = vector.load %arg1[%c0, %c0_0, %c0_1] : memref<1x16x128xbf16, #tpu.memory_space<vmem>>, vector<1x14x128xbf16>
    %1 = vector.shape_cast %0 : vector<1x14x128xbf16> to vector<14x128xbf16>
    %c0_2 = arith.constant 0 : index
    %c0_3 = arith.constant 0 : index
    %c0_4 = arith.constant 0 : index
    %2 = vector.load %arg2[%c0_2, %c0_3, %c0_4] : memref<3x128x224xbf16, #tpu.memory_space<vmem>>, vector<1x128x224xbf16>
    %3 = vector.shape_cast %2 : vector<1x128x224xbf16> to vector<128x224xbf16>
    %cst = arith.constant dense<0.000000e+00> : vector<14x224xf32>
    %4 = tpu.matmul %1, %3, %cst {dimension_numbers = #tpu.dot_dimension_numbers<[1], [0], [0], [1], [0, 0, 1, 1], [], []>} : vector<14x128xbf16>, vector<128x224xbf16>, vector<14x224xf32> -> vector<14x224xf32>
    %c0_5 = arith.constant 0 : index
    %c1 = arith.constant 1 : index
    %c0_6 = arith.constant 0 : index
    %5 = vector.load %arg1[%c0_5, %c1, %c0_6] : memref<1x16x128xbf16, #tpu.memory_space<vmem>>, vector<1x14x128xbf16>
    %6 = vector.shape_cast %5 : vector<1x14x128xbf16> to vector<14x128xbf16>
    %c1_7 = arith.constant 1 : index
    %c0_8 = arith.constant 0 : index
    %c0_9 = arith.constant 0 : index
    %7 = vector.load %arg2[%c1_7, %c0_8, %c0_9] : memref<3x128x224xbf16, #tpu.memory_space<vmem>>, vector<1x128x224xbf16>
    %8 = vector.shape_cast %7 : vector<1x128x224xbf16> to vector<128x224xbf16>
    %cst_10 = arith.constant dense<0.000000e+00> : vector<14x224xf32>
    %9 = tpu.matmul %6, %8, %cst_10 {dimension_numbers = #tpu.dot_dimension_numbers<[1], [0], [0], [1], [0, 0, 1, 1], [], []>} : vector<14x128xbf16>, vector<128x224xbf16>, vector<14x224xf32> -> vector<14x224xf32>
    %10 = arith.addf %4, %9 : vector<14x224xf32>
    %c0_11 = arith.constant 0 : index
    %c2 = arith.constant 2 : index
    %c0_12 = arith.constant 0 : index
    %11 = vector.load %arg1[%c0_11, %c2, %c0_12] : memref<1x16x128xbf16, #tpu.memory_space<vmem>>, vector<1x14x128xbf16>
    %12 = vector.shape_cast %11 : vector<1x14x128xbf16> to vector<14x128xbf16>
    %c2_13 = arith.constant 2 : index
    %c0_14 = arith.constant 0 : index
    %c0_15 = arith.constant 0 : index
    %13 = vector.load %arg2[%c2_13, %c0_14, %c0_15] : memref<3x128x224xbf16, #tpu.memory_space<vmem>>, vector<1x128x224xbf16>
    %14 = vector.shape_cast %13 : vector<1x128x224xbf16> to vector<128x224xbf16>
    %cst_16 = arith.constant dense<0.000000e+00> : vector<14x224xf32>
    %15 = tpu.matmul %12, %14, %cst_16 {dimension_numbers = #tpu.dot_dimension_numbers<[1], [0], [0], [1], [0, 0, 1, 1], [], []>} : vector<14x128xbf16>, vector<128x224xbf16>, vector<14x224xf32> -> vector<14x224xf32>
    %16 = arith.addf %10, %15 : vector<14x224xf32>
    %c0_17 = arith.constant 0 : index
    %c0_18 = arith.constant 0 : index
    %17 = vector.load %arg3[%c0_17, %c0_18] : memref<1x224xf32, #tpu.memory_space<vmem>>, vector<1x224xf32>
    %18 = vector.broadcast %17 : vector<1x224xf32> to vector<14x224xf32>
    %19 = arith.addf %16, %18 : vector<14x224xf32>
    %cst_19 = arith.constant 0.000000e+00 : f32
    %20 = vector.broadcast %cst_19 : f32 to vector<14x224xf32>
    %21 = arith.maximumf %19, %20 : vector<14x224xf32>
    %c0_20 = arith.constant 0 : index
    %c0_21 = arith.constant 0 : index
    %c0_22 = arith.constant 0 : index
    %22 = vector.load %arg4[%c0_20, %c0_21, %c0_22] : memref<2x224x256xf32, #tpu.memory_space<vmem>>, vector<1x224x256xf32>
    %23 = vector.shape_cast %22 : vector<1x224x256xf32> to vector<224x256xf32>
    %cst_23 = arith.constant dense<0.000000e+00> : vector<14x256xf32>
    %24 = tpu.matmul %21, %23, %cst_23 {dimension_numbers = #tpu.dot_dimension_numbers<[1], [0], [0], [1], [0, 0, 1, 1], [], []>} : vector<14x224xf32>, vector<224x256xf32>, vector<14x256xf32> -> vector<14x256xf32>
    %c1_24 = arith.constant 1 : index
    %c0_25 = arith.constant 0 : index
    %c0_26 = arith.constant 0 : index
    %25 = vector.load %arg4[%c1_24, %c0_25, %c0_26] : memref<2x224x256xf32, #tpu.memory_space<vmem>>, vector<1x224x256xf32>
    %26 = vector.shape_cast %25 : vector<1x224x256xf32> to vector<224x256xf32>
    %cst_27 = arith.constant dense<0.000000e+00> : vector<14x256xf32>
    %27 = tpu.matmul %21, %26, %cst_27 {dimension_numbers = #tpu.dot_dimension_numbers<[1], [0], [0], [1], [0, 0, 1, 1], [], []>} : vector<14x224xf32>, vector<224x256xf32>, vector<14x256xf32> -> vector<14x256xf32>
    %28 = arith.maximumf %24, %27 : vector<14x256xf32>
    %c0_28 = arith.constant 0 : index
    %c0_29 = arith.constant 0 : index
    %c0_30 = arith.constant 0 : index
    %29 = vector.load %arg5[%c0_28, %c0_29, %c0_30] : memref<2x16x14xf32, #tpu.memory_space<vmem>>, vector<1x16x14xf32>
    %30 = vector.shape_cast %29 : vector<1x16x14xf32> to vector<16x14xf32>
    %cst_31 = arith.constant dense<0.000000e+00> : vector<16x256xf32>
    %31 = tpu.matmul %30, %28, %cst_31 {dimension_numbers = #tpu.dot_dimension_numbers<[1], [0], [0], [1], [0, 0, 1, 1], [], []>} : vector<16x14xf32>, vector<14x256xf32>, vector<16x256xf32> -> vector<16x256xf32>
    %c1_32 = arith.constant 1 : index
    %c0_33 = arith.constant 0 : index
    %c0_34 = arith.constant 0 : index
    %32 = vector.load %arg5[%c1_32, %c0_33, %c0_34] : memref<2x16x14xf32, #tpu.memory_space<vmem>>, vector<1x16x14xf32>
    %33 = vector.shape_cast %32 : vector<1x16x14xf32> to vector<16x14xf32>
    %cst_35 = arith.constant dense<0.000000e+00> : vector<16x256xf32>
    %34 = tpu.matmul %33, %28, %cst_35 {dimension_numbers = #tpu.dot_dimension_numbers<[1], [0], [0], [1], [0, 0, 1, 1], [], []>} : vector<16x14xf32>, vector<14x256xf32>, vector<16x256xf32> -> vector<16x256xf32>
    %35 = arith.maximumf %31, %34 : vector<16x256xf32>
    %36 = arith.truncf %35 : vector<16x256xf32> to vector<16x256xbf16>
    %c0_36 = arith.constant 0 : index
    %c0_37 = arith.constant 0 : index
    %c0_38 = arith.constant 0 : index
    %37 = vector.load %arg6[%c0_36, %c0_37, %c0_38] : memref<1x16x256xbf16, #tpu.memory_space<vmem>>, vector<1x16x256xbf16>
    %38 = vector.shape_cast %37 : vector<1x16x256xbf16> to vector<16x256xbf16>
    %39 = vector.shape_cast %36 : vector<16x256xbf16> to vector<1x16x256xbf16>
    tpu.vector_store %arg6[%c0_36, %c0_37, %c0_38], %39 {strides = array<i32>} : memref<1x16x256xbf16, #tpu.memory_space<vmem>>, vector<1x16x256xbf16>,
    return
  }
  func.func @transform_0(%arg0: i32) -> (i32, i32, i32) {
    %c0_i32 = arith.constant 0 : i32
    %c0_i32_0 = arith.constant 0 : i32
    %c0_i32_1 = arith.constant 0 : i32
    return %arg0, %c0_i32, %c0_i32_0 : i32, i32, i32
  }
  func.func @transform_1(%arg0: i32) -> (i32, i32, i32) {
    %c0_i32 = arith.constant 0 : i32
    %c0_i32_0 = arith.constant 0 : i32
    %c0_i32_1 = arith.constant 0 : i32
    %c0_i32_2 = arith.constant 0 : i32
    return %c0_i32, %c0_i32_0, %c0_i32_1 : i32, i32, i32
  }
  func.func @transform_2(%arg0: i32) -> (i32, i32) {
    %c0_i32 = arith.constant 0 : i32
    %c0_i32_0 = arith.constant 0 : i32
    %c0_i32_1 = arith.constant 0 : i32
    return %c0_i32, %c0_i32_0 : i32, i32
  }
  func.func @transform_3(%arg0: i32) -> (i32, i32, i32) {
    %c0_i32 = arith.constant 0 : i32
    %c0_i32_0 = arith.constant 0 : i32
    %c0_i32_1 = arith.constant 0 : i32
    %c0_i32_2 = arith.constant 0 : i32
    return %c0_i32, %c0_i32_0, %c0_i32_1 : i32, i32, i32
  }
  func.func @transform_4(%arg0: i32) -> (i32, i32, i32) {
    %c0_i32 = arith.constant 0 : i32
    %c0_i32_0 = arith.constant 0 : i32
    %c0_i32_1 = arith.constant 0 : i32
    %c0_i32_2 = arith.constant 0 : i32
    return %c0_i32, %c0_i32_0, %c0_i32_1 : i32, i32, i32
  }
  func.func @transform_5(%arg0: i32) -> (i32, i32, i32) {
    %c0_i32 = arith.constant 0 : i32
    %c0_i32_0 = arith.constant 0 : i32
    %c0_i32_1 = arith.constant 0 : i32
    return %arg0, %c0_i32, %c0_i32_0 : i32, i32, i32
  }
}

module attributes {stable_mosaic.version = 11 : i64} {
  func.func @_conv_block_kernel(%arg0: i32, %arg1: memref<1x16x256xbf16, #tpu.memory_space<vmem>>, %arg2: memref<3x256x224xbf16, #tpu.memory_space<vmem>>, %arg3: memref<1x224xf32, #tpu.memory_space<vmem>>, %arg4: memref<2x224x144xf32, #tpu.memory_space<vmem>>, %arg5: memref<2x9x14xf32, #tpu.memory_space<vmem>>, %arg6: memref<1x9x144xbf16, #tpu.memory_space<vmem>>) attributes {dimension_semantics = [#tpu.dimension_semantics<parallel>], iteration_bounds = array<i64: 2>, scalar_prefetch = 0 : i64, scratch_operands = 0 : i64, tpu.core_type = #tpu.core_type<tc>, window_params = [{transform_indices = @transform_0, window_bounds = array<i64: 1, 16, 256>}, {pipeline_mode = #tpu.pipeline_mode<synchronous>, transform_indices = @transform_1, window_bounds = array<i64: 3, 256, 224>}, {pipeline_mode = #tpu.pipeline_mode<synchronous>, transform_indices = @transform_2, window_bounds = array<i64: 1, 224>}, {pipeline_mode = #tpu.pipeline_mode<synchronous>, transform_indices = @transform_3, window_bounds = array<i64: 2, 224, 144>}, {pipeline_mode = #tpu.pipeline_mode<synchronous>, transform_indices = @transform_4, window_bounds = array<i64: 2, 9, 14>}, {transform_indices = @transform_5, window_bounds = array<i64: 1, 9, 144>}]} {
    %c0 = arith.constant 0 : index
    %c0_0 = arith.constant 0 : index
    %c0_1 = arith.constant 0 : index
    %0 = vector.load %arg1[%c0, %c0_0, %c0_1] : memref<1x16x256xbf16, #tpu.memory_space<vmem>>, vector<1x14x256xbf16>
    %1 = vector.shape_cast %0 : vector<1x14x256xbf16> to vector<14x256xbf16>
    %c0_2 = arith.constant 0 : index
    %c0_3 = arith.constant 0 : index
    %c0_4 = arith.constant 0 : index
    %2 = vector.load %arg2[%c0_2, %c0_3, %c0_4] : memref<3x256x224xbf16, #tpu.memory_space<vmem>>, vector<1x256x224xbf16>
    %3 = vector.shape_cast %2 : vector<1x256x224xbf16> to vector<256x224xbf16>
    %cst = arith.constant dense<0.000000e+00> : vector<14x224xf32>
    %4 = tpu.matmul %1, %3, %cst {dimension_numbers = #tpu.dot_dimension_numbers<[1], [0], [0], [1], [0, 0, 1, 1], [], []>} : vector<14x256xbf16>, vector<256x224xbf16>, vector<14x224xf32> -> vector<14x224xf32>
    %c0_5 = arith.constant 0 : index
    %c1 = arith.constant 1 : index
    %c0_6 = arith.constant 0 : index
    %5 = vector.load %arg1[%c0_5, %c1, %c0_6] : memref<1x16x256xbf16, #tpu.memory_space<vmem>>, vector<1x14x256xbf16>
    %6 = vector.shape_cast %5 : vector<1x14x256xbf16> to vector<14x256xbf16>
    %c1_7 = arith.constant 1 : index
    %c0_8 = arith.constant 0 : index
    %c0_9 = arith.constant 0 : index
    %7 = vector.load %arg2[%c1_7, %c0_8, %c0_9] : memref<3x256x224xbf16, #tpu.memory_space<vmem>>, vector<1x256x224xbf16>
    %8 = vector.shape_cast %7 : vector<1x256x224xbf16> to vector<256x224xbf16>
    %cst_10 = arith.constant dense<0.000000e+00> : vector<14x224xf32>
    %9 = tpu.matmul %6, %8, %cst_10 {dimension_numbers = #tpu.dot_dimension_numbers<[1], [0], [0], [1], [0, 0, 1, 1], [], []>} : vector<14x256xbf16>, vector<256x224xbf16>, vector<14x224xf32> -> vector<14x224xf32>
    %10 = arith.addf %4, %9 : vector<14x224xf32>
    %c0_11 = arith.constant 0 : index
    %c2 = arith.constant 2 : index
    %c0_12 = arith.constant 0 : index
    %11 = vector.load %arg1[%c0_11, %c2, %c0_12] : memref<1x16x256xbf16, #tpu.memory_space<vmem>>, vector<1x14x256xbf16>
    %12 = vector.shape_cast %11 : vector<1x14x256xbf16> to vector<14x256xbf16>
    %c2_13 = arith.constant 2 : index
    %c0_14 = arith.constant 0 : index
    %c0_15 = arith.constant 0 : index
    %13 = vector.load %arg2[%c2_13, %c0_14, %c0_15] : memref<3x256x224xbf16, #tpu.memory_space<vmem>>, vector<1x256x224xbf16>
    %14 = vector.shape_cast %13 : vector<1x256x224xbf16> to vector<256x224xbf16>
    %cst_16 = arith.constant dense<0.000000e+00> : vector<14x224xf32>
    %15 = tpu.matmul %12, %14, %cst_16 {dimension_numbers = #tpu.dot_dimension_numbers<[1], [0], [0], [1], [0, 0, 1, 1], [], []>} : vector<14x256xbf16>, vector<256x224xbf16>, vector<14x224xf32> -> vector<14x224xf32>
    %16 = arith.addf %10, %15 : vector<14x224xf32>
    %c0_17 = arith.constant 0 : index
    %c0_18 = arith.constant 0 : index
    %17 = vector.load %arg3[%c0_17, %c0_18] : memref<1x224xf32, #tpu.memory_space<vmem>>, vector<1x224xf32>
    %18 = vector.broadcast %17 : vector<1x224xf32> to vector<14x224xf32>
    %19 = arith.addf %16, %18 : vector<14x224xf32>
    %cst_19 = arith.constant 0.000000e+00 : f32
    %20 = vector.broadcast %cst_19 : f32 to vector<14x224xf32>
    %21 = arith.maximumf %19, %20 : vector<14x224xf32>
    %c0_20 = arith.constant 0 : index
    %c0_21 = arith.constant 0 : index
    %c0_22 = arith.constant 0 : index
    %22 = vector.load %arg4[%c0_20, %c0_21, %c0_22] : memref<2x224x144xf32, #tpu.memory_space<vmem>>, vector<1x224x144xf32>
    %23 = vector.shape_cast %22 : vector<1x224x144xf32> to vector<224x144xf32>
    %cst_23 = arith.constant dense<0.000000e+00> : vector<14x144xf32>
    %24 = tpu.matmul %21, %23, %cst_23 {dimension_numbers = #tpu.dot_dimension_numbers<[1], [0], [0], [1], [0, 0, 1, 1], [], []>} : vector<14x224xf32>, vector<224x144xf32>, vector<14x144xf32> -> vector<14x144xf32>
    %c1_24 = arith.constant 1 : index
    %c0_25 = arith.constant 0 : index
    %c0_26 = arith.constant 0 : index
    %25 = vector.load %arg4[%c1_24, %c0_25, %c0_26] : memref<2x224x144xf32, #tpu.memory_space<vmem>>, vector<1x224x144xf32>
    %26 = vector.shape_cast %25 : vector<1x224x144xf32> to vector<224x144xf32>
    %cst_27 = arith.constant dense<0.000000e+00> : vector<14x144xf32>
    %27 = tpu.matmul %21, %26, %cst_27 {dimension_numbers = #tpu.dot_dimension_numbers<[1], [0], [0], [1], [0, 0, 1, 1], [], []>} : vector<14x224xf32>, vector<224x144xf32>, vector<14x144xf32> -> vector<14x144xf32>
    %28 = arith.maximumf %24, %27 : vector<14x144xf32>
    %c0_28 = arith.constant 0 : index
    %c0_29 = arith.constant 0 : index
    %c0_30 = arith.constant 0 : index
    %29 = vector.load %arg5[%c0_28, %c0_29, %c0_30] : memref<2x9x14xf32, #tpu.memory_space<vmem>>, vector<1x9x14xf32>
    %30 = vector.shape_cast %29 : vector<1x9x14xf32> to vector<9x14xf32>
    %cst_31 = arith.constant dense<0.000000e+00> : vector<9x144xf32>
    %31 = tpu.matmul %30, %28, %cst_31 {dimension_numbers = #tpu.dot_dimension_numbers<[1], [0], [0], [1], [0, 0, 1, 1], [], []>} : vector<9x14xf32>, vector<14x144xf32>, vector<9x144xf32> -> vector<9x144xf32>
    %c1_32 = arith.constant 1 : index
    %c0_33 = arith.constant 0 : index
    %c0_34 = arith.constant 0 : index
    %32 = vector.load %arg5[%c1_32, %c0_33, %c0_34] : memref<2x9x14xf32, #tpu.memory_space<vmem>>, vector<1x9x14xf32>
    %33 = vector.shape_cast %32 : vector<1x9x14xf32> to vector<9x14xf32>
    %cst_35 = arith.constant dense<0.000000e+00> : vector<9x144xf32>
    %34 = tpu.matmul %33, %28, %cst_35 {dimension_numbers = #tpu.dot_dimension_numbers<[1], [0], [0], [1], [0, 0, 1, 1], [], []>} : vector<9x14xf32>, vector<14x144xf32>, vector<9x144xf32> -> vector<9x144xf32>
    %35 = arith.maximumf %31, %34 : vector<9x144xf32>
    %36 = arith.truncf %35 : vector<9x144xf32> to vector<9x144xbf16>
    %c0_36 = arith.constant 0 : index
    %c0_37 = arith.constant 0 : index
    %c0_38 = arith.constant 0 : index
    %37 = vector.load %arg6[%c0_36, %c0_37, %c0_38] : memref<1x9x144xbf16, #tpu.memory_space<vmem>>, vector<1x9x144xbf16>
    %38 = vector.shape_cast %37 : vector<1x9x144xbf16> to vector<9x144xbf16>
    %39 = vector.shape_cast %36 : vector<9x144xbf16> to vector<1x9x144xbf16>
    tpu.vector_store %arg6[%c0_36, %c0_37, %c0_38], %39 {strides = array<i32>} : memref<1x9x144xbf16, #tpu.memory_space<vmem>>, vector<1x9x144xbf16>,
    return
  }
  func.func @transform_0(%arg0: i32) -> (i32, i32, i32) {
    %c0_i32 = arith.constant 0 : i32
    %c0_i32_0 = arith.constant 0 : i32
    %c0_i32_1 = arith.constant 0 : i32
    return %arg0, %c0_i32, %c0_i32_0 : i32, i32, i32
  }
  func.func @transform_1(%arg0: i32) -> (i32, i32, i32) {
    %c0_i32 = arith.constant 0 : i32
    %c0_i32_0 = arith.constant 0 : i32
    %c0_i32_1 = arith.constant 0 : i32
    %c0_i32_2 = arith.constant 0 : i32
    return %c0_i32, %c0_i32_0, %c0_i32_1 : i32, i32, i32
  }
  func.func @transform_2(%arg0: i32) -> (i32, i32) {
    %c0_i32 = arith.constant 0 : i32
    %c0_i32_0 = arith.constant 0 : i32
    %c0_i32_1 = arith.constant 0 : i32
    return %c0_i32, %c0_i32_0 : i32, i32
  }
  func.func @transform_3(%arg0: i32) -> (i32, i32, i32) {
    %c0_i32 = arith.constant 0 : i32
    %c0_i32_0 = arith.constant 0 : i32
    %c0_i32_1 = arith.constant 0 : i32
    %c0_i32_2 = arith.constant 0 : i32
    return %c0_i32, %c0_i32_0, %c0_i32_1 : i32, i32, i32
  }
  func.func @transform_4(%arg0: i32) -> (i32, i32, i32) {
    %c0_i32 = arith.constant 0 : i32
    %c0_i32_0 = arith.constant 0 : i32
    %c0_i32_1 = arith.constant 0 : i32
    %c0_i32_2 = arith.constant 0 : i32
    return %c0_i32, %c0_i32_0, %c0_i32_1 : i32, i32, i32
  }
  func.func @transform_5(%arg0: i32) -> (i32, i32, i32) {
    %c0_i32 = arith.constant 0 : i32
    %c0_i32_0 = arith.constant 0 : i32
    %c0_i32_1 = arith.constant 0 : i32
    return %arg0, %c0_i32, %c0_i32_0 : i32, i32, i32
  }
}

module attributes {stable_mosaic.version = 11 : i64} {
  func.func @_conv_block_kernel(%arg0: i32, %arg1: memref<1x9x144xbf16, #tpu.memory_space<vmem>>, %arg2: memref<3x144x112xbf16, #tpu.memory_space<vmem>>, %arg3: memref<1x112xf32, #tpu.memory_space<vmem>>, %arg4: memref<2x112x112xf32, #tpu.memory_space<vmem>>, %arg5: memref<2x7x7xf32, #tpu.memory_space<vmem>>, %arg6: memref<1x7x112xbf16, #tpu.memory_space<vmem>>) attributes {dimension_semantics = [#tpu.dimension_semantics<parallel>], iteration_bounds = array<i64: 2>, scalar_prefetch = 0 : i64, scratch_operands = 0 : i64, tpu.core_type = #tpu.core_type<tc>, window_params = [{transform_indices = @transform_0, window_bounds = array<i64: 1, 9, 144>}, {pipeline_mode = #tpu.pipeline_mode<synchronous>, transform_indices = @transform_1, window_bounds = array<i64: 3, 144, 112>}, {pipeline_mode = #tpu.pipeline_mode<synchronous>, transform_indices = @transform_2, window_bounds = array<i64: 1, 112>}, {pipeline_mode = #tpu.pipeline_mode<synchronous>, transform_indices = @transform_3, window_bounds = array<i64: 2, 112, 112>}, {pipeline_mode = #tpu.pipeline_mode<synchronous>, transform_indices = @transform_4, window_bounds = array<i64: 2, 7, 7>}, {transform_indices = @transform_5, window_bounds = array<i64: 1, 7, 112>}]} {
    %c0 = arith.constant 0 : index
    %c0_0 = arith.constant 0 : index
    %c0_1 = arith.constant 0 : index
    %0 = vector.load %arg1[%c0, %c0_0, %c0_1] : memref<1x9x144xbf16, #tpu.memory_space<vmem>>, vector<1x7x144xbf16>
    %1 = vector.shape_cast %0 : vector<1x7x144xbf16> to vector<7x144xbf16>
    %c0_2 = arith.constant 0 : index
    %c0_3 = arith.constant 0 : index
    %c0_4 = arith.constant 0 : index
    %2 = vector.load %arg2[%c0_2, %c0_3, %c0_4] : memref<3x144x112xbf16, #tpu.memory_space<vmem>>, vector<1x144x112xbf16>
    %3 = vector.shape_cast %2 : vector<1x144x112xbf16> to vector<144x112xbf16>
    %cst = arith.constant dense<0.000000e+00> : vector<7x112xf32>
    %4 = tpu.matmul %1, %3, %cst {dimension_numbers = #tpu.dot_dimension_numbers<[1], [0], [0], [1], [0, 0, 1, 1], [], []>} : vector<7x144xbf16>, vector<144x112xbf16>, vector<7x112xf32> -> vector<7x112xf32>
    %c0_5 = arith.constant 0 : index
    %c1 = arith.constant 1 : index
    %c0_6 = arith.constant 0 : index
    %5 = vector.load %arg1[%c0_5, %c1, %c0_6] : memref<1x9x144xbf16, #tpu.memory_space<vmem>>, vector<1x7x144xbf16>
    %6 = vector.shape_cast %5 : vector<1x7x144xbf16> to vector<7x144xbf16>
    %c1_7 = arith.constant 1 : index
    %c0_8 = arith.constant 0 : index
    %c0_9 = arith.constant 0 : index
    %7 = vector.load %arg2[%c1_7, %c0_8, %c0_9] : memref<3x144x112xbf16, #tpu.memory_space<vmem>>, vector<1x144x112xbf16>
    %8 = vector.shape_cast %7 : vector<1x144x112xbf16> to vector<144x112xbf16>
    %cst_10 = arith.constant dense<0.000000e+00> : vector<7x112xf32>
    %9 = tpu.matmul %6, %8, %cst_10 {dimension_numbers = #tpu.dot_dimension_numbers<[1], [0], [0], [1], [0, 0, 1, 1], [], []>} : vector<7x144xbf16>, vector<144x112xbf16>, vector<7x112xf32> -> vector<7x112xf32>
    %10 = arith.addf %4, %9 : vector<7x112xf32>
    %c0_11 = arith.constant 0 : index
    %c2 = arith.constant 2 : index
    %c0_12 = arith.constant 0 : index
    %11 = vector.load %arg1[%c0_11, %c2, %c0_12] : memref<1x9x144xbf16, #tpu.memory_space<vmem>>, vector<1x7x144xbf16>
    %12 = vector.shape_cast %11 : vector<1x7x144xbf16> to vector<7x144xbf16>
    %c2_13 = arith.constant 2 : index
    %c0_14 = arith.constant 0 : index
    %c0_15 = arith.constant 0 : index
    %13 = vector.load %arg2[%c2_13, %c0_14, %c0_15] : memref<3x144x112xbf16, #tpu.memory_space<vmem>>, vector<1x144x112xbf16>
    %14 = vector.shape_cast %13 : vector<1x144x112xbf16> to vector<144x112xbf16>
    %cst_16 = arith.constant dense<0.000000e+00> : vector<7x112xf32>
    %15 = tpu.matmul %12, %14, %cst_16 {dimension_numbers = #tpu.dot_dimension_numbers<[1], [0], [0], [1], [0, 0, 1, 1], [], []>} : vector<7x144xbf16>, vector<144x112xbf16>, vector<7x112xf32> -> vector<7x112xf32>
    %16 = arith.addf %10, %15 : vector<7x112xf32>
    %c0_17 = arith.constant 0 : index
    %c0_18 = arith.constant 0 : index
    %17 = vector.load %arg3[%c0_17, %c0_18] : memref<1x112xf32, #tpu.memory_space<vmem>>, vector<1x112xf32>
    %18 = vector.broadcast %17 : vector<1x112xf32> to vector<7x112xf32>
    %19 = arith.addf %16, %18 : vector<7x112xf32>
    %cst_19 = arith.constant 0.000000e+00 : f32
    %20 = vector.broadcast %cst_19 : f32 to vector<7x112xf32>
    %21 = arith.maximumf %19, %20 : vector<7x112xf32>
    %c0_20 = arith.constant 0 : index
    %c0_21 = arith.constant 0 : index
    %c0_22 = arith.constant 0 : index
    %22 = vector.load %arg4[%c0_20, %c0_21, %c0_22] : memref<2x112x112xf32, #tpu.memory_space<vmem>>, vector<1x112x112xf32>
    %23 = vector.shape_cast %22 : vector<1x112x112xf32> to vector<112x112xf32>
    %cst_23 = arith.constant dense<0.000000e+00> : vector<7x112xf32>
    %24 = tpu.matmul %21, %23, %cst_23 {dimension_numbers = #tpu.dot_dimension_numbers<[1], [0], [0], [1], [0, 0, 1, 1], [], []>} : vector<7x112xf32>, vector<112x112xf32>, vector<7x112xf32> -> vector<7x112xf32>
    %c1_24 = arith.constant 1 : index
    %c0_25 = arith.constant 0 : index
    %c0_26 = arith.constant 0 : index
    %25 = vector.load %arg4[%c1_24, %c0_25, %c0_26] : memref<2x112x112xf32, #tpu.memory_space<vmem>>, vector<1x112x112xf32>
    %26 = vector.shape_cast %25 : vector<1x112x112xf32> to vector<112x112xf32>
    %cst_27 = arith.constant dense<0.000000e+00> : vector<7x112xf32>
    %27 = tpu.matmul %21, %26, %cst_27 {dimension_numbers = #tpu.dot_dimension_numbers<[1], [0], [0], [1], [0, 0, 1, 1], [], []>} : vector<7x112xf32>, vector<112x112xf32>, vector<7x112xf32> -> vector<7x112xf32>
    %28 = arith.maximumf %24, %27 : vector<7x112xf32>
    %c0_28 = arith.constant 0 : index
    %c0_29 = arith.constant 0 : index
    %c0_30 = arith.constant 0 : index
    %29 = vector.load %arg5[%c0_28, %c0_29, %c0_30] : memref<2x7x7xf32, #tpu.memory_space<vmem>>, vector<1x7x7xf32>
    %30 = vector.shape_cast %29 : vector<1x7x7xf32> to vector<7x7xf32>
    %cst_31 = arith.constant dense<0.000000e+00> : vector<7x112xf32>
    %31 = tpu.matmul %30, %28, %cst_31 {dimension_numbers = #tpu.dot_dimension_numbers<[1], [0], [0], [1], [0, 0, 1, 1], [], []>} : vector<7x7xf32>, vector<7x112xf32>, vector<7x112xf32> -> vector<7x112xf32>
    %c1_32 = arith.constant 1 : index
    %c0_33 = arith.constant 0 : index
    %c0_34 = arith.constant 0 : index
    %32 = vector.load %arg5[%c1_32, %c0_33, %c0_34] : memref<2x7x7xf32, #tpu.memory_space<vmem>>, vector<1x7x7xf32>
    %33 = vector.shape_cast %32 : vector<1x7x7xf32> to vector<7x7xf32>
    %cst_35 = arith.constant dense<0.000000e+00> : vector<7x112xf32>
    %34 = tpu.matmul %33, %28, %cst_35 {dimension_numbers = #tpu.dot_dimension_numbers<[1], [0], [0], [1], [0, 0, 1, 1], [], []>} : vector<7x7xf32>, vector<7x112xf32>, vector<7x112xf32> -> vector<7x112xf32>
    %35 = arith.maximumf %31, %34 : vector<7x112xf32>
    %36 = arith.truncf %35 : vector<7x112xf32> to vector<7x112xbf16>
    %c0_36 = arith.constant 0 : index
    %c0_37 = arith.constant 0 : index
    %c0_38 = arith.constant 0 : index
    %37 = vector.load %arg6[%c0_36, %c0_37, %c0_38] : memref<1x7x112xbf16, #tpu.memory_space<vmem>>, vector<1x7x112xbf16>
    %38 = vector.shape_cast %37 : vector<1x7x112xbf16> to vector<7x112xbf16>
    %39 = vector.shape_cast %36 : vector<7x112xbf16> to vector<1x7x112xbf16>
    tpu.vector_store %arg6[%c0_36, %c0_37, %c0_38], %39 {strides = array<i32>} : memref<1x7x112xbf16, #tpu.memory_space<vmem>>, vector<1x7x112xbf16>,
    return
  }
  func.func @transform_0(%arg0: i32) -> (i32, i32, i32) {
    %c0_i32 = arith.constant 0 : i32
    %c0_i32_0 = arith.constant 0 : i32
    %c0_i32_1 = arith.constant 0 : i32
    return %arg0, %c0_i32, %c0_i32_0 : i32, i32, i32
  }
  func.func @transform_1(%arg0: i32) -> (i32, i32, i32) {
    %c0_i32 = arith.constant 0 : i32
    %c0_i32_0 = arith.constant 0 : i32
    %c0_i32_1 = arith.constant 0 : i32
    %c0_i32_2 = arith.constant 0 : i32
    return %c0_i32, %c0_i32_0, %c0_i32_1 : i32, i32, i32
  }
  func.func @transform_2(%arg0: i32) -> (i32, i32) {
    %c0_i32 = arith.constant 0 : i32
    %c0_i32_0 = arith.constant 0 : i32
    %c0_i32_1 = arith.constant 0 : i32
    return %c0_i32, %c0_i32_0 : i32, i32
  }
  func.func @transform_3(%arg0: i32) -> (i32, i32, i32) {
    %c0_i32 = arith.constant 0 : i32
    %c0_i32_0 = arith.constant 0 : i32
    %c0_i32_1 = arith.constant 0 : i32
    %c0_i32_2 = arith.constant 0 : i32
    return %c0_i32, %c0_i32_0, %c0_i32_1 : i32, i32, i32
  }
  func.func @transform_4(%arg0: i32) -> (i32, i32, i32) {
    %c0_i32 = arith.constant 0 : i32
    %c0_i32_0 = arith.constant 0 : i32
    %c0_i32_1 = arith.constant 0 : i32
    %c0_i32_2 = arith.constant 0 : i32
    return %c0_i32, %c0_i32_0, %c0_i32_1 : i32, i32, i32
  }
  func.func @transform_5(%arg0: i32) -> (i32, i32, i32) {
    %c0_i32 = arith.constant 0 : i32
    %c0_i32_0 = arith.constant 0 : i32
    %c0_i32_1 = arith.constant 0 : i32
    return %arg0, %c0_i32, %c0_i32_0 : i32, i32, i32
  }
}

module attributes {stable_mosaic.version = 11 : i64} {
  func.func @_conv_block_kernel(%arg0: i32, %arg1: memref<1x7x112xbf16, #tpu.memory_space<vmem>>, %arg2: memref<1x112x112xbf16, #tpu.memory_space<vmem>>, %arg3: memref<1x112xf32, #tpu.memory_space<vmem>>, %arg4: memref<2x112x48xf32, #tpu.memory_space<vmem>>, %arg5: memref<2x3x7xf32, #tpu.memory_space<vmem>>, %arg6: memref<1x3x48xbf16, #tpu.memory_space<vmem>>) attributes {dimension_semantics = [#tpu.dimension_semantics<parallel>], iteration_bounds = array<i64: 2>, scalar_prefetch = 0 : i64, scratch_operands = 0 : i64, tpu.core_type = #tpu.core_type<tc>, window_params = [{transform_indices = @transform_0, window_bounds = array<i64: 1, 7, 112>}, {pipeline_mode = #tpu.pipeline_mode<synchronous>, transform_indices = @transform_1, window_bounds = array<i64: 1, 112, 112>}, {pipeline_mode = #tpu.pipeline_mode<synchronous>, transform_indices = @transform_2, window_bounds = array<i64: 1, 112>}, {pipeline_mode = #tpu.pipeline_mode<synchronous>, transform_indices = @transform_3, window_bounds = array<i64: 2, 112, 48>}, {pipeline_mode = #tpu.pipeline_mode<synchronous>, transform_indices = @transform_4, window_bounds = array<i64: 2, 3, 7>}, {transform_indices = @transform_5, window_bounds = array<i64: 1, 3, 48>}]} {
    %c0 = arith.constant 0 : index
    %c0_0 = arith.constant 0 : index
    %c0_1 = arith.constant 0 : index
    %0 = vector.load %arg1[%c0, %c0_0, %c0_1] : memref<1x7x112xbf16, #tpu.memory_space<vmem>>, vector<1x7x112xbf16>
    %1 = vector.shape_cast %0 : vector<1x7x112xbf16> to vector<7x112xbf16>
    %c0_2 = arith.constant 0 : index
    %c0_3 = arith.constant 0 : index
    %c0_4 = arith.constant 0 : index
    %2 = vector.load %arg2[%c0_2, %c0_3, %c0_4] : memref<1x112x112xbf16, #tpu.memory_space<vmem>>, vector<1x112x112xbf16>
    %3 = vector.shape_cast %2 : vector<1x112x112xbf16> to vector<112x112xbf16>
    %cst = arith.constant dense<0.000000e+00> : vector<7x112xf32>
    %4 = tpu.matmul %1, %3, %cst {dimension_numbers = #tpu.dot_dimension_numbers<[1], [0], [0], [1], [0, 0, 1, 1], [], []>} : vector<7x112xbf16>, vector<112x112xbf16>, vector<7x112xf32> -> vector<7x112xf32>
    %c0_5 = arith.constant 0 : index
    %c0_6 = arith.constant 0 : index
    %5 = vector.load %arg3[%c0_5, %c0_6] : memref<1x112xf32, #tpu.memory_space<vmem>>, vector<1x112xf32>
    %6 = vector.broadcast %5 : vector<1x112xf32> to vector<7x112xf32>
    %7 = arith.addf %4, %6 : vector<7x112xf32>
    %cst_7 = arith.constant 0.000000e+00 : f32
    %8 = vector.broadcast %cst_7 : f32 to vector<7x112xf32>
    %9 = arith.maximumf %7, %8 : vector<7x112xf32>
    %c0_8 = arith.constant 0 : index
    %c0_9 = arith.constant 0 : index
    %c0_10 = arith.constant 0 : index
    %10 = vector.load %arg4[%c0_8, %c0_9, %c0_10] : memref<2x112x48xf32, #tpu.memory_space<vmem>>, vector<1x112x48xf32>
    %11 = vector.shape_cast %10 : vector<1x112x48xf32> to vector<112x48xf32>
    %cst_11 = arith.constant dense<0.000000e+00> : vector<7x48xf32>
    %12 = tpu.matmul %9, %11, %cst_11 {dimension_numbers = #tpu.dot_dimension_numbers<[1], [0], [0], [1], [0, 0, 1, 1], [], []>} : vector<7x112xf32>, vector<112x48xf32>, vector<7x48xf32> -> vector<7x48xf32>
    %c1 = arith.constant 1 : index
    %c0_12 = arith.constant 0 : index
    %c0_13 = arith.constant 0 : index
    %13 = vector.load %arg4[%c1, %c0_12, %c0_13] : memref<2x112x48xf32, #tpu.memory_space<vmem>>, vector<1x112x48xf32>
    %14 = vector.shape_cast %13 : vector<1x112x48xf32> to vector<112x48xf32>
    %cst_14 = arith.constant dense<0.000000e+00> : vector<7x48xf32>
    %15 = tpu.matmul %9, %14, %cst_14 {dimension_numbers = #tpu.dot_dimension_numbers<[1], [0], [0], [1], [0, 0, 1, 1], [], []>} : vector<7x112xf32>, vector<112x48xf32>, vector<7x48xf32> -> vector<7x48xf32>
    %16 = arith.maximumf %12, %15 : vector<7x48xf32>
    %c0_15 = arith.constant 0 : index
    %c0_16 = arith.constant 0 : index
    %c0_17 = arith.constant 0 : index
    %17 = vector.load %arg5[%c0_15, %c0_16, %c0_17] : memref<2x3x7xf32, #tpu.memory_space<vmem>>, vector<1x3x7xf32>
    %18 = vector.shape_cast %17 : vector<1x3x7xf32> to vector<3x7xf32>
    %cst_18 = arith.constant dense<0.000000e+00> : vector<3x48xf32>
    %19 = tpu.matmul %18, %16, %cst_18 {dimension_numbers = #tpu.dot_dimension_numbers<[1], [0], [0], [1], [0, 0, 1, 1], [], []>} : vector<3x7xf32>, vector<7x48xf32>, vector<3x48xf32> -> vector<3x48xf32>
    %c1_19 = arith.constant 1 : index
    %c0_20 = arith.constant 0 : index
    %c0_21 = arith.constant 0 : index
    %20 = vector.load %arg5[%c1_19, %c0_20, %c0_21] : memref<2x3x7xf32, #tpu.memory_space<vmem>>, vector<1x3x7xf32>
    %21 = vector.shape_cast %20 : vector<1x3x7xf32> to vector<3x7xf32>
    %cst_22 = arith.constant dense<0.000000e+00> : vector<3x48xf32>
    %22 = tpu.matmul %21, %16, %cst_22 {dimension_numbers = #tpu.dot_dimension_numbers<[1], [0], [0], [1], [0, 0, 1, 1], [], []>} : vector<3x7xf32>, vector<7x48xf32>, vector<3x48xf32> -> vector<3x48xf32>
    %23 = arith.maximumf %19, %22 : vector<3x48xf32>
    %24 = arith.truncf %23 : vector<3x48xf32> to vector<3x48xbf16>
    %c0_23 = arith.constant 0 : index
    %c0_24 = arith.constant 0 : index
    %c0_25 = arith.constant 0 : index
    %25 = vector.load %arg6[%c0_23, %c0_24, %c0_25] : memref<1x3x48xbf16, #tpu.memory_space<vmem>>, vector<1x3x48xbf16>
    %26 = vector.shape_cast %25 : vector<1x3x48xbf16> to vector<3x48xbf16>
    %27 = vector.shape_cast %24 : vector<3x48xbf16> to vector<1x3x48xbf16>
    tpu.vector_store %arg6[%c0_23, %c0_24, %c0_25], %27 {strides = array<i32>} : memref<1x3x48xbf16, #tpu.memory_space<vmem>>, vector<1x3x48xbf16>,
    return
  }
  func.func @transform_0(%arg0: i32) -> (i32, i32, i32) {
    %c0_i32 = arith.constant 0 : i32
    %c0_i32_0 = arith.constant 0 : i32
    %c0_i32_1 = arith.constant 0 : i32
    return %arg0, %c0_i32, %c0_i32_0 : i32, i32, i32
  }
  func.func @transform_1(%arg0: i32) -> (i32, i32, i32) {
    %c0_i32 = arith.constant 0 : i32
    %c0_i32_0 = arith.constant 0 : i32
    %c0_i32_1 = arith.constant 0 : i32
    %c0_i32_2 = arith.constant 0 : i32
    return %c0_i32, %c0_i32_0, %c0_i32_1 : i32, i32, i32
  }
  func.func @transform_2(%arg0: i32) -> (i32, i32) {
    %c0_i32 = arith.constant 0 : i32
    %c0_i32_0 = arith.constant 0 : i32
    %c0_i32_1 = arith.constant 0 : i32
    return %c0_i32, %c0_i32_0 : i32, i32
  }
  func.func @transform_3(%arg0: i32) -> (i32, i32, i32) {
    %c0_i32 = arith.constant 0 : i32
    %c0_i32_0 = arith.constant 0 : i32
    %c0_i32_1 = arith.constant 0 : i32
    %c0_i32_2 = arith.constant 0 : i32
    return %c0_i32, %c0_i32_0, %c0_i32_1 : i32, i32, i32
  }
  func.func @transform_4(%arg0: i32) -> (i32, i32, i32) {
    %c0_i32 = arith.constant 0 : i32
    %c0_i32_0 = arith.constant 0 : i32
    %c0_i32_1 = arith.constant 0 : i32
    %c0_i32_2 = arith.constant 0 : i32
    return %c0_i32, %c0_i32_0, %c0_i32_1 : i32, i32, i32
  }
  func.func @transform_5(%arg0: i32) -> (i32, i32, i32) {
    %c0_i32 = arith.constant 0 : i32
    %c0_i32_0 = arith.constant 0 : i32
    %c0_i32_1 = arith.constant 0 : i32
    return %arg0, %c0_i32, %c0_i32_0 : i32, i32, i32
  }
}

module attributes {stable_mosaic.version = 11 : i64} {
  func.func @_fc_logsoftmax_kernel(%arg0: memref<2x144xbf16, #tpu.memory_space<vmem>>, %arg1: memref<144x10xf32, #tpu.memory_space<vmem>>, %arg2: memref<1x10xf32, #tpu.memory_space<vmem>>, %arg3: memref<2x10xf32, #tpu.memory_space<vmem>>) attributes {dimension_semantics = [], scalar_prefetch = 0 : i64, scratch_operands = 0 : i64, tpu.core_type = #tpu.core_type<tc>} {
    %c0 = arith.constant 0 : index
    %c0_0 = arith.constant 0 : index
    %0 = vector.load %arg0[%c0, %c0_0] : memref<2x144xbf16, #tpu.memory_space<vmem>>, vector<2x144xbf16>
    %1 = arith.extf %0 : vector<2x144xbf16> to vector<2x144xf32>
    %c0_1 = arith.constant 0 : index
    %c0_2 = arith.constant 0 : index
    %2 = vector.load %arg1[%c0_1, %c0_2] : memref<144x10xf32, #tpu.memory_space<vmem>>, vector<144x10xf32>
    %cst = arith.constant dense<0.000000e+00> : vector<2x10xf32>
    %3 = tpu.matmul %1, %2, %cst {dimension_numbers = #tpu.dot_dimension_numbers<[1], [0], [0], [1], [0, 0, 1, 1], [], []>} : vector<2x144xf32>, vector<144x10xf32>, vector<2x10xf32> -> vector<2x10xf32>
    %c0_3 = arith.constant 0 : index
    %c0_4 = arith.constant 0 : index
    %4 = vector.load %arg2[%c0_3, %c0_4] : memref<1x10xf32, #tpu.memory_space<vmem>>, vector<1x10xf32>
    %5 = vector.broadcast %4 : vector<1x10xf32> to vector<2x10xf32>
    %6 = arith.addf %3, %5 : vector<2x10xf32>
    %cst_5 = arith.constant dense<0xFF800000> : vector<2xf32>
    %7 = vector.multi_reduction <maximumf>, %6, %cst_5 [1] : vector<2x10xf32> to vector<2xf32>
    %8 = vector.shape_cast %7 : vector<2xf32> to vector<2x1xf32>
    %9 = vector.broadcast %8 : vector<2x1xf32> to vector<2x10xf32>
    %10 = arith.subf %6, %9 : vector<2x10xf32>
    %11 = math.exp %10 : vector<2x10xf32>
    %cst_6 = arith.constant dense<0.000000e+00> : vector<2xf32>
    %12 = vector.multi_reduction <add>, %11, %cst_6 [1] : vector<2x10xf32> to vector<2xf32>
    %13 = vector.shape_cast %12 : vector<2xf32> to vector<2x1xf32>
    %14 = math.log %13 : vector<2x1xf32>
    %15 = arith.addf %14, %8 : vector<2x1xf32>
    %16 = vector.broadcast %15 : vector<2x1xf32> to vector<2x10xf32>
    %17 = arith.subf %6, %16 : vector<2x10xf32>
    %c0_7 = arith.constant 0 : index
    %c0_8 = arith.constant 0 : index
    %18 = vector.load %arg3[%c0_7, %c0_8] : memref<2x10xf32, #tpu.memory_space<vmem>>, vector<2x10xf32>
    tpu.vector_store %arg3[%c0_7, %c0_8], %17 {strides = array<i32>} : memref<2x10xf32, #tpu.memory_space<vmem>>, vector<2x10xf32>,
    return
  }
}

</mosaic_0001>

<bundles_post_ra>
// kernel: model_reducing_params_forward.7
= control target key start
LH: loop header
LB: loop body
LE: loop exit
PB: predicated region body
PF: predicated region fallthrough
CT: control target
= control target key end

     0   :  { %s1362_s18 = smov 0   ;;  %s1949_s0 = inlined_call_operand.vmem [shape: bf16[2,30,30], index: 0, kind: input, shape index: {}]   ;;  %s1950_s1 = inlined_call_operand.vmem [shape: bf16[3,30,224], index: 1, kind: input, shape index: {}]   ;;  %s1951_s2 = inlined_call_operand.vmem [shape: f32[1,224], index: 2, kind: input, shape index: {}]   ;;  %s1952_s3 = inlined_call_operand.vmem [shape: f32[2,224,240], index: 3, kind: input, shape index: {}]   ;;  %s1953_s4 = inlined_call_operand.vmem [shape: f32[2,30,28], index: 4, kind: input, shape index: {}]   ;;  %s1954_s5 = inlined_call_operand.vmem [shape: bf16[2,30,240], index: 5, kind: output, shape index: {}]  }
   0x1 LB: > { %s1116_s19 = sadd.s32 4294967295, %s1330_s18   ;;  %p1120_p0 = scmp.ge.s32.totalorder %s1330_s18, 1  ;;  %s1330_s18 = sphi %s1362_s18, %s15_s18  }
   0x2   : > { %p187_p1 = scmp.lt.s32.totalorder %s1330_s18, 3 }
   0x4   : > { %p188_p2 = pnand %p1120_p0, %p187_p1 }
   0x5   : > { %p215_p3 = scmp.lt.s32.totalorder (!%p188_p2), %s1116_s19, 1 }
   0x6   : > { %191 = sbr.rel (%p188_p2) target bundleno = 546 (0x222), region = 40 }
   0xb   : > { %v1139_v0 = vld [vmem:[%s1950_s1 + $0x30] sm:$0xf]  ;;  %v1300_v1 = vld [vmem:[%s1950_s1 + $0x34] sm:$0x70]  ;;  %vm291_vm0 = vcmask 1046528   ;;  %s1958_s19 = smov (!%p215_p3, %s1116_s19), 1 }
   0xc   : > { %v1140_v2 = vor.u32 %v1300_v1, %v1139_v0  ;;  %v1299_v3 = vld [vmem:[%s1950_s1 + $0x34] sm:$0xf]  ;;  %v1141_v4 = vld [vmem:[%s1950_s1 + $0x38] sm:$0x70]  ;;  %v1131_v5 = vld [vmem:[%s1950_s1 + $0x20] sm:$0xf] }
   0xd   : > { %v1144_v6 = vor.u32 %v1299_v3, %v1141_v4  ;;  %v1298_v7 = vld [vmem:[%s1950_s1 + $0x24] sm:$0xf0]  ;;  %v1297_v8 = vld [vmem:[%s1950_s1 + $0x24] sm:$0xf]  ;;  %v1133_v9 = vld [vmem:[%s1950_s1 + $0x28] sm:$0xf0] }
   0xe   : > { %v293_v10 = vsel %vm291_vm0, %v1140_v2, 0  ;;  %v1159_v11 = vld [vmem:[%s1950_s1 + $0x10] sm:$0xf]  ;;  %v1132_v13 = vor.u32 %v1298_v7, %v1131_v5  ;;  %v1296_v14 = vld [vmem:[%s1950_s1 + $0x14] sm:$0x70]  ;;  %v1136_v16 = vor.u32 %v1297_v8, %v1133_v9  ;;  %s1291_s17 = sshll.u32 %s1958_s19, 4 }
   0xf   : > { %304 = vmatpush.bf16.msra.mxu0 %v293_v10  ;;  %1312 = vmatpush.bf16.msra.mxu2 %v293_v10  ;;  %v296_v12 = vsel %vm291_vm0, %v1144_v6, 0  ;;  %v1295_v15 = vld [vmem:[%s1950_s1 + $0x14] sm:$0xf]  ;;  %v1160_v17 = vor.u32 %v1296_v14, %v1159_v11  ;;  %v1161_v18 = vld [vmem:[%s1950_s1 + $0x18] sm:$0x70]  ;;  %s1417_s26 = scalar_lea.vmem %s1949_s0, %s1291_s17  ;;  %vm284_vm2 = vcmask 244736  }
  0x10   : > { %323 = vmatpush.bf16.msra.mxu1 %v296_v12  ;;  %1314 = vmatpush.bf16.msra.mxu3 %v296_v12  ;;  %v1183_v19 = vld [vmem:[%s1950_s1 + $0x50] sm:$0xf]  ;;  %v1164_v20 = vor.u32 %v1295_v15, %v1161_v18  ;;  %v1304_v21 = vld [vmem:[%s1950_s1 + $0x54] sm:$0x70]  ;;  %v1303_v22 = vld [vmem:[%s1950_s1 + $0x54] sm:$0xf] }
  0x11   : > { %v1185_v23 = vld [vmem:[%s1950_s1 + $0x58] sm:$0x70]  ;;  %v1306_v24 = vld [vmem:[%s1417_s26] sm:$0xff]   ;;  %v1430_v25 = vld [vmem:[%s1417_s26 + $0x8] sm:$0xf]  ;;  %v363_v27 = vsel %vm291_vm0, %v1160_v17, 0  ;;  %v1184_v28 = vor.u32 %v1304_v21, %v1183_v19 }
  0x12   : > { %v234_v26 = vld [vmem:[%s1417_s26 + $0xc] sm:$0x7]  ;;  %v1188_v29 = vor.u32 %v1303_v22, %v1185_v23  ;;  %v246_v30 = vunpack.c.l.b16 %v1430_v25  ;;  %v252_v32 = vshrl.u32 %v1306_v24, 16  ;;  %v254_v33 = vshll.u32 %v1306_v24, 16  ;;  %v1151_v34 = vld [vmem:[%s1950_s1] sm:$0xf] }
  0x13   : > { %305 = vmatpush.bf16.msra.mxu0 %v1132_v13  ;;  %1313 = vmatpush.bf16.msra.mxu2 %v1132_v13  ;;  %v247_v31 = vunpack.c.l.b16 %v234_v26  ;;  %v1294_v35 = vld [vmem:[%s1950_s1 + $0x4] sm:$0xf0]  ;;  %v366_v36 = vsel %vm291_vm0, %v1164_v20, 0  ;;  %v444_v37 = vsel %vm291_vm0, %v1184_v28, 0  ;;  %v1293_v39 = vld [vmem:[%s1950_s1 + $0x4] sm:$0xf] }
  0x14   : > { %324 = vmatpush.bf16.msra.mxu1 %v1136_v16  ;;  %1315 = vmatpush.bf16.msra.mxu3 %v1136_v16  ;;  %v447_v38 = vsel %vm291_vm0, %v1188_v29, 0  ;;  %v256_v41 = vrot.slane %v254_v33, 1  ;;  %v1152_v42 = vor.u32 %v1294_v35, %v1151_v34  ;;  %v1153_v43 = vld [vmem:[%s1950_s1 + $0x8] sm:$0xf0]  ;;  %v1175_v44 = vld [vmem:[%s1950_s1 + $0x40] sm:$0xf] }
  0x15   : > { %v249_v40 = vpack.c.b16 %v247_v31, %v246_v30  ;;  %v1156_v45 = vor.u32 %v1293_v39, %v1153_v43  ;;  %v1302_v46 = vld [vmem:[%s1950_s1 + $0x44] sm:$0xf0]  ;;  %v1301_v47 = vld [vmem:[%s1950_s1 + $0x44] sm:$0xf]  ;;  %v1177_v48 = vld [vmem:[%s1950_s1 + $0x48] sm:$0xf0] }
  0x16   : > { %v257_v49 = vor.u32 %v256_v41, %v252_v32  ;;  %v1176_v52 = vor.u32 %v1302_v46, %v1175_v44  ;;  %vm250_vm1 = vsmask.f32 7424  ;;  %v1180_v53 = vor.u32 %v1301_v47, %v1177_v48  ;;  %v1309_v57 = vld [vmem:[%s1417_s26] sm:$0xf0]  ;;  %v1310_v58 = vld [vmem:[%s1417_s26] sm:$0xe] }
  0x17   : > { %374 = vmatpush.bf16.msrb.mxu2 %v363_v27  ;;  %455 = vmatpush.bf16.msrb.mxu0 %v444_v37  ;;  %v259_v50 = vshll.u32 %v249_v40, 16  ;;  %v263_v51 = vshrl.u32 %v249_v40, 16  ;;  %v1311_v59 = vor.u32 %v1310_v58, %v1309_v57  ;;  %v417_v61 = vrot.slane %v249_v40, 1  ;;  %v229_v63 = vld [vmem:[%s1417_s26 + $0xc] sm:$0x3]  ;;  %v547_v2 = vld [vmem:[%s1952_s3 + $0xf0] sm:$0xff] }
  0x18   : > { %393 = vmatpush.bf16.msrb.mxu3 %v366_v36  ;;  %474 = vmatpush.bf16.msrb.mxu1 %v447_v38  ;;  %v337_v0 = vunpack.c.l.b16 %v229_v63  ;;  %v548_v3 = vld [vmem:[%s1952_s3 + $0xf8] sm:$0xff]  ;;  %v545_v4 = vld [vmem:[%s1952_s3 + $0xe0] sm:$0xff]  ;;  %v546_v5 = vld [vmem:[%s1952_s3 + $0xe8] sm:$0xff]  ;;  %vm573_vm3 = vcmask 785408   ;;  %vm900_vm4 = vcmask 1043456   ;;  %vm887_vm5 = vcmask 228352  }
  0x19   : > { %v261_v54 = vrot.slane %v259_v50, 1  ;;  %v416_v60 = vrot.slane %v1311_v59, 1  ;;  %v543_v6 = vld [vmem:[%s1952_s3 + $0xd0] sm:$0xff]  ;;  %v544_v7 = vld [vmem:[%s1952_s3 + $0xd8] sm:$0xff]  ;;  %v541_v8 = vld [vmem:[%s1952_s3 + $0xc0] sm:$0xff]  ;;  %s1292_s13 = sshll.u32 %s1958_s19, 5 }
  0x1a   : > { %v338_v1 = vpack.c.b16 %v337_v0, %v246_v30  ;;  %v542_v9 = vld [vmem:[%s1952_s3 + $0xc8] sm:$0xff]  ;;  %v539_v10 = vld [vmem:[%s1952_s3 + $0xb0] sm:$0xff]  ;;  %v540_v12 = vld [vmem:[%s1952_s3 + $0xb8] sm:$0xff]  ;;  %vm1052_vm6 = vcmask 916484   ;;  %s224_s16 = scalar_lea.vmem %s1954_s5, %s1292_s13  ;;  %vm1057_vm8 = vcmask 1042432   ;;  %vm1058_vm9 = vcmask 915460  }
  0x1b   : > { %375 = vmatpush.bf16.msrb.mxu2 %v1152_v42  ;;  %456 = vmatpush.bf16.msrb.mxu0 %v1176_v52  ;;  %v262_v55 = vsel %vm250_vm1, %v257_v49, %v261_v54  ;;  %v265_v56 = vor.u32 %v263_v51, %v261_v54  ;;  %v418_v62 = vsel %vm291_vm0, %v416_v60, %v417_v61  ;;  %v571_v11 = vld [vmem:[%s1952_s3 + $0x1b0] sm:$0xff]  ;;  %v572_v13 = vld [vmem:[%s1952_s3 + $0x1b8] sm:$0xff]  ;;  %v537_v14 = vld [vmem:[%s1952_s3 + $0xa0] sm:$0xff] }
  0x1c   : > { %394 = vmatpush.bf16.msrb.mxu3 %v1156_v45  ;;  %475 = vmatpush.bf16.msrb.mxu1 %v1180_v53  ;;  %v569_v15 = vld [vmem:[%s1952_s3 + $0x1a0] sm:$0xff]  ;;  %v538_v16 = vld [vmem:[%s1952_s3 + $0xa8] sm:$0xff]  ;;  %v535_v18 = vld [vmem:[%s1952_s3 + $0x90] sm:$0xff] }
  0x1d   : > { %1145 = vmatmul.msk.bf16.vlgmr.msra.gmra.mxu0 %vm284_vm2, %v262_v55  ;;  %1147 = vmatmul.msk.bf16.vlgmr.msra.gmra.mxu1 %vm284_vm2, %v262_v55  ;;  %v570_v17 = vld [vmem:[%s1952_s3 + $0x1a8] sm:$0xff]  ;;  %v567_v19 = vld [vmem:[%s1952_s3 + $0x190] sm:$0xff]  ;;  %v536_v20 = vld [vmem:[%s1952_s3 + $0x98] sm:$0xff] }
  0x1e   : > { %1146 = vmatmul.msk.bf16.vlgmr.msra.gmra.mxu2 %vm284_vm2, %v265_v56  ;;  %1148 = vmatmul.msk.bf16.vlgmr.msra.gmra.mxu3 %vm284_vm2, %v265_v56  ;;  %v568_v21 = vld [vmem:[%s1952_s3 + $0x198] sm:$0xff]  ;;  %v533_v22 = vld [vmem:[%s1952_s3 + $0x80] sm:$0xff]  ;;  %v566_v25 = vld [vmem:[%s1952_s3 + $0x188] sm:$0xff] }
  0x1f   : > { %586 = vmatpush.msra.mxu2 %v547_v2  ;;  %644 = vmatpush.msra.mxu0 %v548_v3  ;;  %v565_v23 = vld [vmem:[%s1952_s3 + $0x180] sm:$0xff]  ;;  %v531_v26 = vld [vmem:[%s1952_s3 + $0x70] sm:$0xff]  ;;  %v532_v28 = vld [vmem:[%s1952_s3 + $0x78] sm:$0xff] }
  0x20   : > { %619 = vmatpush.msra.mxu3 %v571_v11  ;;  %677 = vmatpush.msra.mxu1 %v572_v13  ;;  %v563_v27 = vld [vmem:[%s1952_s3 + $0x170] sm:$0xff]  ;;  %v564_v29 = vld [vmem:[%s1952_s3 + $0x178] sm:$0xff]  ;;  %v529_v30 = vld [vmem:[%s1952_s3 + $0x60] sm:$0xff] }
  0x21   : > { %587 = vmatpush.msra.mxu2 %v545_v4  ;;  %645 = vmatpush.msra.mxu0 %v546_v5  ;;  %v561_v31 = vld [vmem:[%s1952_s3 + $0x160] sm:$0xff]  ;;  %v530_v32 = vld [vmem:[%s1952_s3 + $0x68] sm:$0xff]  ;;  %v527_v34 = vld [vmem:[%s1952_s3 + $0x50] sm:$0xff] }
  0x22   : > { %620 = vmatpush.msra.mxu3 %v569_v15  ;;  %678 = vmatpush.msra.mxu1 %v570_v17  ;;  %v562_v33 = vld [vmem:[%s1952_s3 + $0x168] sm:$0xff]  ;;  %v559_v35 = vld [vmem:[%s1952_s3 + $0x150] sm:$0xff]  ;;  %v528_v36 = vld [vmem:[%s1952_s3 + $0x58] sm:$0xff] }
  0x23   : > { %588 = vmatpush.msra.mxu2 %v543_v6  ;;  %646 = vmatpush.msra.mxu0 %v544_v7  ;;  %v560_v37 = vld [vmem:[%s1952_s3 + $0x158] sm:$0xff]  ;;  %v525_v38 = vld [vmem:[%s1952_s3 + $0x40] sm:$0xff]  ;;  %v526_v40 = vld [vmem:[%s1952_s3 + $0x48] sm:$0xff] }
  0x24   : > { %621 = vmatpush.msra.mxu3 %v567_v19  ;;  %679 = vmatpush.msra.mxu1 %v568_v21  ;;  %v557_v39 = vld [vmem:[%s1952_s3 + $0x140] sm:$0xff]  ;;  %v558_v41 = vld [vmem:[%s1952_s3 + $0x148] sm:$0xff]  ;;  %v523_v42 = vld [vmem:[%s1952_s3 + $0x30] sm:$0xff] }
  0x25   : > { %589 = vmatpush.msra.mxu2 %v541_v8  ;;  %647 = vmatpush.msra.mxu0 %v542_v9  ;;  %v555_v43 = vld [vmem:[%s1952_s3 + $0x130] sm:$0xff]  ;;  %v524_v44 = vld [vmem:[%s1952_s3 + $0x38] sm:$0xff]  ;;  %v521_v46 = vld [vmem:[%s1952_s3 + $0x20] sm:$0xff] }
  0x26   : > { %622 = vmatpush.msra.mxu3 %v565_v23  ;;  %680 = vmatpush.msra.mxu1 %v566_v25  ;;  %v556_v45 = vld [vmem:[%s1952_s3 + $0x138] sm:$0xff]  ;;  %v553_v47 = vld [vmem:[%s1952_s3 + $0x120] sm:$0xff]  ;;  %v522_v48 = vld [vmem:[%s1952_s3 + $0x28] sm:$0xff] }
  0x27   : > { %590 = vmatpush.msra.mxu2 %v539_v10  ;;  %648 = vmatpush.msra.mxu0 %v540_v12  ;;  %v554_v49 = vld [vmem:[%s1952_s3 + $0x128] sm:$0xff]  ;;  %v519_v50 = vld [vmem:[%s1952_s3 + $0x10] sm:$0xff]  ;;  %v520_v52 = vld [vmem:[%s1952_s3 + $0x18] sm:$0xff] }
  0x28   : > { %623 = vmatpush.msra.mxu3 %v563_v27  ;;  %681 = vmatpush.msra.mxu1 %v564_v29  ;;  %v551_v51 = vld [vmem:[%s1952_s3 + $0x110] sm:$0xff]  ;;  %v552_v53 = vld [vmem:[%s1952_s3 + $0x118] sm:$0xff]  ;;  %v517_v54 = vld [vmem:[%s1952_s3] sm:$0xff] }
  0x29   : > { %591 = vmatpush.msra.mxu2 %v537_v14  ;;  %649 = vmatpush.msra.mxu0 %v538_v16  ;;  %v549_v55 = vld [vmem:[%s1952_s3 + $0x100] sm:$0xff]  ;;  %v518_v56 = vld [vmem:[%s1952_s3 + $0x8] sm:$0xff]  ;;  %v1231_v60 = vld [vmem:[%s1952_s3 + $0x2b0] sm:$0xff] }
  0x2a   : > { %624 = vmatpush.msra.mxu3 %v561_v31  ;;  %682 = vmatpush.msra.mxu1 %v562_v33  ;;  %v550_v57 = vld [vmem:[%s1952_s3 + $0x108] sm:$0xff]  ;;  %v1227_v0 = vld [vmem:[%s1952_s3 + $0x290] sm:$0xff]  ;;  %v1225_v4 = vld [vmem:[%s1952_s3 + $0x280] sm:$0xff] }
  0x2b   : > { %592 = vmatpush.msra.mxu2 %v535_v18  ;;  %650 = vmatpush.msra.mxu0 %v536_v20  ;;  %v1230_v63 = vld [vmem:[%s1952_s3 + $0x2a8] sm:$0xff]  ;;  %v1223_v8 = vld [vmem:[%s1952_s3 + $0x270] sm:$0xff]  ;;  %v1224_v10 = vld [vmem:[%s1952_s3 + $0x278] sm:$0xff] }
  0x2c   : > { %625 = vmatpush.msra.mxu3 %v559_v35  ;;  %683 = vmatpush.msra.mxu1 %v560_v37  ;;  %v1226_v5 = vld [vmem:[%s1952_s3 + $0x288] sm:$0xff]  ;;  %v1255_v9 = vld [vmem:[%s1952_s3 + $0x370] sm:$0xff]  ;;  %v1256_v11 = vld [vmem:[%s1952_s3 + $0x378] sm:$0xff] }
  0x2d   : > { %1189 = vmatmul.msk.bf16.vlgmr.msrb.gmra.mxu0 %vm284_vm2, %v418_v62  ;;  %1191 = vmatmul.msk.bf16.vlgmr.msrb.gmra.mxu1 %vm284_vm2, %v418_v62  ;;  %v1229_v62 = vld [vmem:[%s1952_s3 + $0x2a0] sm:$0xff]  ;;  %v1222_v14 = vld [vmem:[%s1952_s3 + $0x268] sm:$0xff]  ;;  %v1219_v16 = vld [vmem:[%s1952_s3 + $0x250] sm:$0xff] }
  0x2e   : > { %1165 = vmatmul.msk.bf16.vlgmr.msrb.gmra.mxu2 %vm284_vm2, %v1306_v24  ;;  %1167 = vmatmul.msk.bf16.vlgmr.msrb.gmra.mxu3 %vm284_vm2, %v1306_v24  ;;  %v534_v24 = vld [vmem:[%s1952_s3 + $0x88] sm:$0xff]  ;;  %v1221_v12 = vld [vmem:[%s1952_s3 + $0x260] sm:$0xff]  ;;  %v1251_v17 = vld [vmem:[%s1952_s3 + $0x350] sm:$0xff] }
  0x2f   : > { %593 = vmatpush.msra.mxu2 %v533_v22  ;;  %651 = vmatpush.msra.mxu0 %v534_v24  ;;  %v1253_v13 = vld [vmem:[%s1952_s3 + $0x360] sm:$0xff]  ;;  %v1254_v15 = vld [vmem:[%s1952_s3 + $0x368] sm:$0xff]  ;;  %v1220_v18 = vld [vmem:[%s1952_s3 + $0x258] sm:$0xff] }
  0x30   : > { %626 = vmatpush.msra.mxu3 %v557_v39  ;;  %684 = vmatpush.msra.mxu1 %v558_v41  ;;  %v1252_v19 = vld [vmem:[%s1952_s3 + $0x358] sm:$0xff]  ;;  %v1217_v22 = vld [vmem:[%s1952_s3 + $0x240] sm:$0xff]  ;;  %v1218_v24 = vld [vmem:[%s1952_s3 + $0x248] sm:$0xff] }
  0x31   : > { %594 = vmatpush.msra.mxu2 %v531_v26  ;;  %652 = vmatpush.msra.mxu0 %v532_v28  ;;  %v1249_v23 = vld [vmem:[%s1952_s3 + $0x340] sm:$0xff]  ;;  %v1250_v25 = vld [vmem:[%s1952_s3 + $0x348] sm:$0xff]  ;;  %v1215_v26 = vld [vmem:[%s1952_s3 + $0x230] sm:$0xff] }
  0x32   : > { %627 = vmatpush.msra.mxu3 %v555_v43  ;;  %685 = vmatpush.msra.mxu1 %v556_v45  ;;  %v1247_v27 = vld [vmem:[%s1952_s3 + $0x330] sm:$0xff]  ;;  %v1216_v28 = vld [vmem:[%s1952_s3 + $0x238] sm:$0xff]  ;;  %v1245_v33 = vld [vmem:[%s1952_s3 + $0x320] sm:$0xff] }
  0x33   : > { %595 = vmatpush.msra.mxu2 %v529_v30  ;;  %653 = vmatpush.msra.mxu0 %v530_v32  ;;  %v1248_v31 = vld [vmem:[%s1952_s3 + $0x338] sm:$0xff]  ;;  %v1213_v32 = vld [vmem:[%s1952_s3 + $0x220] sm:$0xff]  ;;  %v1211_v37 = vld [vmem:[%s1952_s3 + $0x210] sm:$0xff] }
  0x34   : > { %628 = vmatpush.msra.mxu3 %v553_v47  ;;  %686 = vmatpush.msra.mxu1 %v554_v49  ;;  %v495_v35 = vld [vmem:[%s1951_s2] sm:$0x3]  ;;  %v1212_v39 = vld [vmem:[%s1952_s3 + $0x218] sm:$0xff]  ;;  %v1210_v45 = vld [vmem:[%s1952_s3 + $0x208] sm:$0xff] }
  0x35   : > { %596 = vmatpush.msra.mxu2 %v527_v34  ;;  %654 = vmatpush.msra.mxu0 %v528_v36  ;;  %v1214_v34 = vld [vmem:[%s1952_s3 + $0x228] sm:$0xff]  ;;  %v1209_v41 = vld [vmem:[%s1952_s3 + $0x200] sm:$0xff]  ;;  %vm1936_vm7 = vmor %vm1052_vm6, %vm900_vm4 }
  0x36   : > { %629 = vmatpush.msra.mxu3 %v551_v51  ;;  %687 = vmatpush.msra.mxu1 %v552_v53  ;;  %v1246_v36 = vld [vmem:[%s1952_s3 + $0x328] sm:$0xff]  ;;  %v1207_v51 = vld [vmem:[%s1952_s3 + $0x1f0] sm:$0xff]  ;;  %v1208_v53 = vld [vmem:[%s1952_s3 + $0x1f8] sm:$0xff] }
  0x37   : > { %597 = vmatpush.msra.mxu2 %v525_v38  ;;  %655 = vmatpush.msra.mxu0 %v526_v40  ;;  %v1243_v38 = vld [vmem:[%s1952_s3 + $0x310] sm:$0xff]  ;;  %v1244_v40 = vld [vmem:[%s1952_s3 + $0x318] sm:$0xff]  ;;  %vm1059_vm10 = vmor %vm1058_vm9, %vm1057_vm8 }
  0x38   : > { %630 = vmatpush.msra.mxu3 %v549_v55  ;;  %688 = vmatpush.msra.mxu1 %v550_v57  ;;  %v1205_v57 = vld [vmem:[%s1952_s3 + $0x1e0] sm:$0xff] }
  0x39   : > { %598 = vmatpush.msra.mxu2 %v523_v42  ;;  %656 = vmatpush.msra.mxu0 %v524_v44  ;;  %v1241_v42 = vld [vmem:[%s1952_s3 + $0x300] sm:$0xff] }
  0x3a   : > { %792 = vmatpush.msrb.mxu3 %v1255_v9  ;;  %850 = vmatpush.msrb.mxu1 %v1256_v11 }
  0x3b   : > { %599 = vmatpush.msra.mxu2 %v521_v46  ;;  %657 = vmatpush.msra.mxu0 %v522_v48  ;;  %v1242_v46 = vld [vmem:[%s1952_s3 + $0x308] sm:$0xff]  ;;  %v1786_v48 = vperm.slane %v495_v35, 0 }
  0x3c   : > { %793 = vmatpush.msrb.mxu3 %v1253_v13  ;;  %851 = vmatpush.msrb.mxu1 %v1254_v15  ;;  %v1201_v13 = vld [vmem:[%s1952_s3 + $0x1c0] sm:$0xff] }
  0x3d   : > { %1190 = vmatmul.msk.bf16.gmra.mxu0 %vm284_vm2, %v417_v61  ;;  %1192 = vmatmul.msk.bf16.gmra.mxu1 %vm284_vm2, %v417_v61  ;;  %v1232_v61 = vld [vmem:[%s1952_s3 + $0x2b8] sm:$0xff] }
  0x3e   : > { %1166 = vmatmul.msk.bf16.gmra.mxu2 %vm284_vm2, %v338_v1  ;;  %1168 = vmatmul.msk.bf16.gmra.mxu3 %vm284_vm2, %v338_v1  ;;  %v1228_v1 = vld [vmem:[%s1952_s3 + $0x298] sm:$0xff] }
  0x3f   : > { %600 = vmatpush.msra.mxu2 %v519_v50  ;;  %658 = vmatpush.msra.mxu0 %v520_v52  ;;  %v1789_v50 = vperm.slane %v495_v35, 1  ;;  %v1239_v52 = vld [vmem:[%s1952_s3 + $0x2f0] sm:$0xff] }
  0x40   : > { %794 = vmatpush.msrb.mxu3 %v1251_v17  ;;  %852 = vmatpush.msrb.mxu1 %v1252_v19  ;;  %v1202_v17 = vld [vmem:[%s1952_s3 + $0x1c8] sm:$0xff] }
  0x41   : > { %601 = vmatpush.msra.mxu2 %v517_v54  ;;  %659 = vmatpush.msra.mxu0 %v518_v56  ;;  %v1240_v56 = vld [vmem:[%s1952_s3 + $0x2f8] sm:$0xff] }
  0x42   : > { %795 = vmatpush.msrb.mxu3 %v1249_v23  ;;  %853 = vmatpush.msrb.mxu1 %v1250_v25 }
  0x43   : > { %759 = vmatpush.msrb.mxu2 %v1231_v60  ;;  %817 = vmatpush.msrb.mxu0 %v1232_v61  ;;  %v1238_v60 = vld [vmem:[%s1952_s3 + $0x2e8] sm:$0xff]  ;;  %v1203_v61 = vld [vmem:[%s1952_s3 + $0x1d0] sm:$0xff] }
  0x44   : > { %796 = vmatpush.msrb.mxu3 %v1247_v27  ;;  %854 = vmatpush.msrb.mxu1 %v1248_v31 }
  0x45   : > { %760 = vmatpush.msrb.mxu2 %v1229_v62  ;;  %818 = vmatpush.msrb.mxu0 %v1230_v63 }
  0x46   : > { %797 = vmatpush.msrb.mxu3 %v1245_v33  ;;  %855 = vmatpush.msrb.mxu1 %v1246_v36 }
  0x47   : > { %761 = vmatpush.msrb.mxu2 %v1227_v0  ;;  %819 = vmatpush.msrb.mxu0 %v1228_v1 }
  0x48   : > { %798 = vmatpush.msrb.mxu3 %v1243_v38  ;;  %856 = vmatpush.msrb.mxu1 %v1244_v40 }
  0x49   : > { %762 = vmatpush.msrb.mxu2 %v1225_v4  ;;  %820 = vmatpush.msrb.mxu0 %v1226_v5  ;;  %v1235_v4 = vld [vmem:[%s1952_s3 + $0x2d0] sm:$0xff]  ;;  %v1204_v5 = vld [vmem:[%s1952_s3 + $0x1d8] sm:$0xff] }
  0x4a   : > { %799 = vmatpush.msrb.mxu3 %v1241_v42  ;;  %857 = vmatpush.msrb.mxu1 %v1242_v46 }
  0x4b   : > { %763 = vmatpush.msrb.mxu2 %v1223_v8  ;;  %821 = vmatpush.msrb.mxu0 %v1224_v10  ;;  %v1236_v8 = vld [vmem:[%s1952_s3 + $0x2d8] sm:$0xff] }
  0x4c   : > { %800 = vmatpush.msrb.mxu3 %v1239_v52  ;;  %858 = vmatpush.msrb.mxu1 %v1240_v56 }
  0x4d   : > { %764 = vmatpush.msrb.mxu2 %v1221_v12  ;;  %822 = vmatpush.msrb.mxu0 %v1222_v14  ;;  %v1233_v14 = vld [vmem:[%s1952_s3 + $0x2c0] sm:$0xff] }
  0x4e   : > { %859 = vmatpush.msrb.mxu1 %v1238_v60 }
  0x4f   : > { %765 = vmatpush.msrb.mxu2 %v1219_v16  ;;  %823 = vmatpush.msrb.mxu0 %v1220_v18  ;;  %v1234_v18 = vld [vmem:[%s1952_s3 + $0x2c8] sm:$0xff] }
  0x50   : > { %860 = vmatpush.msrb.mxu1 %v1236_v8 }
  0x51   : > { %766 = vmatpush.msrb.mxu2 %v1217_v22  ;;  %824 = vmatpush.msrb.mxu0 %v1218_v24 }
  0x52   : > { %861 = vmatpush.msrb.mxu1 %v1234_v18 }
  0x53   : > { %767 = vmatpush.msrb.mxu2 %v1215_v26  ;;  %825 = vmatpush.msrb.mxu0 %v1216_v28 }
  0x55   : > { %768 = vmatpush.msrb.mxu2 %v1213_v32  ;;  %826 = vmatpush.msrb.mxu0 %v1214_v34 }
  0x57   : > { %769 = vmatpush.msrb.mxu2 %v1211_v37  ;;  %827 = vmatpush.msrb.mxu0 %v1212_v39 }
  0x59   : > { %770 = vmatpush.msrb.mxu2 %v1209_v41  ;;  %828 = vmatpush.msrb.mxu0 %v1210_v45 }
  0x5b   : > { %771 = vmatpush.msrb.mxu2 %v1207_v51  ;;  %829 = vmatpush.msrb.mxu0 %v1208_v53 }
  0x5d   : > { %772 = vmatpush.msrb.mxu2 %v1205_v57 }
  0x5f   : > { %773 = vmatpush.msrb.mxu2 %v1203_v61 }
  0x61   : > { %774 = vmatpush.msrb.mxu2 %v1201_v13 }
  0x9a   : > { %v1646_v58 = vpop.f32.mrf.mxu0  ;;  %v1648_v59 = vpop.f32.mrf.mxu1 }
  0xa1   : > { %v1668_v2 = vpop.f32.mrf.mxu2  ;;  %v1670_v3 = vpop.f32.mrf.mxu3 }
  0xa2   : > { %v1678_v6 = vpop.f32.mrf.mxu0  ;;  %v1680_v7 = vpop.f32.mrf.mxu1 }
  0xa9   : > { %v1718_v20 = vpop.f32.mrf.mxu2  ;;  %v1720_v21 = vpop.f32.mrf.mxu3 }
  0xaa   : > { %v458_v29 = vpop.f32.mrf.mxu0  ;;  %v477_v30 = vpop.f32.mrf.mxu1 }
  0xb1   : > { %v377_v43 = vpop.f32.mrf.mxu2  ;;  %v396_v44 = vpop.f32.mrf.mxu3 }
  0xb2   : > { %v378_v47 = vadd.f32 %v377_v43, %v1646_v58  ;;  %v397_v49 = vadd.f32 %v396_v44, %v1648_v59  ;;  %v1237_v58 = vld [vmem:[%s1952_s3 + $0x2e0] sm:$0xff]  ;;  %v1206_v59 = vld [vmem:[%s1952_s3 + $0x1e8] sm:$0xff]  ;;  %v460_v0 = vpop.f32.mrf.mxu0  ;;  %v479_v1 = vpop.f32.mrf.mxu1 }
  0xb3   : > { %801 = vmatpush.msrb.mxu3 %v1237_v58  ;;  %830 = vmatpush.msrb.mxu0 %v1206_v59 }
  0xb4   : > { %v487_v54 = vadd.f32 %v458_v29, %v378_v47  ;;  %v488_v55 = vadd.f32 %v477_v30, %v397_v49 }
  0xb5   : > { %802 = vmatpush.msrb.mxu3 %v1235_v4  ;;  %831 = vmatpush.msrb.mxu0 %v1204_v5 }
  0xb6   : > { %v501_v62 = vadd.f32 %v1786_v48, %v487_v54  ;;  %v502_v63 = vadd.f32 %v1789_v50, %v488_v55 }
  0xb7   : > { %803 = vmatpush.msrb.mxu3 %v1233_v14  ;;  %832 = vmatpush.msrb.mxu0 %v1202_v17 }
  0xb8   : > { %v1829_v9 = vmax.f32 %v501_v62, 0.0  ;;  %v1831_v10 = vmax.f32 %v502_v63, 0.0 }
  0xb9   : > { %v379_v11 = vpop.f32.mrf.mxu2  ;;  %v398_v12 = vpop.f32.mrf.mxu3 }
  0xba   : > { %v380_v15 = vadd.f32 %v379_v11, %v1678_v6  ;;  %v399_v16 = vadd.f32 %v398_v12, %v1680_v7  ;;  %602 = vmatmul.f32.vlgmr.msra.gmra.mxu2 %v1829_v9  ;;  %1193 = vmatmul.msk.f32.vlgmr.msra.gmra.mxu3 %vm573_vm3, %v1831_v10  ;;  %v463_v25 = vpop.f32.mrf.mxu0  ;;  %v482_v26 = vpop.f32.mrf.mxu1 }
  0xbb   : > { %660 = vmatmul.f32.vlgmr.msra.gmra.mxu0 %v1829_v9  ;;  %1197 = vmatmul.msk.f32.vlgmr.msra.gmra.mxu1 %vm573_vm3, %v1831_v10 }
  0xbc   : > { %v489_v6 = vadd.f32 %v460_v0, %v380_v15  ;;  %v490_v7 = vadd.f32 %v479_v1, %v399_v16 }
  0xbe   : > { %v503_v19 = vadd.f32 %v1786_v48, %v489_v6  ;;  %v504_v22 = vadd.f32 %v1789_v50, %v490_v7 }
  0xc0   : > { %v511_v23 = vmax.f32 %v503_v19, 0.0  ;;  %v512_v24 = vmax.f32 %v504_v22, 0.0 }
  0xc1   : > { %v382_v27 = vpop.f32.mrf.mxu2  ;;  %v401_v28 = vpop.f32.mrf.mxu3 }
  0xc2   : > { %v383_v29 = vadd.f32 %v382_v27, %v1668_v2  ;;  %v402_v30 = vadd.f32 %v401_v28, %v1670_v3  ;;  %605 = vmatmul.f32.gmra.mxu2 %v511_v23  ;;  %1194 = vmatmul.msk.f32.gmra.mxu3 %vm573_vm3, %v512_v24  ;;  %v465_v39 = vpop.f32.mrf.mxu0  ;;  %v484_v40 = vpop.f32.mrf.mxu1 }
  0xc3   : > { %663 = vmatmul.f32.gmra.mxu0 %v511_v23  ;;  %1198 = vmatmul.msk.f32.gmra.mxu1 %vm573_vm3, %v512_v24 }
  0xc4   : > { %v491_v31 = vadd.f32 %v463_v25, %v383_v29  ;;  %v492_v32 = vadd.f32 %v482_v26, %v402_v30 }
  0xc6   : > { %v505_v33 = vadd.f32 %v1786_v48, %v491_v31  ;;  %v506_v34 = vadd.f32 %v1789_v50, %v492_v32 }
  0xc8   : > { %v513_v35 = vmax.f32 %v505_v33, 0.0  ;;  %v514_v36 = vmax.f32 %v506_v34, 0.0 }
  0xc9   : > { %v384_v37 = vpop.f32.mrf.mxu2  ;;  %v403_v38 = vpop.f32.mrf.mxu3 }
  0xca   : > { %v385_v2 = vadd.f32 %v384_v37, %v1718_v20  ;;  %v404_v3 = vadd.f32 %v403_v38, %v1720_v21  ;;  %608 = vmatmul.f32.gmra.mxu2 %v513_v35  ;;  %1195 = vmatmul.msk.f32.gmra.mxu3 %vm573_vm3, %v514_v36  ;;  %v883_v38 = vld [vmem:[%s1953_s4] sm:$0xff] }
  0xcb   : > { %666 = vmatmul.f32.gmra.mxu0 %v513_v35  ;;  %1199 = vmatmul.msk.f32.gmra.mxu1 %vm573_vm3, %v514_v36 }
  0xcc   : > { %v493_v41 = vadd.f32 %v465_v39, %v385_v2  ;;  %v494_v42 = vadd.f32 %v484_v40, %v404_v3  ;;  %v1275_v2 = vld [vmem:[%s1953_s4 + $0x20] sm:$0xff] }
  0xce   : > { %v507_v43 = vadd.f32 %v1786_v48, %v493_v41  ;;  %v508_v44 = vadd.f32 %v1789_v50, %v494_v42  ;;  %v884_v41 = vld [vmem:[%s1953_s4 + $0x8] sm:$0xff] }
  0xcf   : > { %v1276_v42 = vld [vmem:[%s1953_s4 + $0x28] sm:$0xff] }
  0xd0   : > { %v515_v45 = vmax.f32 %v507_v43, 0.0  ;;  %v516_v46 = vmax.f32 %v508_v44, 0.0  ;;  %v885_v43 = vld [vmem:[%s1953_s4 + $0x10] sm:$0xff] }
  0xd1   : > { %v1277_v44 = vld [vmem:[%s1953_s4 + $0x30] sm:$0xff] }
  0xd2   : > { %611 = vmatmul.f32.gmra.mxu2 %v515_v45  ;;  %1196 = vmatmul.msk.f32.gmra.mxu3 %vm573_vm3, %v516_v46 }
  0xd3   : > { %669 = vmatmul.f32.gmra.mxu0 %v515_v45  ;;  %1200 = vmatmul.msk.f32.gmra.mxu1 %vm573_vm3, %v516_v46 }
  0xda   : > { %775 = vmatmul.f32.vlgmr.msrb.gmra.mxu2 %v1829_v9  ;;  %1257 = vmatmul.msk.f32.vlgmr.msrb.gmra.mxu3 %vm573_vm3, %v1831_v10 }
  0xdb   : > { %833 = vmatmul.f32.vlgmr.msrb.gmra.mxu0 %v1829_v9  ;;  %1261 = vmatmul.msk.f32.vlgmr.msrb.gmra.mxu1 %vm573_vm3, %v1831_v10 }
  0xe2   : > { %778 = vmatmul.f32.gmra.mxu2 %v511_v23  ;;  %1258 = vmatmul.msk.f32.gmra.mxu3 %vm573_vm3, %v512_v24 }
  0xe3   : > { %836 = vmatmul.f32.gmra.mxu0 %v511_v23  ;;  %1262 = vmatmul.msk.f32.gmra.mxu1 %vm573_vm3, %v512_v24 }
  0xea   : > { %781 = vmatmul.f32.gmra.mxu2 %v513_v35  ;;  %1259 = vmatmul.msk.f32.gmra.mxu3 %vm573_vm3, %v514_v36 }
  0xeb   : > { %839 = vmatmul.f32.gmra.mxu0 %v513_v35  ;;  %1263 = vmatmul.msk.f32.gmra.mxu1 %vm573_vm3, %v514_v36 }
  0xf2   : > { %784 = vmatmul.f32.gmra.mxu2 %v515_v45  ;;  %1260 = vmatmul.msk.f32.gmra.mxu3 %vm573_vm3, %v516_v46 }
  0xf3   : > { %842 = vmatmul.f32.gmra.mxu0 %v515_v45  ;;  %1264 = vmatmul.msk.f32.gmra.mxu1 %vm573_vm3, %v516_v46  ;;  %v886_v45 = vld [vmem:[%s1953_s4 + $0x18] sm:$0x3f] }
  0xf4   : > { %v1278_v46 = vld [vmem:[%s1953_s4 + $0x38] sm:$0x3f] }
 0x138   : > { %v661_v20 = vpop.f32.mrf.mxu0  ;;  %v690_v21 = vpop.f32.mrf.mxu1 }
 0x139   : > { %v691_v29 = vadd.f32 %v690_v21, %v661_v20 }
 0x13d   : > { %v1881_v47 = vpop.f32.mrf.mxu2  ;;  %v1883_v48 = vpop.f32.mrf.mxu3 }
 0x13e   : > { %v633_v3 = vadd.f32 %v1883_v48, %v1881_v47 }
 0x140   : > { %v664_v49 = vpop.f32.mrf.mxu0  ;;  %v693_v50 = vpop.f32.mrf.mxu1 }
 0x141   : > { %v694_v19 = vadd.f32 %v693_v50, %v664_v49 }
 0x145   : > { %v606_v51 = vpop.f32.mrf.mxu2  ;;  %v635_v52 = vpop.f32.mrf.mxu3 }
 0x146   : > { %v636_v35 = vadd.f32 %v635_v52, %v606_v51 }
 0x148   : > { %v667_v53 = vpop.f32.mrf.mxu0  ;;  %v696_v54 = vpop.f32.mrf.mxu1 }
 0x149   : > { %v697_v18 = vadd.f32 %v696_v54, %v667_v53 }
 0x14d   : > { %v609_v55 = vpop.f32.mrf.mxu2  ;;  %v638_v56 = vpop.f32.mrf.mxu3 }
 0x14e   : > { %v639_v31 = vadd.f32 %v638_v56, %v609_v55 }
 0x150   : > { %v670_v57 = vpop.f32.mrf.mxu0  ;;  %v699_v58 = vpop.f32.mrf.mxu1 }
 0x151   : > { %v700_v15 = vadd.f32 %v699_v58, %v670_v57 }
 0x155   : > { %v612_v59 = vpop.f32.mrf.mxu2  ;;  %v641_v60 = vpop.f32.mrf.mxu3 }
 0x156   : > { %v642_v26 = vadd.f32 %v641_v60, %v612_v59 }
 0x158   : > { %v834_v61 = vpop.f32.mrf.mxu0  ;;  %v863_v62 = vpop.f32.mrf.mxu1 }
 0x159   : > { %v864_v22 = vadd.f32 %v863_v62, %v834_v61 }
 0x15b   : > { %v876_v34 = vmax.f32 %v691_v29, %v864_v22 }
 0x15d   : > { %v776_v63 = vpop.f32.mrf.mxu2  ;;  %v805_v0 = vpop.f32.mrf.mxu3 }
 0x15e   : > { %v806_v36 = vadd.f32 %v805_v0, %v776_v63 }
 0x160   : > { %v837_v1 = vpop.f32.mrf.mxu0  ;;  %v866_v4 = vpop.f32.mrf.mxu1  ;;  %v875_v40 = vmax.f32 %v633_v3, %v806_v36 }
 0x161   : > { %v867_v6 = vadd.f32 %v866_v4, %v837_v1 }
 0x163   : > { %v878_v30 = vmax.f32 %v694_v19, %v867_v6 }
 0x165   : > { %v779_v5 = vpop.f32.mrf.mxu2  ;;  %v808_v8 = vpop.f32.mrf.mxu3 }
 0x166   : > { %v809_v32 = vadd.f32 %v808_v8, %v779_v5 }
 0x168   : > { %v840_v9 = vpop.f32.mrf.mxu0  ;;  %v869_v10 = vpop.f32.mrf.mxu1  ;;  %v877_v39 = vmax.f32 %v636_v35, %v809_v32 }
 0x169   : > { %v870_v16 = vadd.f32 %v869_v10, %v840_v9 }
 0x16b   : > { %v880_v23 = vmax.f32 %v697_v18, %v870_v16 }
 0x16d   : > { %v782_v11 = vpop.f32.mrf.mxu2  ;;  %v811_v12 = vpop.f32.mrf.mxu3 }
 0x16e   : > { %v812_v27 = vadd.f32 %v811_v12, %v782_v11 }
 0x170   : > { %v843_v13 = vpop.f32.mrf.mxu0  ;;  %v872_v14 = vpop.f32.mrf.mxu1  ;;  %v879_v37 = vmax.f32 %v639_v31, %v812_v27 }
 0x171   : > { %v873_v17 = vadd.f32 %v872_v14, %v843_v13 }
 0x173   : > { %v882_v7 = vmax.f32 %v700_v15, %v873_v17 }
 0x175   : > { %1270 = vmatpush.msk.msra.mxu3 %vm900_vm4, %v882_v7  ;;  %1284 = vmatpush.msk.msra.mxu1 %vm900_vm4, %v882_v7  ;;  %v785_v24 = vpop.f32.mrf.mxu2  ;;  %v814_v25 = vpop.f32.mrf.mxu3 }
 0x176   : > { %v815_v28 = vadd.f32 %v814_v25, %v785_v24 }
 0x177   : > { %949 = vmatpush.msra.mxu3 %v880_v23  ;;  %1024 = vmatpush.msra.mxu1 %v880_v23 }
 0x178   : > { %v881_v33 = vmax.f32 %v642_v26, %v815_v28 }
 0x179   : > { %950 = vmatpush.msra.mxu3 %v878_v30  ;;  %1025 = vmatpush.msra.mxu1 %v878_v30 }
 0x17a   : > { %1265 = vmatpush.msk.msra.mxu2 %vm900_vm4, %v881_v33  ;;  %1279 = vmatpush.msk.msra.mxu0 %vm900_vm4, %v881_v33 }
 0x17b   : > { %951 = vmatpush.msra.mxu3 %v876_v34  ;;  %1026 = vmatpush.msra.mxu1 %v876_v34 }
 0x17c   : > { %920 = vmatpush.msra.mxu2 %v879_v37  ;;  %995 = vmatpush.msra.mxu0 %v879_v37 }
 0x17d   : > { %1271 = vmatmul.msk.f32.vlgmr.msra.gmra.mxu3 %vm887_vm5, %v883_v38  ;;  %1285 = vmatmul.msk.f32.vlgmr.msra.gmra.mxu1 %vm887_vm5, %v1275_v2 }
 0x17e   : > { %921 = vmatpush.msra.mxu2 %v877_v39  ;;  %996 = vmatpush.msra.mxu0 %v877_v39 }
 0x180   : > { %922 = vmatpush.msra.mxu2 %v875_v40  ;;  %997 = vmatpush.msra.mxu0 %v875_v40 }
 0x181   : > { %1266 = vmatmul.msk.f32.vlgmr.msra.gmra.mxu2 %vm887_vm5, %v883_v38  ;;  %1280 = vmatmul.msk.f32.vlgmr.msra.gmra.mxu0 %vm887_vm5, %v1275_v2 }
 0x185   : > { %1272 = vmatmul.msk.f32.gmra.mxu3 %vm887_vm5, %v884_v41  ;;  %1286 = vmatmul.msk.f32.gmra.mxu1 %vm887_vm5, %v1276_v42 }
 0x189   : > { %1267 = vmatmul.msk.f32.gmra.mxu2 %vm887_vm5, %v884_v41  ;;  %1281 = vmatmul.msk.f32.gmra.mxu0 %vm887_vm5, %v1276_v42 }
 0x18d   : > { %1273 = vmatmul.msk.f32.gmra.mxu3 %vm887_vm5, %v885_v43  ;;  %1287 = vmatmul.msk.f32.gmra.mxu1 %vm887_vm5, %v1277_v44 }
 0x191   : > { %1268 = vmatmul.msk.f32.gmra.mxu2 %vm887_vm5, %v885_v43  ;;  %1282 = vmatmul.msk.f32.gmra.mxu0 %vm887_vm5, %v1277_v44 }
 0x195   : > { %1274 = vmatmul.msk.f32.gmra.mxu3 %vm887_vm5, %v886_v45  ;;  %1288 = vmatmul.msk.f32.gmra.mxu1 %vm887_vm5, %v1278_v46 }
 0x199   : > { %1269 = vmatmul.msk.f32.gmra.mxu2 %vm887_vm5, %v886_v45  ;;  %1283 = vmatmul.msk.f32.gmra.mxu0 %vm887_vm5, %v1278_v46 }
 0x1fa   : > { %v1028_v20 = vpop.f32.mrf.mxu1 }
 0x1fe   : > { %v999_v21 = vpop.f32.mrf.mxu0 }
 0x200   : > { %v953_v47 = vpop.f32.mrf.mxu3 }
 0x201   : > { %v1041_v48 = vmax.f32 %v953_v47, %v1028_v20 }
 0x202   : > { %v1031_v50 = vpop.f32.mrf.mxu1 }
 0x204   : > { %v924_v49 = vpop.f32.mrf.mxu2 }
 0x205   : > { %v1040_v51 = vmax.f32 %v924_v49, %v999_v21 }
 0x206   : > { %v1002_v53 = vpop.f32.mrf.mxu0 }
 0x207   : > { %v1048_v54 = vpack.c.bf16 %v1041_v48, %v1040_v51 }
 0x208   : > { %v956_v55 = vpop.f32.mrf.mxu3 }
 0x209   : > { %1054 = vst.msk [vmem:[%s224_s16] sm:$0xff] %vm1936_vm7, %v1048_v54  ;;  %v1043_v56 = vmax.f32 %v956_v55, %v1031_v50 }
 0x20a   : > { %v1034_v59 = vpop.f32.mrf.mxu1 }
 0x20c   : > { %v927_v57 = vpop.f32.mrf.mxu2 }
 0x20d   : > { %v1042_v58 = vmax.f32 %v927_v57, %v1002_v53 }
 0x20e   : > { %v1005_v62 = vpop.f32.mrf.mxu0 }
 0x20f   : > { %v1049_v60 = vpack.c.bf16 %v1043_v56, %v1042_v58 }
 0x210   : > { %v959_v61 = vpop.f32.mrf.mxu3 }
 0x211   : > { %1055 = vst.msk [vmem:[%s224_s16 + $0x8] sm:$0xff] %vm1936_vm7, %v1049_v60  ;;  %v1045_v63 = vmax.f32 %v959_v61, %v1034_v59 }
 0x212   : > { %v1037_v8 = vpop.f32.mrf.mxu1 }
 0x214   : > { %v930_v0 = vpop.f32.mrf.mxu2 }
 0x215   : > { %v1044_v1 = vmax.f32 %v930_v0, %v1005_v62 }
 0x216   : > { %v1008_v9 = vpop.f32.mrf.mxu0 }
 0x217   : > { %v1050_v4 = vpack.c.bf16 %v1045_v63, %v1044_v1 }
 0x218   : > { %v962_v5 = vpop.f32.mrf.mxu3 }
 0x219   : > { %1056 = vst.msk [vmem:[%s224_s16 + $0x10] sm:$0xff] %vm1936_vm7, %v1050_v4  ;;  %v1047_v10 = vmax.f32 %v962_v5, %v1037_v8 }
 0x21c   : > { %v933_v11 = vpop.f32.mrf.mxu2 }
 0x21d   : > { %v1046_v12 = vmax.f32 %v933_v11, %v1008_v9 }
 0x21f   : > { %v1051_v13 = vpack.c.bf16 %v1047_v10, %v1046_v12 }
 0x221   : > { %1060 = vst.msk [vmem:[%s224_s16 + $0x18] sm:$0x77] %vm1059_vm10, %v1051_v13 }
 0x222 PF: > { %s15_s18 = sadd.s32 1, %s1330_s18  }
 0x223   : > { %p12_p4 = scmp.ge.s32.totalorder %s15_s18, 4  }
 0x225   :  { %14 = sbr.rel (!%p12_p4) target bundleno = 1 (0x1), region = 74 }

// kernel: model_reducing_params_forward.8
= control target key start
LH: loop header
LB: loop body
LE: loop exit
PB: predicated region body
PF: predicated region fallthrough
CT: control target
= control target key end

     0   :  { %10 = vsyncpa [#allocation3], 0  ;;  %s2130_s18 = smov 0   ;;  %s2906_s0 = inlined_call_operand.vmem [shape: bf16[2,30,240], index: 0, kind: input, shape index: {}]   ;;  %s2907_s1 = inlined_call_operand.vmem [shape: bf16[3,240,224], index: 1, kind: input, shape index: {}]   ;;  %s2908_s2 = inlined_call_operand.vmem [shape: f32[1,224], index: 2, kind: input, shape index: {}]   ;;  %s2909_s3 = inlined_call_operand.hbm [shape: f32[2,224,128], index: 3, kind: input, shape index: {}]   ;;  %s2910_s4 = inlined_call_operand.vmem [shape: f32[2,16,28], index: 4, kind: input, shape index: {}]   ;;  %s2911_s5 = inlined_call_operand.vmem [shape: bf16[2,16,128], index: 5, kind: output, shape index: {}]  }
   0x1 LB: > { %s174_s21 = sshll.u32 %s2909_s3, 4  ;;  %s1468_s22 = sadd.s32 4294967295, %s2095_s18   ;;  %s2095_s18 = sphi %s2130_s18, %s16_s18   ;;  %s175_s21 = int_to_ptr.hbm [resolvable:$true] %s174_s21 }
   0x2   : > { %p1470_p0 = scmp.ge.s32.totalorder %s2095_s18, 1  ;;  %p157_p1 = scmp.lt.s32.totalorder %s2095_s18, 3 }
   0x3   : > { %p2042_p2 = scmp.eq.s32.totalorder %s1468_s22, 0  ;;  %s2097_s23 = smov [#allocation2]  }
   0x4   : > { %p158_p3 = pnand %p1470_p0, %p157_p1  ;;  %s176_s24 = sshll.u32 %s2097_s23, 4  ;;  %s177_s24 = int_to_ptr.vmem [resolvable:$true] %s176_s24 }
   0x5   : > { %s2098_s25 = smov 128   ;;  %s2099_s26 = smov 8  }
   0x6   : > { %p2038_p4 = pneg %p158_p3  ;;  %203 = sbr.rel (%p158_p3) target bundleno = 558 (0x22e), region = 40 }
   0x8   : > { %p2039_p5 = pnand %p2042_p2, %p2038_p4 }
   0xa   : > { %2041 = dma.hbm_to_vmem [thread:$0]  (!%p2039_p5), %s175_s21, 7168, %s177_s24, [#allocation3], %s2098_s25, %s2098_s25, %s2099_s26  }
   0xb   : > { %2090 = dma.done.wait (%p2042_p2), [#allocation3], 7168  }
   0xc   : > { %2092 = vsyncadd (%p2042_p2), [#allocation3], 4294960128  ;;  %p232_p6 = scmp.lt.s32.totalorder %s1468_s22, 1  ;;  %v1567_v0 = vld [vmem:[%s2907_s1 + $0x160] sm:$0xf]  ;;  %vm508_vm1 = vcmask 916480  }
   0xd   : > { %v1976_v1 = vld [vmem:[%s2907_s1 + $0x164] sm:$0xf0]  ;;  %v1623_v2 = vld [vmem:[%s2907_s1 + $0x1d0] sm:$0xf]  ;;  %v1990_v4 = vld [vmem:[%s2907_s1 + $0x1d4] sm:$0xf0] }
   0xe   : > { %s2913_s22 = smov (!%p232_p6, %s1468_s22), 1  ;;  %v1568_v3 = vor.u32 %v1976_v1, %v1567_v0  ;;  %v1975_v5 = vld [vmem:[%s2907_s1 + $0x164] sm:$0xf]  ;;  %v1569_v6 = vld [vmem:[%s2907_s1 + $0x168] sm:$0xf0]  ;;  %v1624_v7 = vor.u32 %v1990_v4, %v1623_v2  ;;  %vm866_vm2 = vcmask 1046528  }
   0xf   : > { %v1572_v8 = vor.u32 %v1975_v5, %v1569_v6  ;;  %v1989_v9 = vld [vmem:[%s2907_s1 + $0x1d4] sm:$0xf]  ;;  %v1625_v10 = vld [vmem:[%s2907_s1 + $0x1d8] sm:$0xf0]  ;;  %v1559_v11 = vld [vmem:[%s2907_s1 + $0x150] sm:$0xf] }
  0x10   : > { %515 = vmatpush.bf16.msra.mxu0 %v1568_v3  ;;  %v1628_v12 = vor.u32 %v1989_v9, %v1625_v10  ;;  %v1974_v13 = vld [vmem:[%s2907_s1 + $0x154] sm:$0xf0]  ;;  %v1615_v14 = vld [vmem:[%s2907_s1 + $0x1c0] sm:$0xf]  ;;  %v1988_v15 = vld [vmem:[%s2907_s1 + $0x1c4] sm:$0xf0]  ;;  %535 = vmatpush.bf16.msra.mxu1 %v1624_v7 }
  0x11   : > { %553 = vmatpush.bf16.msra.mxu2 %v1572_v8  ;;  %v1560_v16 = vor.u32 %v1974_v13, %v1559_v11  ;;  %v1616_v17 = vor.u32 %v1988_v15, %v1615_v14  ;;  %v1973_v18 = vld [vmem:[%s2907_s1 + $0x154] sm:$0xf]  ;;  %v1561_v19 = vld [vmem:[%s2907_s1 + $0x158] sm:$0xf0]  ;;  %v1987_v20 = vld [vmem:[%s2907_s1 + $0x1c4] sm:$0xf] }
  0x12   : > { %573 = vmatpush.bf16.msra.mxu3 %v1628_v12  ;;  %v1564_v21 = vor.u32 %v1973_v18, %v1561_v19  ;;  %v1617_v22 = vld [vmem:[%s2907_s1 + $0x1c8] sm:$0xf0]  ;;  %v1551_v23 = vld [vmem:[%s2907_s1 + $0x140] sm:$0xf]  ;;  %v1972_v24 = vld [vmem:[%s2907_s1 + $0x144] sm:$0xf0] }
  0x13   : > { %v1620_v25 = vor.u32 %v1987_v20, %v1617_v22  ;;  %v1607_v26 = vld [vmem:[%s2907_s1 + $0x1b0] sm:$0xf]  ;;  %v1986_v27 = vld [vmem:[%s2907_s1 + $0x1b4] sm:$0xf0]  ;;  %v1971_v28 = vld [vmem:[%s2907_s1 + $0x144] sm:$0xf]  ;;  %v1552_v29 = vor.u32 %v1972_v24, %v1551_v23 }
  0x14   : > { %516 = vmatpush.bf16.msra.mxu0 %v1560_v16  ;;  %v1553_v30 = vld [vmem:[%s2907_s1 + $0x148] sm:$0xf0]  ;;  %v1985_v31 = vld [vmem:[%s2907_s1 + $0x1b4] sm:$0xf]  ;;  %v1609_v32 = vld [vmem:[%s2907_s1 + $0x1b8] sm:$0xf0]  ;;  %536 = vmatpush.bf16.msra.mxu1 %v1616_v17  ;;  %v1608_v33 = vor.u32 %v1986_v27, %v1607_v26 }
  0x15   : > { %554 = vmatpush.bf16.msra.mxu2 %v1564_v21  ;;  %v1556_v34 = vor.u32 %v1971_v28, %v1553_v30  ;;  %v1543_v35 = vld [vmem:[%s2907_s1 + $0x130] sm:$0xf]  ;;  %v1970_v36 = vld [vmem:[%s2907_s1 + $0x134] sm:$0xf0]  ;;  %v1599_v37 = vld [vmem:[%s2907_s1 + $0x1a0] sm:$0xf]  ;;  %v1612_v38 = vor.u32 %v1985_v31, %v1609_v32 }
  0x16   : > { %574 = vmatpush.bf16.msra.mxu3 %v1620_v25  ;;  %v1984_v39 = vld [vmem:[%s2907_s1 + $0x1a4] sm:$0xf0]  ;;  %v1969_v40 = vld [vmem:[%s2907_s1 + $0x134] sm:$0xf]  ;;  %v1545_v41 = vld [vmem:[%s2907_s1 + $0x138] sm:$0xf0]  ;;  %v1544_v44 = vor.u32 %v1970_v36, %v1543_v35 }
  0x17   : > { %v1983_v42 = vld [vmem:[%s2907_s1 + $0x1a4] sm:$0xf]  ;;  %v1601_v43 = vld [vmem:[%s2907_s1 + $0x1a8] sm:$0xf0]  ;;  %s1929_s21 = sshll.u32 %s2913_s22, 5  ;;  %v1600_v45 = vor.u32 %v1984_v39, %v1599_v37  ;;  %v1548_v46 = vor.u32 %v1969_v40, %v1545_v41  ;;  %vm1165_vm3 = vcmask 785408  }
  0x18   : > { %517 = vmatpush.bf16.msra.mxu0 %v1552_v29  ;;  %537 = vmatpush.bf16.msra.mxu1 %v1608_v33  ;;  %v1535_v47 = vld [vmem:[%s2907_s1 + $0x120] sm:$0xf]  ;;  %v1968_v48 = vld [vmem:[%s2907_s1 + $0x124] sm:$0xf0]  ;;  %v1591_v49 = vld [vmem:[%s2907_s1 + $0x190] sm:$0xf]  ;;  %v1604_v50 = vor.u32 %v1983_v42, %v1601_v43  ;;  %s2276_s25 = scalar_lea.vmem %s2906_s0, %s1929_s21 }
  0x19   : > { %555 = vmatpush.bf16.msra.mxu2 %v1556_v34  ;;  %v1982_v51 = vld [vmem:[%s2907_s1 + $0x194] sm:$0xf0]  ;;  %v1967_v52 = vld [vmem:[%s2907_s1 + $0x124] sm:$0xf]  ;;  %v1537_v53 = vld [vmem:[%s2907_s1 + $0x128] sm:$0xf0]  ;;  %v1536_v56 = vor.u32 %v1968_v48, %v1535_v47 }
  0x1a   : > { %575 = vmatpush.bf16.msra.mxu3 %v1612_v38  ;;  %v1981_v54 = vld [vmem:[%s2907_s1 + $0x194] sm:$0xf]  ;;  %v1593_v55 = vld [vmem:[%s2907_s1 + $0x198] sm:$0xf0]  ;;  %v1527_v57 = vld [vmem:[%s2907_s1 + $0x110] sm:$0xf]  ;;  %v1592_v60 = vor.u32 %v1982_v51, %v1591_v49  ;;  %v1540_v61 = vor.u32 %v1967_v52, %v1537_v53 }
  0x1b   : > { %v1966_v58 = vld [vmem:[%s2907_s1 + $0x114] sm:$0xf0]  ;;  %v1583_v59 = vld [vmem:[%s2907_s1 + $0x180] sm:$0xf]  ;;  %v1980_v62 = vld [vmem:[%s2907_s1 + $0x184] sm:$0xf0]  ;;  %v1596_v1 = vor.u32 %v1981_v54, %v1593_v55 }
  0x1c   : > { %518 = vmatpush.bf16.msra.mxu0 %v1544_v44  ;;  %538 = vmatpush.bf16.msra.mxu1 %v1600_v45  ;;  %v1965_v63 = vld [vmem:[%s2907_s1 + $0x114] sm:$0xf]  ;;  %v1529_v0 = vld [vmem:[%s2907_s1 + $0x118] sm:$0xf0]  ;;  %v1979_v2 = vld [vmem:[%s2907_s1 + $0x184] sm:$0xf]  ;;  %v1528_v5 = vor.u32 %v1966_v58, %v1527_v57  ;;  %v1584_v9 = vor.u32 %v1980_v62, %v1583_v59 }
  0x1d   : > { %556 = vmatpush.bf16.msra.mxu2 %v1548_v46  ;;  %v1585_v3 = vld [vmem:[%s2907_s1 + $0x188] sm:$0xf0]  ;;  %v2296_v4 = vld [vmem:[%s2907_s1 + $0x100] sm:$0xf]  ;;  %v1964_v6 = vld [vmem:[%s2907_s1 + $0x104] sm:$0xf0]  ;;  %v1532_v10 = vor.u32 %v1965_v63, %v1529_v0 }
  0x1e   : > { %576 = vmatpush.bf16.msra.mxu3 %v1604_v50  ;;  %v2304_v7 = vld [vmem:[%s2907_s1 + $0x170] sm:$0xf]  ;;  %v243_v8 = vld [vmem:[%s2276_s25] sm:$0xff]  ;;  %v2308_v11 = vld [vmem:[%s2276_s25 + $0x8] sm:$0xff]  ;;  %v1588_v23 = vor.u32 %v1979_v2, %v1585_v3  ;;  %vm325_vm0 = vsmask.f32 7424  ;;  %v1520_v28 = vor.u32 %v1964_v6, %v2296_v4 }
  0x1f   : > { %v2311_v12 = vld [vmem:[%s2276_s25 + $0x10] sm:$0xff]  ;;  %v277_v13 = vld [vmem:[%s2276_s25 + $0x18] sm:$0x77]  ;;  %v314_v14 = vunpack.c.h.b16 %v243_v8  ;;  %v313_v15 = vunpack.c.l.b16 %v243_v8  ;;  %v1963_v17 = vld [vmem:[%s2907_s1 + $0x104] sm:$0xf]  ;;  %v316_v19 = vunpack.c.h.b16 %v2308_v11  ;;  %v315_v22 = vunpack.c.l.b16 %v2308_v11  ;;  %s1930_s17 = sshll.u32 %s2913_s22, 3 }
  0x20   : > { %519 = vmatpush.bf16.msra.mxu0 %v1536_v56  ;;  %539 = vmatpush.bf16.msra.mxu1 %v1592_v60  ;;  %v1978_v16 = vld [vmem:[%s2907_s1 + $0x174] sm:$0xf0]  ;;  %v1521_v18 = vld [vmem:[%s2907_s1 + $0x108] sm:$0xf0]  ;;  %v318_v20 = vunpack.c.h.b16 %v2311_v12  ;;  %v320_v21 = vunpack.c.h.b16 %v277_v13  ;;  %v1977_v24 = vld [vmem:[%s2907_s1 + $0x174] sm:$0xf]  ;;  %v317_v26 = vunpack.c.l.b16 %v2311_v12  ;;  %v319_v27 = vunpack.c.l.b16 %v277_v13  ;;  %s241_s23 = scalar_lea.vmem %s2911_s5, %s1930_s17 }
  0x21   : > { %557 = vmatpush.bf16.msra.mxu2 %v1540_v61  ;;  %v1577_v25 = vld [vmem:[%s2907_s1 + $0x178] sm:$0xf0]  ;;  %v2336_v29 = vpack.c.b16 %v316_v19, %v314_v14  ;;  %v1511_v31 = vld [vmem:[%s2907_s1 + $0xf0] sm:$0xf]  ;;  %v1962_v32 = vld [vmem:[%s2907_s1 + $0xf4] sm:$0xf0]  ;;  %v1576_v35 = vor.u32 %v1978_v16, %v2304_v7  ;;  %v1524_v36 = vor.u32 %v1963_v17, %v1521_v18  ;;  %v2363_v39 = vpack.c.b16 %v315_v22, %v313_v15 }
  0x22   : > { %577 = vmatpush.bf16.msra.mxu3 %v1596_v1  ;;  %v2340_v30 = vpack.c.b16 %v320_v21, %v318_v20  ;;  %v1691_v33 = vld [vmem:[%s2907_s1 + $0x70] sm:$0xf]  ;;  %v1946_v34 = vld [vmem:[%s2907_s1 + $0x74] sm:$0xf0]  ;;  %v1961_v37 = vld [vmem:[%s2907_s1 + $0xf4] sm:$0xf]  ;;  %v2367_v40 = vpack.c.b16 %v319_v27, %v317_v26  ;;  %v1580_v43 = vor.u32 %v1977_v24, %v1577_v25  ;;  %v1512_v58 = vor.u32 %v1962_v32, %v1511_v31 }
  0x23   : > { %v1513_v38 = vld [vmem:[%s2907_s1 + $0xf8] sm:$0xf0]  ;;  %v1747_v41 = vld [vmem:[%s2907_s1 + $0xe0] sm:$0xf]  ;;  %v1960_v42 = vld [vmem:[%s2907_s1 + $0xe4] sm:$0xf0]  ;;  %v1692_v48 = vor.u32 %v1946_v34, %v1691_v33 }
  0x24   : > { %520 = vmatpush.bf16.msra.mxu0 %v1528_v5  ;;  %540 = vmatpush.bf16.msra.mxu1 %v1584_v9  ;;  %v339_v44 = vshrl.u32 %v2336_v29, 16  ;;  %v341_v45 = vshll.u32 %v2336_v29, 16  ;;  %v346_v46 = vshll.u32 %v2340_v30, 16  ;;  %v1683_v47 = vld [vmem:[%s2907_s1 + $0x60] sm:$0xf]  ;;  %v327_v49 = vshrl.u32 %v2363_v39, 16 }
  0x25   : > { %558 = vmatpush.bf16.msra.mxu2 %v1532_v10  ;;  %v329_v50 = vshll.u32 %v2363_v39, 16  ;;  %v334_v51 = vshll.u32 %v2367_v40, 16  ;;  %v1944_v52 = vld [vmem:[%s2907_s1 + $0x64] sm:$0xf0]  ;;  %v1748_v55 = vor.u32 %v1960_v42, %v1747_v41  ;;  %v1945_v56 = vld [vmem:[%s2907_s1 + $0x74] sm:$0xf]  ;;  %v1516_v0 = vor.u32 %v1961_v37, %v1513_v38 }
  0x26   : > { %578 = vmatpush.bf16.msra.mxu3 %v1588_v23  ;;  %v343_v53 = vrot.slane %v341_v45, 1  ;;  %v2387_v54 = vrot.slane %v346_v46, 1  ;;  %v1693_v57 = vld [vmem:[%s2907_s1 + $0x78] sm:$0xf0]  ;;  %v1739_v61 = vld [vmem:[%s2907_s1 + $0xd0] sm:$0xf]  ;;  %v1684_v2 = vor.u32 %v1944_v52, %v1683_v47 }
  0x27   : > { %v331_v59 = vrot.slane %v329_v50, 1  ;;  %v2395_v60 = vrot.slane %v334_v51, 1  ;;  %v1958_v62 = vld [vmem:[%s2907_s1 + $0xd4] sm:$0xf0]  ;;  %v1696_v3 = vor.u32 %v1945_v56, %v1693_v57  ;;  %v1675_v4 = vld [vmem:[%s2907_s1 + $0x50] sm:$0xf] }
  0x28   : > { %521 = vmatpush.bf16.msra.mxu0 %v1520_v28  ;;  %541 = vmatpush.bf16.msra.mxu1 %v1576_v35  ;;  %v344_v63 = vor.u32 %v343_v53, %v339_v44  ;;  %v1959_v5 = vld [vmem:[%s2907_s1 + $0xe4] sm:$0xf]  ;;  %v1749_v6 = vld [vmem:[%s2907_s1 + $0xe8] sm:$0xf0]  ;;  %v1942_v8 = vld [vmem:[%s2907_s1 + $0x54] sm:$0xf0]  ;;  %v1740_v9 = vor.u32 %v1958_v62, %v1739_v61 }
  0x29   : > { %559 = vmatpush.bf16.msra.mxu2 %v1524_v36  ;;  %v332_v1 = vor.u32 %v331_v59, %v327_v49  ;;  %v1943_v10 = vld [vmem:[%s2907_s1 + $0x64] sm:$0xf]  ;;  %v1685_v13 = vld [vmem:[%s2907_s1 + $0x68] sm:$0xf0]  ;;  %v1731_v15 = vld [vmem:[%s2907_s1 + $0xc0] sm:$0xf]  ;;  %v1752_v17 = vor.u32 %v1959_v5, %v1749_v6  ;;  %v1676_v18 = vor.u32 %v1942_v8, %v1675_v4 }
  0x2a   : > { %579 = vmatpush.bf16.msra.mxu3 %v1580_v43  ;;  %v349_v7 = vsel %vm325_vm0, %v344_v63, %v2387_v54  ;;  %v1956_v16 = vld [vmem:[%s2907_s1 + $0xc4] sm:$0xf0]  ;;  %v1688_v21 = vor.u32 %v1943_v10, %v1685_v13  ;;  %v1667_v23 = vld [vmem:[%s2907_s1 + $0x40] sm:$0xf]  ;;  %v1957_v24 = vld [vmem:[%s2907_s1 + $0xd4] sm:$0xf] }
  0x2b   : > { %1629 = vmatmul.msk.bf16.vlgmr.msra.gmra.mxu1 %vm508_vm1, %v349_v7  ;;  %v337_v14 = vsel %vm325_vm0, %v332_v1, %v2395_v60  ;;  %v1741_v25 = vld [vmem:[%s2907_s1 + $0xd8] sm:$0xf0]  ;;  %v1940_v27 = vld [vmem:[%s2907_s1 + $0x44] sm:$0xf0]  ;;  %v1732_v28 = vor.u32 %v1956_v16, %v1731_v15  ;;  %v1941_v31 = vld [vmem:[%s2907_s1 + $0x54] sm:$0xf] }
  0x2c   : > { %753 = vmatpush.bf16.msrb.mxu1 %v1692_v48  ;;  %522 = vmatpush.bf16.msra.mxu0 %v1512_v58  ;;  %v1677_v32 = vld [vmem:[%s2907_s1 + $0x58] sm:$0xf0]  ;;  %v1723_v33 = vld [vmem:[%s2907_s1 + $0xb0] sm:$0xf]  ;;  %v1954_v34 = vld [vmem:[%s2907_s1 + $0xb4] sm:$0xf0]  ;;  %v1744_v35 = vor.u32 %v1957_v24, %v1741_v25  ;;  %v1668_v36 = vor.u32 %v1940_v27, %v1667_v23 }
  0x2d   : > { %1631 = vmatmul.msk.bf16.vlgmr.msra.gmra.mxu3 %vm508_vm1, %v349_v7  ;;  %560 = vmatpush.bf16.msra.mxu2 %v1516_v0  ;;  %v1680_v37 = vor.u32 %v1941_v31, %v1677_v32  ;;  %v1659_v38 = vld [vmem:[%s2907_s1 + $0x30] sm:$0xf]  ;;  %v1955_v41 = vld [vmem:[%s2907_s1 + $0xc4] sm:$0xf]  ;;  %v1733_v42 = vld [vmem:[%s2907_s1 + $0xc8] sm:$0xf0]  ;;  %v1724_v44 = vor.u32 %v1954_v34, %v1723_v33 }
  0x2e   : > { %773 = vmatpush.bf16.msrb.mxu3 %v1748_v55  ;;  %v1938_v43 = vld [vmem:[%s2907_s1 + $0x34] sm:$0xf0]  ;;  %v1939_v45 = vld [vmem:[%s2907_s1 + $0x44] sm:$0xf]  ;;  %v1669_v46 = vld [vmem:[%s2907_s1 + $0x48] sm:$0xf0]  ;;  %v1736_v50 = vor.u32 %v1955_v41, %v1733_v42 }
  0x2f   : > { %523 = vmatmul.bf16.vlgmr.msra.gmra.mxu0 %v337_v14  ;;  %v353_v47 = vshrl.u32 %v2340_v30, 16  ;;  %v1715_v48 = vld [vmem:[%s2907_s1 + $0xa0] sm:$0xf]  ;;  %v1952_v49 = vld [vmem:[%s2907_s1 + $0xa4] sm:$0xf0]  ;;  %v350_v51 = vshrl.u32 %v2367_v40, 16  ;;  %v1660_v52 = vor.u32 %v1938_v43, %v1659_v38  ;;  %v1672_v53 = vor.u32 %v1939_v45, %v1669_v46 }
  0x30   : > { %754 = vmatpush.bf16.msrb.mxu1 %v1684_v2  ;;  %791 = vmatpush.bf16.msrb.mxu0 %v1696_v3  ;;  %v1651_v55 = vld [vmem:[%s2907_s1 + $0x20] sm:$0xf]  ;;  %v1953_v56 = vld [vmem:[%s2907_s1 + $0xb4] sm:$0xf]  ;;  %v1725_v57 = vld [vmem:[%s2907_s1 + $0xb8] sm:$0xf0]  ;;  %v1716_v59 = vor.u32 %v1952_v49, %v1715_v48 }
  0x31   : > { %561 = vmatmul.bf16.vlgmr.msra.gmra.mxu2 %v337_v14  ;;  %v1936_v58 = vld [vmem:[%s2907_s1 + $0x24] sm:$0xf0]  ;;  %v1937_v61 = vld [vmem:[%s2907_s1 + $0x34] sm:$0xf]  ;;  %v1661_v62 = vld [vmem:[%s2907_s1 + $0x38] sm:$0xf0]  ;;  %v355_v63 = vor.u32 %v353_v47, %v2387_v54  ;;  %v1728_v2 = vor.u32 %v1953_v56, %v1725_v57  ;;  %v352_v7 = vor.u32 %v350_v51, %v2395_v60 }
  0x32   : > { %774 = vmatpush.bf16.msrb.mxu3 %v1740_v9  ;;  %811 = vmatpush.bf16.msrb.mxu2 %v1752_v17  ;;  %v1707_v0 = vld [vmem:[%s2907_s1 + $0x90] sm:$0xf]  ;;  %v1950_v1 = vld [vmem:[%s2907_s1 + $0x94] sm:$0xf0]  ;;  %v1652_v3 = vor.u32 %v1936_v58, %v1651_v55  ;;  %v1664_v4 = vor.u32 %v1937_v61, %v1661_v62  ;;  %v1951_v54 = vld [vmem:[%s2907_s1 + $0xa4] sm:$0xf] }
  0x33   : > { %v1643_v5 = vld [vmem:[%s2907_s1 + $0x10] sm:$0xf]  ;;  %v1717_v6 = vld [vmem:[%s2907_s1 + $0xa8] sm:$0xf0]  ;;  %v1934_v8 = vld [vmem:[%s2907_s1 + $0x14] sm:$0xf0]  ;;  %v1708_v9 = vor.u32 %v1950_v1, %v1707_v0 }
  0x34   : > { %755 = vmatpush.bf16.msrb.mxu1 %v1676_v18  ;;  %792 = vmatpush.bf16.msrb.mxu0 %v1688_v21  ;;  %v1935_v10 = vld [vmem:[%s2907_s1 + $0x24] sm:$0xf]  ;;  %v1653_v13 = vld [vmem:[%s2907_s1 + $0x28] sm:$0xf0]  ;;  %v1699_v60 = vld [vmem:[%s2907_s1 + $0x80] sm:$0xf]  ;;  %v1720_v15 = vor.u32 %v1951_v54, %v1717_v6  ;;  %v1644_v18 = vor.u32 %v1934_v8, %v1643_v5 }
  0x35   : > { %v1948_v14 = vld [vmem:[%s2907_s1 + $0x84] sm:$0xf0]  ;;  %v1901_v16 = vld [vmem:[%s2907_s1 + $0x2c0] sm:$0xf]  ;;  %v1656_v21 = vor.u32 %v1935_v10, %v1653_v13  ;;  %v1949_v24 = vld [vmem:[%s2907_s1 + $0x94] sm:$0xf] }
  0x36   : > { %775 = vmatpush.bf16.msrb.mxu3 %v1732_v28  ;;  %812 = vmatpush.bf16.msrb.mxu2 %v1744_v35  ;;  %v2020_v17 = vld [vmem:[%s2907_s1 + $0x2c4] sm:$0xf0]  ;;  %v1635_v23 = vld [vmem:[%s2907_s1] sm:$0xf]  ;;  %v1709_v25 = vld [vmem:[%s2907_s1 + $0x98] sm:$0xf0]  ;;  %v1700_v28 = vor.u32 %v1948_v14, %v1699_v60 }
  0x37   : > { %v1932_v27 = vld [vmem:[%s2907_s1 + $0x4] sm:$0xf0]  ;;  %v1933_v31 = vld [vmem:[%s2907_s1 + $0x14] sm:$0xf]  ;;  %v1645_v32 = vld [vmem:[%s2907_s1 + $0x18] sm:$0xf0]  ;;  %v1902_v33 = vor.u32 %v2020_v17, %v1901_v16 }
  0x38   : > { %756 = vmatpush.bf16.msrb.mxu1 %v1668_v36  ;;  %793 = vmatpush.bf16.msrb.mxu0 %v1680_v37  ;;  %v1845_v34 = vld [vmem:[%s2907_s1 + $0x250] sm:$0xf]  ;;  %v2006_v35 = vld [vmem:[%s2907_s1 + $0x254] sm:$0xf0]  ;;  %v1712_v36 = vor.u32 %v1949_v24, %v1709_v25  ;;  %v1931_v37 = vld [vmem:[%s2907_s1 + $0x4] sm:$0xf]  ;;  %v1636_v42 = vor.u32 %v1932_v27, %v1635_v23  ;;  %v1648_v43 = vor.u32 %v1933_v31, %v1645_v32 }
  0x39   : > { %v1893_v38 = vld [vmem:[%s2907_s1 + $0x2b0] sm:$0xf]  ;;  %v2018_v41 = vld [vmem:[%s2907_s1 + $0x2b4] sm:$0xf0]  ;;  %v1947_v45 = vld [vmem:[%s2907_s1 + $0x84] sm:$0xf]  ;;  %v1846_v48 = vor.u32 %v2006_v35, %v1845_v34 }
  0x3a   : > { %776 = vmatpush.bf16.msrb.mxu3 %v1724_v44  ;;  %813 = vmatpush.bf16.msrb.mxu2 %v1736_v50  ;;  %v1637_v44 = vld [vmem:[%s2907_s1 + $0x8] sm:$0xf0]  ;;  %v2005_v47 = vld [vmem:[%s2907_s1 + $0x254] sm:$0xf]  ;;  %v2019_v49 = vld [vmem:[%s2907_s1 + $0x2c4] sm:$0xf] }
  0x3b   : > { %1630 = vmatmul.msk.bf16.gmra.mxu1 %vm508_vm1, %v355_v63  ;;  %v1701_v46 = vld [vmem:[%s2907_s1 + $0x88] sm:$0xf0]  ;;  %v1847_v51 = vld [vmem:[%s2907_s1 + $0x258] sm:$0xf0]  ;;  %v2004_v55 = vld [vmem:[%s2907_s1 + $0x244] sm:$0xf0] }
  0x3c   : > { %757 = vmatpush.bf16.msrb.mxu1 %v1660_v52  ;;  %794 = vmatpush.bf16.msrb.mxu0 %v1672_v53  ;;  %v1903_v50 = vld [vmem:[%s2907_s1 + $0x2c8] sm:$0xf0]  ;;  %v1894_v52 = vor.u32 %v2018_v41, %v1893_v38  ;;  %v1837_v53 = vld [vmem:[%s2907_s1 + $0x240] sm:$0xf]  ;;  %v1704_v56 = vor.u32 %v1947_v45, %v1701_v46  ;;  %v2016_v58 = vld [vmem:[%s2907_s1 + $0x2a4] sm:$0xf0]  ;;  %v1850_v62 = vor.u32 %v2005_v47, %v1847_v51 }
  0x3d   : > { %1632 = vmatmul.msk.bf16.gmra.mxu3 %vm508_vm1, %v355_v63  ;;  %v1885_v57 = vld [vmem:[%s2907_s1 + $0x2a0] sm:$0xf]  ;;  %v1906_v61 = vor.u32 %v2019_v49, %v1903_v50  ;;  %v1838_v63 = vor.u32 %v2004_v55, %v1837_v53  ;;  %v2017_v0 = vld [vmem:[%s2907_s1 + $0x2b4] sm:$0xf]  ;;  %v1895_v1 = vld [vmem:[%s2907_s1 + $0x2b8] sm:$0xf0] }
  0x3e   : > { %777 = vmatpush.bf16.msrb.mxu3 %v1716_v59  ;;  %814 = vmatpush.bf16.msrb.mxu2 %v1728_v2  ;;  %v1640_v59 = vor.u32 %v1931_v37, %v1637_v44  ;;  %v1886_v2 = vor.u32 %v2016_v58, %v1885_v57  ;;  %v2003_v5 = vld [vmem:[%s2907_s1 + $0x244] sm:$0xf]  ;;  %v1839_v54 = vld [vmem:[%s2907_s1 + $0x248] sm:$0xf0]  ;;  %v1877_v6 = vld [vmem:[%s2907_s1 + $0x290] sm:$0xf] }
  0x3f   : > { %528 = vmatmul.bf16.gmra.mxu0 %v352_v7  ;;  %v2014_v8 = vld [vmem:[%s2907_s1 + $0x294] sm:$0xf0]  ;;  %v1887_v10 = vld [vmem:[%s2907_s1 + $0x2a8] sm:$0xf0]  ;;  %v829_v60 = vld [vmem:[%s2276_s25] sm:$0xee]  ;;  %v1842_v14 = vor.u32 %v2003_v5, %v1839_v54 }
  0x40   : > { %758 = vmatpush.bf16.msrb.mxu1 %v1652_v3  ;;  %795 = vmatpush.bf16.msrb.mxu0 %v1664_v4  ;;  %v1829_v3 = vld [vmem:[%s2907_s1 + $0x230] sm:$0xf]  ;;  %v2002_v4 = vld [vmem:[%s2907_s1 + $0x234] sm:$0xf0]  ;;  %v2000_v16 = vld [vmem:[%s2907_s1 + $0x224] sm:$0xf0]  ;;  %v863_v17 = vunpack.c.h.b16 %v829_v60  ;;  %v1878_v24 = vor.u32 %v2014_v8, %v1877_v6 }
  0x41   : > { %566 = vmatmul.bf16.gmra.mxu2 %v352_v7  ;;  %v1898_v7 = vor.u32 %v2017_v0, %v1895_v1  ;;  %v1830_v13 = vor.u32 %v2002_v4, %v1829_v3  ;;  %v1831_v23 = vld [vmem:[%s2907_s1 + $0x238] sm:$0xf0]  ;;  %v1869_v27 = vld [vmem:[%s2907_s1 + $0x280] sm:$0xf]  ;;  %v2662_v32 = vrot.slane %v2340_v30, 1  ;;  %v2667_v34 = vrot.slane %v2367_v40, 1 }
  0x42   : > { %778 = vmatpush.bf16.msrb.mxu3 %v1708_v9  ;;  %815 = vmatpush.bf16.msrb.mxu2 %v1720_v15  ;;  %v2015_v9 = vld [vmem:[%s2907_s1 + $0x2a4] sm:$0xf]  ;;  %v1821_v15 = vld [vmem:[%s2907_s1 + $0x220] sm:$0xf]  ;;  %v865_v31 = vpack.c.b16 %v316_v19, %v863_v17  ;;  %v1879_v19 = vld [vmem:[%s2907_s1 + $0x298] sm:$0xf0] }
  0x43   : > { %v1890_v25 = vor.u32 %v2015_v9, %v1887_v10  ;;  %v1822_v35 = vor.u32 %v2000_v16, %v1821_v15  ;;  %v1998_v30 = vld [vmem:[%s2907_s1 + $0x214] sm:$0xf0]  ;;  %v1999_v38 = vld [vmem:[%s2907_s1 + $0x224] sm:$0xf]  ;;  %v1871_v49 = vld [vmem:[%s2907_s1 + $0x288] sm:$0xf0] }
  0x44   : > { %759 = vmatpush.bf16.msrb.mxu1 %v1644_v18  ;;  %796 = vmatpush.bf16.msrb.mxu0 %v1656_v21  ;;  %v862_v18 = vunpack.c.l.b16 %v829_v60  ;;  %v2001_v21 = vld [vmem:[%s2907_s1 + $0x234] sm:$0xf]  ;;  %v246_v37 = vld [vmem:[%s2276_s25 + $0x18] sm:$0x33]  ;;  %v1996_v53 = vld [vmem:[%s2907_s1 + $0x204] sm:$0xf0] }
  0x45   : > { %v1834_v11 = vor.u32 %v2001_v21, %v1831_v23  ;;  %v2010_v44 = vld [vmem:[%s2907_s1 + $0x274] sm:$0xf0]  ;;  %v592_v50 = vunpack.c.l.b16 %v246_v37  ;;  %v593_v55 = vunpack.c.h.b16 %v246_v37  ;;  %v1815_v57 = vld [vmem:[%s2907_s1 + $0x218] sm:$0xf0]  ;;  %v2009_v0 = vld [vmem:[%s2907_s1 + $0x274] sm:$0xf] }
  0x46   : > { %779 = vmatpush.bf16.msrb.mxu3 %v1700_v28  ;;  %816 = vmatpush.bf16.msrb.mxu2 %v1712_v36  ;;  %v2012_v28 = vld [vmem:[%s2907_s1 + $0x284] sm:$0xf0]  ;;  %v2013_v36 = vld [vmem:[%s2907_s1 + $0x294] sm:$0xf]  ;;  %v1863_v1 = vld [vmem:[%s2907_s1 + $0x278] sm:$0xf0] }
  0x47   : > { %v1870_v41 = vor.u32 %v2012_v28, %v1869_v27  ;;  %v1797_v4 = vld [vmem:[%s2907_s1 + $0x1f0] sm:$0xf]  ;;  %v1994_v5 = vld [vmem:[%s2907_s1 + $0x1f4] sm:$0xf0]  ;;  %v595_v54 = vpack.c.b16 %v593_v55, %v318_v20  ;;  %v1995_v6 = vld [vmem:[%s2907_s1 + $0x204] sm:$0xf]  ;;  %v1866_v8 = vor.u32 %v2009_v0, %v1863_v1 }
  0x48   : > { %760 = vmatpush.bf16.msrb.mxu1 %v1636_v42  ;;  %797 = vmatpush.bf16.msrb.mxu0 %v1648_v43  ;;  %v1882_v42 = vor.u32 %v2013_v36, %v1879_v19  ;;  %v1861_v43 = vld [vmem:[%s2907_s1 + $0x270] sm:$0xf]  ;;  %v1798_v9 = vor.u32 %v1994_v5, %v1797_v4  ;;  %v2007_v10 = vld [vmem:[%s2907_s1 + $0x264] sm:$0xf]  ;;  %v1855_v12 = vld [vmem:[%s2907_s1 + $0x268] sm:$0xf0] }
  0x49   : > { %v1862_v58 = vor.u32 %v2010_v44, %v1861_v43  ;;  %v1992_v60 = vld [vmem:[%s2907_s1 + $0x1e4] sm:$0xf0]  ;;  %v1799_v15 = vld [vmem:[%s2907_s1 + $0x1f8] sm:$0xf0]  ;;  %v1858_v16 = vor.u32 %v2007_v10, %v1855_v12  ;;  %v1991_v21 = vld [vmem:[%s2907_s1 + $0x1e4] sm:$0xf] }
  0x4a   : > { %1051 = vmatpush.bf16.msra.mxu3 %v1902_v33  ;;  %817 = vmatpush.bf16.msrb.mxu2 %v1704_v56  ;;  %v864_v33 = vpack.c.b16 %v315_v22, %v862_v18  ;;  %v1813_v22 = vld [vmem:[%s2907_s1 + $0x210] sm:$0xf]  ;;  %v1997_v56 = vld [vmem:[%s2907_s1 + $0x214] sm:$0xf]  ;;  %v1791_v23 = vld [vmem:[%s2907_s1 + $0x1e8] sm:$0xf0] }
  0x4b   : > { %761 = vmatmul.bf16.vlgmr.msrb.gmra.mxu1 %v2363_v39  ;;  %v1814_v47 = vor.u32 %v1998_v30, %v1813_v22  ;;  %v1818_v3 = vor.u32 %v1997_v56, %v1815_v57  ;;  %v1151_v22 = vld [vmem:[#allocation2 + $0x70] sm:$0xff]  ;;  %v1250_v37 = vld [vmem:[#allocation2 + $0x148] sm:$0xff]  ;;  %v1148_v43 = vld [vmem:[#allocation2 + $0x58] sm:$0xff]  ;;  %vm1336_vm4 = vcmask 1043456   ;;  %vm1329_vm5 = vcmask 228352  }
  0x4c   : > { %1031 = vmatpush.bf16.msra.mxu1 %v1846_v48  ;;  %798 = vmatpush.bf16.msrb.mxu0 %v1640_v59  ;;  %v867_v40 = vrot.slane %v864_v33, 1  ;;  %v2011_v48 = vld [vmem:[%s2907_s1 + $0x284] sm:$0xf]  ;;  %v1251_v30 = vld [vmem:[#allocation2 + $0x150] sm:$0xff]  ;;  %v1248_v44 = vld [vmem:[#allocation2 + $0x138] sm:$0xff] }
  0x4d   : > { %1753 = vmatmul.msk.bf16.vlgmr.msrb.gmra.mxu3 %vm508_vm1, %v2336_v29  ;;  %v1874_v59 = vor.u32 %v2011_v48, %v1871_v49  ;;  %v1146_v49 = vld [vmem:[#allocation2 + $0x48] sm:$0xff]  ;;  %v1163_v55 = vld [vmem:[#allocation2 + $0xd0] sm:$0xff]  ;;  %v1245_v56 = vld [vmem:[#allocation2 + $0x120] sm:$0xff] }
  0x4e   : > { %1052 = vmatpush.bf16.msra.mxu3 %v1894_v52  ;;  %1089 = vmatpush.bf16.msra.mxu2 %v1906_v61  ;;  %v2703_v46 = vsel %vm866_vm2, %v867_v40, %v2667_v34  ;;  %v1805_v52 = vld [vmem:[%s2907_s1 + $0x200] sm:$0xf]  ;;  %v1150_v40 = vld [vmem:[#allocation2 + $0x68] sm:$0xff]  ;;  %v1243_v4 = vld [vmem:[#allocation2 + $0x110] sm:$0xff] }
  0x4f   : > { %799 = vmatmul.bf16.vlgmr.msrb.gmra.mxu0 %v2363_v39  ;;  %v870_v39 = vrot.slane %v865_v31, 1  ;;  %v1853_v61 = vld [vmem:[%s2907_s1 + $0x260] sm:$0xf]  ;;  %v1262_v0 = vld [vmem:[#allocation2 + $0x1a8] sm:$0xff]  ;;  %v1159_v10 = vld [vmem:[#allocation2 + $0xb0] sm:$0xff] }
  0x50   : > { %1069 = vmatpush.bf16.msra.mxu0 %v1850_v62  ;;  %1032 = vmatpush.bf16.msra.mxu1 %v1838_v63  ;;  %v1806_v62 = vor.u32 %v1996_v53, %v1805_v52  ;;  %v2008_v63 = vld [vmem:[%s2907_s1 + $0x264] sm:$0xf0]  ;;  %v1264_v52 = vld [vmem:[#allocation2 + $0x1b8] sm:$0xff]  ;;  %v1145_v53 = vld [vmem:[#allocation2 + $0x40] sm:$0xff] }
  0x51   : > { %1755 = vmatmul.msk.bf16.vlgmr.msrb.gmra.mxu2 %vm508_vm1, %v2336_v29  ;;  %v1823_v29 = vld [vmem:[%s2907_s1 + $0x228] sm:$0xf0]  ;;  %v2699_v45 = vsel %vm866_vm2, %v870_v39, %v2662_v32  ;;  %v1241_v12 = vld [vmem:[#allocation2 + $0x100] sm:$0xff] }
  0x52   : > { %1053 = vmatpush.bf16.msra.mxu3 %v1886_v2  ;;  %1090 = vmatpush.bf16.msra.mxu2 %v1898_v7  ;;  %v1826_v51 = vor.u32 %v1999_v38, %v1823_v29  ;;  %v594_v2 = vpack.c.b16 %v592_v50, %v317_v26  ;;  %v1807_v26 = vld [vmem:[%s2907_s1 + $0x208] sm:$0xf0]  ;;  %v1854_v7 = vor.u32 %v2008_v63, %v1853_v61  ;;  %v1149_v38 = vld [vmem:[#allocation2 + $0x60] sm:$0xff]  ;;  %v1164_v50 = vld [vmem:[#allocation2 + $0xd8] sm:$0xff] }
  0x53   : > { %v1810_v20 = vor.u32 %v1995_v6, %v1807_v26  ;;  %v1249_v29 = vld [vmem:[#allocation2 + $0x140] sm:$0xff]  ;;  %v1144_v61 = vld [vmem:[#allocation2 + $0x38] sm:$0xff]  ;;  %v1142_v6 = vld [vmem:[#allocation2 + $0x28] sm:$0xff] }
  0x54   : > { %1033 = vmatpush.bf16.msra.mxu1 %v1830_v13  ;;  %1070 = vmatpush.bf16.msra.mxu0 %v1842_v14  ;;  %v1789_v13 = vld [vmem:[%s2907_s1 + $0x1e0] sm:$0xf]  ;;  %v1993_v14 = vld [vmem:[%s2907_s1 + $0x1f4] sm:$0xf]  ;;  %v1244_v63 = vld [vmem:[#allocation2 + $0x118] sm:$0xff] }
  0x55   : > { %v1790_v17 = vor.u32 %v1992_v60, %v1789_v13  ;;  %v1802_v18 = vor.u32 %v1993_v14, %v1799_v15  ;;  %v1160_v26 = vld [vmem:[#allocation2 + $0xb8] sm:$0xff]  ;;  %v1259_v13 = vld [vmem:[#allocation2 + $0x190] sm:$0xff]  ;;  %v1158_v15 = vld [vmem:[#allocation2 + $0xa8] sm:$0xff] }
  0x56   : > { %1054 = vmatpush.bf16.msra.mxu3 %v1878_v24  ;;  %1091 = vmatpush.bf16.msra.mxu2 %v1890_v25  ;;  %v1794_v24 = vor.u32 %v1991_v21, %v1791_v23  ;;  %v1140_v14 = vld [vmem:[#allocation2 + $0x18] sm:$0xff]  ;;  %v1139_v21 = vld [vmem:[#allocation2 + $0x10] sm:$0xff]  ;;  %v1157_v23 = vld [vmem:[#allocation2 + $0xa0] sm:$0xff] }
  0x58   : > { %1034 = vmatpush.bf16.msra.mxu1 %v1822_v35  ;;  %1071 = vmatpush.bf16.msra.mxu0 %v1834_v11  ;;  %v1252_v11 = vld [vmem:[#allocation2 + $0x158] sm:$0xff] }
  0x5a   : > { %1055 = vmatpush.bf16.msra.mxu3 %v1870_v41  ;;  %1092 = vmatpush.bf16.msra.mxu2 %v1882_v42 }
  0x5b   : > { %766 = vmatmul.bf16.gmra.mxu1 %v594_v2 }
  0x5c   : > { %1035 = vmatpush.bf16.msra.mxu1 %v1814_v47  ;;  %1072 = vmatpush.bf16.msra.mxu0 %v1826_v51  ;;  %v1247_v47 = vld [vmem:[#allocation2 + $0x130] sm:$0xff]  ;;  %v1246_v51 = vld [vmem:[#allocation2 + $0x128] sm:$0xff] }
  0x5d   : > { %1754 = vmatmul.msk.bf16.gmra.mxu3 %vm508_vm1, %v595_v54 }
  0x5e   : > { %1056 = vmatpush.bf16.msra.mxu3 %v1862_v58  ;;  %1093 = vmatpush.bf16.msra.mxu2 %v1874_v59  ;;  %v1263_v58 = vld [vmem:[#allocation2 + $0x1b0] sm:$0xff] }
  0x5f   : > { %804 = vmatmul.bf16.gmra.mxu0 %v594_v2  ;;  %v1143_v2 = vld [vmem:[#allocation2 + $0x30] sm:$0xff] }
  0x60   : > { %1036 = vmatpush.bf16.msra.mxu1 %v1806_v62  ;;  %1073 = vmatpush.bf16.msra.mxu0 %v1818_v3  ;;  %v1162_v62 = vld [vmem:[#allocation2 + $0xc8] sm:$0xff]  ;;  %v1161_v3 = vld [vmem:[#allocation2 + $0xc0] sm:$0xff] }
  0x61   : > { %1756 = vmatmul.msk.bf16.gmra.mxu2 %vm508_vm1, %v595_v54  ;;  %v1261_v54 = vld [vmem:[#allocation2 + $0x1a0] sm:$0xff] }
  0x62   : > { %1057 = vmatpush.bf16.msra.mxu3 %v1854_v7  ;;  %1094 = vmatpush.bf16.msra.mxu2 %v1866_v8  ;;  %v1242_v7 = vld [vmem:[#allocation2 + $0x108] sm:$0xff]  ;;  %v1260_v8 = vld [vmem:[#allocation2 + $0x198] sm:$0xff] }
  0x64   : > { %1037 = vmatpush.bf16.msra.mxu1 %v1798_v9  ;;  %1074 = vmatpush.bf16.msra.mxu0 %v1810_v20  ;;  %v1141_v9 = vld [vmem:[#allocation2 + $0x20] sm:$0xff] }
  0x66   : > { %1095 = vmatpush.bf16.msra.mxu2 %v1858_v16  ;;  %1211 = vmatpush.msrb.mxu3 %v1164_v50  ;;  %v1240_v16 = vld [vmem:[#allocation2 + $0xf8] sm:$0xff]  ;;  %v1254_v50 = vld [vmem:[#allocation2 + $0x168] sm:$0xff] }
  0x68   : > { %1038 = vmatpush.bf16.msra.mxu1 %v1790_v17  ;;  %1075 = vmatpush.bf16.msra.mxu0 %v1802_v18  ;;  %v1258_v17 = vld [vmem:[#allocation2 + $0x188] sm:$0xff] }
  0x69   : > { %1212 = vmatpush.msrb.mxu3 %v1163_v55 }
  0x6a   : > { %1298 = vmatpush.msrb.mxu2 %v1264_v52  ;;  %v1153_v52 = vld [vmem:[#allocation2 + $0x80] sm:$0xff] }
  0x6b   : > { %1039 = vmatmul.bf16.vlgmr.msra.gmra.mxu1 %v2703_v46  ;;  %1213 = vmatpush.msrb.mxu3 %v1162_v62 }
  0x6c   : > { %1076 = vmatpush.bf16.msra.mxu0 %v1794_v24  ;;  %1299 = vmatpush.msrb.mxu2 %v1263_v58  ;;  %v1239_v24 = vld [vmem:[#allocation2 + $0xf0] sm:$0xff] }
  0x6d   : > { %1907 = vmatmul.msk.bf16.vlgmr.msra.gmra.mxu3 %vm508_vm1, %v2699_v45 }
  0x6e   : > { %1300 = vmatpush.msrb.mxu2 %v1262_v0  ;;  %1214 = vmatpush.msrb.mxu3 %v1161_v3 }
  0x6f   : > { %1077 = vmatmul.bf16.vlgmr.msra.gmra.mxu0 %v2703_v46  ;;  %v1147_v46 = vld [vmem:[#allocation2 + $0x50] sm:$0xff] }
  0x70   : > { %1265 = vmatpush.msrb.mxu0 %v1252_v11  ;;  %1301 = vmatpush.msrb.mxu2 %v1261_v54  ;;  %v1257_v11 = vld [vmem:[#allocation2 + $0x180] sm:$0xff] }
  0x71   : > { %1909 = vmatmul.msk.bf16.vlgmr.msra.gmra.mxu2 %vm508_vm1, %v2699_v45  ;;  %1215 = vmatpush.msrb.mxu3 %v1160_v26  ;;  %v1115_v54 = vld [vmem:[%s2908_s2] sm:$0x3] }
  0x72   : > { %1266 = vmatpush.msrb.mxu0 %v1251_v30  ;;  %1302 = vmatpush.msrb.mxu2 %v1260_v8  ;;  %v1156_v30 = vld [vmem:[#allocation2 + $0x98] sm:$0xff] }
  0x73   : > { %1216 = vmatpush.msrb.mxu3 %v1159_v10  ;;  %v2848_v10 = vperm.slane %v1115_v54, 0 }
  0x74   : > { %1267 = vmatpush.msrb.mxu0 %v1250_v37  ;;  %1303 = vmatpush.msrb.mxu2 %v1259_v13  ;;  %v1256_v37 = vld [vmem:[#allocation2 + $0x178] sm:$0xff] }
  0x75   : > { %1217 = vmatpush.msrb.mxu3 %v1158_v15 }
  0x76   : > { %1268 = vmatpush.msrb.mxu0 %v1249_v29  ;;  %1304 = vmatpush.msrb.mxu2 %v1258_v17  ;;  %v1155_v29 = vld [vmem:[#allocation2 + $0x90] sm:$0xff] }
  0x77   : > { %1218 = vmatpush.msrb.mxu3 %v1157_v23 }
  0x78   : > { %1269 = vmatpush.msrb.mxu0 %v1248_v44  ;;  %1305 = vmatpush.msrb.mxu2 %v1257_v11 }
  0x79   : > { %1219 = vmatpush.msrb.mxu3 %v1156_v30 }
  0x7a   : > { %1270 = vmatpush.msrb.mxu0 %v1247_v47  ;;  %1306 = vmatpush.msrb.mxu2 %v1256_v37 }
  0x7b   : > { %1044 = vmatmul.bf16.gmra.mxu1 %v2667_v34  ;;  %1220 = vmatpush.msrb.mxu3 %v1155_v29 }
  0x7c   : > { %1271 = vmatpush.msrb.mxu0 %v1246_v51 }
  0x7d   : > { %1908 = vmatmul.msk.bf16.gmra.mxu3 %vm508_vm1, %v2662_v32 }
  0x7e   : > { %1272 = vmatpush.msrb.mxu0 %v1245_v56 }
  0x7f   : > { %1082 = vmatmul.bf16.gmra.mxu0 %v2667_v34  ;;  %v1152_v34 = vld [vmem:[#allocation2 + $0x78] sm:$0xff] }
  0x80   : > { %1178 = vmatpush.msrb.mxu1 %v1152_v34  ;;  %1273 = vmatpush.msrb.mxu0 %v1244_v63 }
  0x81   : > { %1910 = vmatmul.msk.bf16.gmra.mxu2 %vm508_vm1, %v2662_v32 }
  0x82   : > { %1179 = vmatpush.msrb.mxu1 %v1151_v22  ;;  %1274 = vmatpush.msrb.mxu0 %v1243_v4  ;;  %v1138_v22 = vld [vmem:[#allocation2 + $0x8] sm:$0xff] }
  0x84   : > { %1180 = vmatpush.msrb.mxu1 %v1150_v40  ;;  %1275 = vmatpush.msrb.mxu0 %v1242_v7  ;;  %v1238_v40 = vld [vmem:[#allocation2 + $0xe8] sm:$0xff] }
  0x86   : > { %1181 = vmatpush.msrb.mxu1 %v1149_v38  ;;  %1276 = vmatpush.msrb.mxu0 %v1241_v12  ;;  %v1137_v38 = vld [vmem:[#allocation2] sm:$0xff] }
  0x88   : > { %1182 = vmatpush.msrb.mxu1 %v1148_v43  ;;  %1277 = vmatpush.msrb.mxu0 %v1240_v16  ;;  %v1237_v43 = vld [vmem:[#allocation2 + $0xe0] sm:$0xff]  ;;  %v2851_v16 = vperm.slane %v1115_v54, 1 }
  0x8a   : > { %1183 = vmatpush.msrb.mxu1 %v1147_v46  ;;  %1278 = vmatpush.msrb.mxu0 %v1239_v24  ;;  %v1255_v46 = vld [vmem:[#allocation2 + $0x170] sm:$0xff] }
  0x8b   : > { %1307 = vmatpush.msrb.mxu2 %v1255_v46 }
  0x8c   : > { %1184 = vmatpush.msrb.mxu1 %v1146_v49  ;;  %1279 = vmatpush.msrb.mxu0 %v1238_v40  ;;  %v1154_v49 = vld [vmem:[#allocation2 + $0x88] sm:$0xff] }
  0x8d   : > { %1221 = vmatpush.msrb.mxu3 %v1154_v49  ;;  %1308 = vmatpush.msrb.mxu2 %v1254_v50 }
  0x8e   : > { %1185 = vmatpush.msrb.mxu1 %v1145_v53  ;;  %1280 = vmatpush.msrb.mxu0 %v1237_v43  ;;  %v1253_v53 = vld [vmem:[#allocation2 + $0x160] sm:$0xff] }
  0x8f   : > { %1222 = vmatpush.msrb.mxu3 %v1153_v52  ;;  %1309 = vmatpush.msrb.mxu2 %v1253_v53 }
  0x90   : > { %1186 = vmatpush.msrb.mxu1 %v1144_v61 }
  0x92   : > { %1187 = vmatpush.msrb.mxu1 %v1143_v2 }
  0x94   : > { %1188 = vmatpush.msrb.mxu1 %v1142_v6 }
  0x96   : > { %1189 = vmatpush.msrb.mxu1 %v1141_v9 }
  0x98   : > { %1190 = vmatpush.msrb.mxu1 %v1140_v14 }
  0x9a   : > { %1191 = vmatpush.msrb.mxu1 %v1139_v21 }
  0x9c   : > { %1192 = vmatpush.msrb.mxu1 %v1138_v22 }
  0x9e   : > { %1193 = vmatpush.msrb.mxu1 %v1137_v38 }
  0xa8   : > { %v2789_v25 = vpop.f32.mrf.mxu1 }
  0xac   : > { %v2791_v27 = vpop.f32.mrf.mxu0 }
  0xad   : > { %v544_v3 = vadd.f32 %v2789_v25, %v2791_v27 }
  0xb0   : > { %v2793_v28 = vpop.f32.mrf.mxu3  ;;  %v2795_v31 = vpop.f32.mrf.mxu1 }
  0xb4   : > { %v2797_v33 = vpop.f32.mrf.mxu2  ;;  %v2799_v35 = vpop.f32.mrf.mxu0 }
  0xb5   : > { %v582_v26 = vadd.f32 %v2793_v28, %v2797_v33 }
  0xb8   : > { %v2801_v36 = vpop.f32.mrf.mxu3  ;;  %v2803_v19 = vpop.f32.mrf.mxu1 }
  0xbc   : > { %v2805_v32 = vpop.f32.mrf.mxu2  ;;  %v2807_v39 = vpop.f32.mrf.mxu0 }
  0xc0   : > { %v2809_v41 = vpop.f32.mrf.mxu3  ;;  %v2811_v42 = vpop.f32.mrf.mxu1 }
  0xc4   : > { %v2813_v45 = vpop.f32.mrf.mxu2  ;;  %v2815_v48 = vpop.f32.mrf.mxu0 }
  0xc8   : > { %v2817_v57 = vpop.f32.mrf.mxu3  ;;  %v2819_v59 = vpop.f32.mrf.mxu1 }
  0xc9   : > { %v763_v6 = vadd.f32 %v2819_v59, %v544_v3  ;;  %v546_v59 = vadd.f32 %v2795_v31, %v2799_v35 }
  0xcc   : > { %v2821_v1 = vpop.f32.mrf.mxu2  ;;  %v2823_v5 = vpop.f32.mrf.mxu0 }
  0xcd   : > { %v801_v12 = vadd.f32 %v2823_v5, %v582_v26  ;;  %v584_v5 = vadd.f32 %v2801_v36, %v2805_v32  ;;  %v549_v32 = vadd.f32 %v2803_v19, %v2807_v39 }
  0xd0   : > { %v2825_v20 = vpop.f32.mrf.mxu3  ;;  %v2827_v60 = vpop.f32.mrf.mxu1 }
  0xd1   : > { %v782_v8 = vadd.f32 %v2825_v20, %v763_v6  ;;  %v765_v20 = vadd.f32 %v2827_v60, %v546_v59 }
  0xd4   : > { %v819_v18 = vpop.f32.mrf.mxu2  ;;  %v2829_v34 = vpop.f32.mrf.mxu0 }
  0xd5   : > { %v820_v14 = vadd.f32 %v819_v18, %v801_v12  ;;  %v803_v31 = vadd.f32 %v2829_v34, %v584_v5  ;;  %v587_v34 = vadd.f32 %v2809_v41, %v2813_v45  ;;  %v551_v41 = vadd.f32 %v2811_v42, %v2815_v48 }
  0xd8   : > { %v783_v44 = vpop.f32.mrf.mxu3  ;;  %v767_v47 = vpop.f32.mrf.mxu1 }
  0xd9   : > { %v784_v18 = vadd.f32 %v783_v44, %v765_v20  ;;  %v768_v29 = vadd.f32 %v767_v47, %v549_v32 }
  0xdc   : > { %v821_v51 = vpop.f32.mrf.mxu2  ;;  %v805_v55 = vpop.f32.mrf.mxu0 }
  0xdd   : > { %v822_v40 = vadd.f32 %v821_v51, %v803_v31  ;;  %v806_v52 = vadd.f32 %v805_v55, %v587_v34  ;;  %v589_v55 = vadd.f32 %v2817_v57, %v2821_v1  ;;  %v1923_v34 = vld [vmem:[%s2910_s4 + $0x18] sm:$0xff] }
  0xe0   : > { %v786_v56 = vpop.f32.mrf.mxu3  ;;  %v2831_v58 = vpop.f32.mrf.mxu1 }
  0xe1   : > { %v787_v49 = vadd.f32 %v786_v56, %v768_v29 }
  0xe4   : > { %v824_v61 = vpop.f32.mrf.mxu2  ;;  %v2833_v62 = vpop.f32.mrf.mxu0 }
  0xe5   : > { %v825_v39 = vadd.f32 %v824_v61, %v806_v52  ;;  %v808_v42 = vadd.f32 %v2833_v62, %v589_v55 }
  0xe8   : > { %v2835_v63 = vpop.f32.mrf.mxu3  ;;  %v1040_v0 = vpop.f32.mrf.mxu1 }
  0xec   : > { %v2837_v2 = vpop.f32.mrf.mxu2  ;;  %v1078_v4 = vpop.f32.mrf.mxu0 }
  0xf0   : > { %v1059_v7 = vpop.f32.mrf.mxu3  ;;  %v1042_v13 = vpop.f32.mrf.mxu1 }
  0xf1   : > { %v1060_v9 = vadd.f32 %v1059_v7, %v1040_v0 }
  0xf3   : > { %v1107_v25 = vadd.f32 %v1060_v9, %v782_v8 }
  0xf4   : > { %v1097_v27 = vpop.f32.mrf.mxu2  ;;  %v1080_v21 = vpop.f32.mrf.mxu0 }
  0xf5   : > { %v1098_v15 = vadd.f32 %v1097_v27, %v1078_v4  ;;  %v1121_v28 = vadd.f32 %v2848_v10, %v1107_v25  ;;  %v770_v4 = vadd.f32 %v2831_v58, %v551_v41  ;;  %v827_v58 = vadd.f32 %v2837_v2, %v808_v42 }
  0xf7   : > { %v1108_v33 = vadd.f32 %v1098_v15, %v820_v14  ;;  %v1129_v17 = vmax.f32 %v1121_v28, 0.0  ;;  %v789_v26 = vadd.f32 %v2835_v63, %v770_v4 }
  0xf8   : > { %v1061_v24 = vpop.f32.mrf.mxu3  ;;  %v1045_v36 = vpop.f32.mrf.mxu1 }
  0xf9   : > { %v1122_v23 = vadd.f32 %v2851_v16, %v1108_v33  ;;  %v1062_v11 = vadd.f32 %v1061_v24, %v1042_v13  ;;  %1194 = vmatmul.f32.vlgmr.msrb.gmra.mxu1 %v1129_v17  ;;  %1281 = vmatmul.f32.vlgmr.msrb.gmra.mxu0 %v1129_v17 }
  0xfb   : > { %v1130_v35 = vmax.f32 %v1122_v23, 0.0  ;;  %v1109_v22 = vadd.f32 %v1062_v11, %v784_v18 }
  0xfc   : > { %v1099_v30 = vpop.f32.mrf.mxu2  ;;  %v1083_v50 = vpop.f32.mrf.mxu0 }
  0xfd   : > { %v1100_v60 = vadd.f32 %v1099_v30, %v1080_v21  ;;  %1911 = vmatmul.msk.f32.vlgmr.msrb.gmra.mxu3 %vm1165_vm3, %v1130_v35  ;;  %1915 = vmatmul.msk.f32.vlgmr.msrb.gmra.mxu2 %vm1165_vm3, %v1130_v35  ;;  %v1123_v37 = vadd.f32 %v2848_v10, %v1109_v22 }
  0xff   : > { %v1110_v38 = vadd.f32 %v1100_v60, %v822_v40  ;;  %v1131_v43 = vmax.f32 %v1123_v37, 0.0 }
 0x100   : > { %v1064_v44 = vpop.f32.mrf.mxu3  ;;  %v1047_v56 = vpop.f32.mrf.mxu1 }
 0x101   : > { %v1124_v46 = vadd.f32 %v2851_v16, %v1110_v38  ;;  %v1065_v51 = vadd.f32 %v1064_v44, %v1045_v36  ;;  %1197 = vmatmul.f32.gmra.mxu1 %v1131_v43  ;;  %1284 = vmatmul.f32.gmra.mxu0 %v1131_v43  ;;  %v1922_v43 = vld [vmem:[%s2910_s4 + $0x10] sm:$0xff]  ;;  %v1327_v44 = vld [vmem:[%s2910_s4] sm:$0xff] }
 0x103   : > { %v1132_v53 = vmax.f32 %v1124_v46, 0.0  ;;  %v1111_v0 = vadd.f32 %v1065_v51, %v787_v49  ;;  %v1328_v46 = vld [vmem:[%s2910_s4 + $0x8] sm:$0xff] }
 0x104   : > { %v1102_v19 = vpop.f32.mrf.mxu2  ;;  %v1085_v8 = vpop.f32.mrf.mxu0 }
 0x105   : > { %v1103_v3 = vadd.f32 %v1102_v19, %v1083_v50  ;;  %1912 = vmatmul.msk.f32.gmra.mxu3 %vm1165_vm3, %v1132_v53  ;;  %1916 = vmatmul.msk.f32.gmra.mxu2 %vm1165_vm3, %v1132_v53  ;;  %v1125_v45 = vadd.f32 %v2848_v10, %v1111_v0 }
 0x107   : > { %v1112_v47 = vadd.f32 %v1103_v3, %v825_v39  ;;  %v1133_v54 = vmax.f32 %v1125_v45, 0.0 }
 0x108   : > { %v1066_v6 = vpop.f32.mrf.mxu3 }
 0x109   : > { %v1126_v61 = vadd.f32 %v2851_v16, %v1112_v47  ;;  %v1067_v7 = vadd.f32 %v1066_v6, %v1047_v56  ;;  %1200 = vmatmul.f32.gmra.mxu1 %v1133_v54  ;;  %1287 = vmatmul.f32.gmra.mxu0 %v1133_v54 }
 0x10b   : > { %v1134_v48 = vmax.f32 %v1126_v61, 0.0  ;;  %v1113_v9 = vadd.f32 %v1067_v7, %v789_v26 }
 0x10c   : > { %v1104_v12 = vpop.f32.mrf.mxu2 }
 0x10d   : > { %v1105_v13 = vadd.f32 %v1104_v12, %v1085_v8  ;;  %1913 = vmatmul.msk.f32.gmra.mxu3 %vm1165_vm3, %v1134_v48  ;;  %1917 = vmatmul.msk.f32.gmra.mxu2 %vm1165_vm3, %v1134_v48  ;;  %v1127_v57 = vadd.f32 %v2848_v10, %v1113_v9 }
 0x10f   : > { %v1114_v1 = vadd.f32 %v1105_v13, %v827_v58  ;;  %v1135_v63 = vmax.f32 %v1127_v57, 0.0 }
 0x111   : > { %v1128_v25 = vadd.f32 %v2851_v16, %v1114_v1  ;;  %1203 = vmatmul.f32.gmra.mxu1 %v1135_v63  ;;  %1290 = vmatmul.f32.gmra.mxu0 %v1135_v63 }
 0x113   : > { %v1136_v62 = vmax.f32 %v1128_v25, 0.0 }
 0x115   : > { %1914 = vmatmul.msk.f32.gmra.mxu3 %vm1165_vm3, %v1136_v62  ;;  %1918 = vmatmul.msk.f32.gmra.mxu2 %vm1165_vm3, %v1136_v62 }
 0x176   : > { %v1195_v27 = vpop.f32.mrf.mxu1  ;;  %v1282_v2 = vpop.f32.mrf.mxu0 }
 0x17e   : > { %v1198_v59 = vpop.f32.mrf.mxu1  ;;  %v1285_v28 = vpop.f32.mrf.mxu0 }
 0x180   : > { %v1224_v14 = vpop.f32.mrf.mxu3  ;;  %v1311_v15 = vpop.f32.mrf.mxu2 }
 0x181   : > { %v1225_v36 = vadd.f32 %v1224_v14, %v1195_v27  ;;  %v1312_v32 = vadd.f32 %v1311_v15, %v1282_v2 }
 0x183   : > { %v1323_v29 = vmax.f32 %v1225_v36, %v1312_v32 }
 0x186   : > { %v1201_v10 = vpop.f32.mrf.mxu1  ;;  %v1288_v17 = vpop.f32.mrf.mxu0 }
 0x188   : > { %v1227_v33 = vpop.f32.mrf.mxu3  ;;  %v1314_v20 = vpop.f32.mrf.mxu2 }
 0x189   : > { %v1228_v30 = vadd.f32 %v1227_v33, %v1198_v59  ;;  %v1315_v40 = vadd.f32 %v1314_v20, %v1285_v28 }
 0x18b   : > { %v1324_v38 = vmax.f32 %v1228_v30, %v1315_v40 }
 0x18e   : > { %v1204_v16 = vpop.f32.mrf.mxu1  ;;  %v1291_v23 = vpop.f32.mrf.mxu0 }
 0x190   : > { %v1230_v21 = vpop.f32.mrf.mxu3  ;;  %v1317_v5 = vpop.f32.mrf.mxu2 }
 0x191   : > { %v1231_v11 = vadd.f32 %v1230_v21, %v1201_v10  ;;  %v1318_v31 = vadd.f32 %v1317_v5, %v1288_v17 }
 0x193   : > { %v1325_v37 = vmax.f32 %v1231_v11, %v1318_v31 }
 0x198   : > { %v1233_v24 = vpop.f32.mrf.mxu3  ;;  %v1320_v18 = vpop.f32.mrf.mxu2 }
 0x199   : > { %v1234_v35 = vadd.f32 %v1233_v24, %v1204_v16  ;;  %v1321_v22 = vadd.f32 %v1320_v18, %v1291_v23 }
 0x19b   : > { %v1326_v60 = vmax.f32 %v1234_v35, %v1321_v22 }
 0x19d   : > { %1919 = vmatpush.msk.msra.mxu0 %vm1336_vm4, %v1326_v60  ;;  %2026 = vmatpush.msk.msra.mxu1 %vm1336_vm4, %v1326_v60 }
 0x19e   : > { %1924 = vmatpush.msk.msra.mxu2 %vm1336_vm4, %v1326_v60  ;;  %2030 = vmatpush.msk.msra.mxu3 %vm1336_vm4, %v1326_v60 }
 0x19f   : > { %1353 = vmatpush.msra.mxu0 %v1325_v37  ;;  %2027 = vmatpush.msra.mxu1 %v1325_v37 }
 0x1a0   : > { %1385 = vmatpush.msra.mxu2 %v1325_v37  ;;  %2031 = vmatpush.msra.mxu3 %v1325_v37 }
 0x1a1   : > { %1354 = vmatpush.msra.mxu0 %v1324_v38  ;;  %2028 = vmatpush.msra.mxu1 %v1324_v38 }
 0x1a2   : > { %1386 = vmatpush.msra.mxu2 %v1324_v38  ;;  %2032 = vmatpush.msra.mxu3 %v1324_v38 }
 0x1a3   : > { %1355 = vmatpush.msra.mxu0 %v1323_v29  ;;  %2029 = vmatpush.msra.mxu1 %v1323_v29 }
 0x1a4   : > { %1387 = vmatpush.msra.mxu2 %v1323_v29  ;;  %2033 = vmatpush.msra.mxu3 %v1323_v29 }
 0x1a5   : > { %1925 = vmatmul.msk.f32.vlgmr.msra.gmra.mxu2 %vm1329_vm5, %v1922_v43  ;;  %1926 = vmatmul.msk.f32.vlgmr.msra.gmra.mxu3 %vm1329_vm5, %v1923_v34 }
 0x1a6   : > { %1920 = vmatmul.msk.f32.vlgmr.msra.gmra.mxu0 %vm1329_vm5, %v1327_v44  ;;  %1921 = vmatmul.msk.f32.vlgmr.msra.gmra.mxu1 %vm1329_vm5, %v1328_v46 }
 0x223   : > { %v1357_v49 = vpop.f32.mrf.mxu0  ;;  %v1360_v50 = vpop.f32.mrf.mxu1 }
 0x228   : > { %v1389_v51 = vpop.f32.mrf.mxu2  ;;  %v1392_v52 = vpop.f32.mrf.mxu3 }
 0x229   : > { %v1395_v53 = vmax.f32 %v1357_v49, %v1389_v51  ;;  %v1396_v0 = vmax.f32 %v1360_v50, %v1392_v52 }
 0x22b   : > { %v2024_v19 = vpack.c.bf16 %v1396_v0, %v1395_v53 }
 0x22d   : > { %2025 = vst [vmem:[%s241_s23] sm:$0xff] %v2024_v19  }
 0x22e PF: > { %s16_s18 = sadd.s32 1, %s2095_s18  }
 0x22f   : > { %p13_p7 = scmp.ge.s32.totalorder %s16_s18, 4  }
 0x231   :  { %15 = sbr.rel (!%p13_p7) target bundleno = 1 (0x1), region = 79 }
 0x236   :  { %1422 = vsyncpa [#allocation3], 1 }
 0x237   :  { %1424 = vsyncpa [#allocation3 + $0x1], 1 }

// kernel: model_reducing_params_forward.9
= control target key start
LH: loop header
LB: loop body
LE: loop exit
PB: predicated region body
PF: predicated region fallthrough
CT: control target
= control target key end

     0   :  { %10 = vsyncpa [#allocation3], 0  ;;  %s1575_s18 = smov 0   ;;  %s1940_s0 = inlined_call_operand.vmem [shape: bf16[2,16,128], index: 0, kind: input, shape index: {}]   ;;  %s1941_s1 = inlined_call_operand.vmem [shape: bf16[3,128,224], index: 1, kind: input, shape index: {}]   ;;  %s1942_s2 = inlined_call_operand.vmem [shape: f32[1,224], index: 2, kind: input, shape index: {}]   ;;  %s1943_s3 = inlined_call_operand.hbm [shape: f32[2,224,256], index: 3, kind: input, shape index: {}]   ;;  %s1944_s4 = inlined_call_operand.vmem [shape: f32[2,16,14], index: 4, kind: input, shape index: {}]   ;;  %s1945_s5 = inlined_call_operand.vmem [shape: bf16[2,16,256], index: 5, kind: output, shape index: {}]  }
   0x1 LB: > { %s174_s21 = sshll.u32 %s1943_s3, 4  ;;  %s1584_s22 = sadd.s32 4294967295, %s1540_s18   ;;  %s1540_s18 = sphi %s1575_s18, %s16_s18   ;;  %s175_s21 = int_to_ptr.hbm [resolvable:$true] %s174_s21 }
   0x2   : > { %p1162_p0 = scmp.ge.s32.totalorder %s1540_s18, 1  ;;  %p157_p1 = scmp.lt.s32.totalorder %s1540_s18, 3 }
   0x3   : > { %p1479_p2 = scmp.eq.s32.totalorder %s1584_s22, 0  ;;  %s1542_s23 = smov [#allocation2]  }
   0x4   : > { %p158_p3 = pnand %p1162_p0, %p157_p1  ;;  %s176_s24 = sshll.u32 %s1542_s23, 4  ;;  %s177_s24 = int_to_ptr.vmem [resolvable:$true] %s176_s24 }
   0x5   : > { %s1543_s25 = smov 256   ;;  %s1544_s26 = smov 16  }
   0x6   : > { %p1475_p4 = pneg %p158_p3  ;;  %203 = sbr.rel (%p158_p3) target bundleno = 537 (0x219), region = 40 }
   0x8   : > { %p1476_p5 = pnand %p1479_p2, %p1475_p4 }
   0xa   : > { %1478 = dma.hbm_to_vmem [thread:$0]  (!%p1476_p5), %s175_s21, 14336, %s177_s24, [#allocation3], %s1543_s25, %s1543_s25, %s1544_s26  }
   0xb   : > { %1534 = dma.done.wait (%p1479_p2), [#allocation3], 14336  }
   0xc   : > { %1536 = vsyncadd (%p1479_p2), [#allocation3], 4294952960  ;;  %v1245_v0 = vld [vmem:[%s1941_s1 + $0xf0] sm:$0xf]  ;;  %v1452_v1 = vld [vmem:[%s1941_s1 + $0xf4] sm:$0xf0] }
   0xd   : > { %v1451_v2 = vld [vmem:[%s1941_s1 + $0xf4] sm:$0xf]  ;;  %v1246_v3 = vor.u32 %v1452_v1, %v1245_v0  ;;  %v1247_v4 = vld [vmem:[%s1941_s1 + $0xf8] sm:$0xf0]  ;;  %v1309_v5 = vld [vmem:[%s1941_s1 + $0x70] sm:$0xf] }
   0xe   : > { %v1436_v6 = vld [vmem:[%s1941_s1 + $0x74] sm:$0xf0]  ;;  %v1250_v7 = vor.u32 %v1451_v2, %v1247_v4  ;;  %v1237_v9 = vld [vmem:[%s1941_s1 + $0xe0] sm:$0xf]  ;;  %v1450_v10 = vld [vmem:[%s1941_s1 + $0xe4] sm:$0xf0] }
   0xf   : > { %v1310_v8 = vor.u32 %v1436_v6, %v1309_v5  ;;  %v1449_v11 = vld [vmem:[%s1941_s1 + $0xe4] sm:$0xf]  ;;  %371 = vmatpush.bf16.msra.mxu0 %v1246_v3  ;;  %v1238_v12 = vor.u32 %v1450_v10, %v1237_v9  ;;  %v1239_v13 = vld [vmem:[%s1941_s1 + $0xe8] sm:$0xf0]  ;;  %v1301_v14 = vld [vmem:[%s1941_s1 + $0x60] sm:$0xf] }
  0x10   : > { %v1434_v15 = vld [vmem:[%s1941_s1 + $0x64] sm:$0xf0]  ;;  %385 = vmatpush.bf16.msra.mxu1 %v1250_v7  ;;  %v1242_v16 = vor.u32 %v1449_v11, %v1239_v13  ;;  %v1229_v18 = vld [vmem:[%s1941_s1 + $0xd0] sm:$0xf]  ;;  %v1448_v19 = vld [vmem:[%s1941_s1 + $0xd4] sm:$0xf0] }
  0x11   : > { %483 = vmatpush.bf16.msra.mxu2 %v1310_v8  ;;  %v1302_v17 = vor.u32 %v1434_v15, %v1301_v14  ;;  %v1447_v20 = vld [vmem:[%s1941_s1 + $0xd4] sm:$0xf]  ;;  %v1231_v21 = vld [vmem:[%s1941_s1 + $0xd8] sm:$0xf0]  ;;  %v1293_v22 = vld [vmem:[%s1941_s1 + $0x50] sm:$0xf]  ;;  %v1230_v24 = vor.u32 %v1448_v19, %v1229_v18 }
  0x12   : > { %v1432_v23 = vld [vmem:[%s1941_s1 + $0x54] sm:$0xf0]  ;;  %p232_p6 = scmp.lt.s32.totalorder %s1584_s22, 1  ;;  %v1221_v25 = vld [vmem:[%s1941_s1 + $0xc0] sm:$0xf]  ;;  %v1234_v27 = vor.u32 %v1447_v20, %v1231_v21  ;;  %vm716_vm0 = vcmask 785408  }
  0x13   : > { %372 = vmatpush.bf16.msra.mxu0 %v1238_v12  ;;  %v1446_v26 = vld [vmem:[%s1941_s1 + $0xc4] sm:$0xf0]  ;;  %v1294_v28 = vor.u32 %v1432_v23, %v1293_v22  ;;  %v1445_v29 = vld [vmem:[%s1941_s1 + $0xc4] sm:$0xf]  ;;  %v1435_v30 = vld [vmem:[%s1941_s1 + $0x74] sm:$0xf] }
  0x14   : > { %386 = vmatpush.bf16.msra.mxu1 %v1242_v16  ;;  %v1311_v31 = vld [vmem:[%s1941_s1 + $0x78] sm:$0xf0]  ;;  %v1223_v32 = vld [vmem:[%s1941_s1 + $0xc8] sm:$0xf0]  ;;  %v1285_v33 = vld [vmem:[%s1941_s1 + $0x40] sm:$0xf]  ;;  %v1222_v37 = vor.u32 %v1446_v26, %v1221_v25 }
  0x15   : > { %484 = vmatpush.bf16.msra.mxu2 %v1302_v17  ;;  %v1430_v34 = vld [vmem:[%s1941_s1 + $0x44] sm:$0xf0]  ;;  %v1314_v35 = vor.u32 %v1435_v30, %v1311_v31  ;;  %v1433_v36 = vld [vmem:[%s1941_s1 + $0x64] sm:$0xf]  ;;  %s1947_s22 = smov (!%p232_p6, %s1584_s22), 1  ;;  %v1226_v41 = vor.u32 %v1445_v29, %v1223_v32  ;;  %vm977_vm1 = vcmask 1045504  }
  0x16   : > { %v1213_v38 = vld [vmem:[%s1941_s1 + $0xb0] sm:$0xf]  ;;  %v1444_v39 = vld [vmem:[%s1941_s1 + $0xb4] sm:$0xf0]  ;;  %v1303_v40 = vld [vmem:[%s1941_s1 + $0x68] sm:$0xf0]  ;;  %v1286_v42 = vor.u32 %v1430_v34, %v1285_v33 }
  0x17   : > { %373 = vmatpush.bf16.msra.mxu0 %v1230_v24  ;;  %497 = vmatpush.bf16.msra.mxu3 %v1314_v35  ;;  %v1443_v43 = vld [vmem:[%s1941_s1 + $0xb4] sm:$0xf]  ;;  %v1215_v44 = vld [vmem:[%s1941_s1 + $0xb8] sm:$0xf0]  ;;  %v1277_v45 = vld [vmem:[%s1941_s1 + $0x30] sm:$0xf]  ;;  %v1306_v46 = vor.u32 %v1433_v36, %v1303_v40  ;;  %v1214_v50 = vor.u32 %v1444_v39, %v1213_v38 }
  0x18   : > { %387 = vmatpush.bf16.msra.mxu1 %v1234_v27  ;;  %v1428_v47 = vld [vmem:[%s1941_s1 + $0x34] sm:$0xf0]  ;;  %v1431_v48 = vld [vmem:[%s1941_s1 + $0x54] sm:$0xf]  ;;  %v1295_v49 = vld [vmem:[%s1941_s1 + $0x58] sm:$0xf0]  ;;  %v1218_v54 = vor.u32 %v1443_v43, %v1215_v44 }
  0x19   : > { %485 = vmatpush.bf16.msra.mxu2 %v1294_v28  ;;  %s1419_s30 = sshll.u32 %s1947_s22, 3  ;;  %v1205_v51 = vld [vmem:[%s1941_s1 + $0xa0] sm:$0xf]  ;;  %v1442_v52 = vld [vmem:[%s1941_s1 + $0xa4] sm:$0xf0]  ;;  %v1298_v53 = vor.u32 %v1431_v48, %v1295_v49  ;;  %v1278_v55 = vor.u32 %v1428_v47, %v1277_v45  ;;  %vm970_vm2 = vcmask 113664  }
  0x1a   : > { %v1441_v56 = vld [vmem:[%s1941_s1 + $0xa4] sm:$0xf]  ;;  %v1287_v58 = vld [vmem:[%s1941_s1 + $0x48] sm:$0xf0]  ;;  %v1269_v60 = vld [vmem:[%s1941_s1 + $0x20] sm:$0xf]  ;;  %s1731_s26 = scalar_lea.vmem %s1940_s0, %s1419_s30  ;;  %v1206_v62 = vor.u32 %v1442_v52, %v1205_v51 }
  0x1b   : > { %374 = vmatpush.bf16.msra.mxu0 %v1222_v37  ;;  %498 = vmatpush.bf16.msra.mxu3 %v1306_v46  ;;  %v1429_v57 = vld [vmem:[%s1941_s1 + $0x44] sm:$0xf]  ;;  %v1207_v59 = vld [vmem:[%s1941_s1 + $0xa8] sm:$0xf0]  ;;  %v1426_v61 = vld [vmem:[%s1941_s1 + $0x24] sm:$0xf0] }
  0x1c   : > { %388 = vmatpush.bf16.msra.mxu1 %v1226_v41  ;;  %v1197_v63 = vld [vmem:[%s1941_s1 + $0x90] sm:$0xf]  ;;  %v1440_v0 = vld [vmem:[%s1941_s1 + $0x94] sm:$0xf0]  ;;  %v1439_v1 = vld [vmem:[%s1941_s1 + $0x94] sm:$0xf]  ;;  %v1290_v2 = vor.u32 %v1429_v57, %v1287_v58  ;;  %v1210_v3 = vor.u32 %v1441_v56, %v1207_v59  ;;  %v1270_v4 = vor.u32 %v1426_v61, %v1269_v60 }
  0x1d   : > { %486 = vmatpush.bf16.msra.mxu2 %v1286_v42  ;;  %v1199_v5 = vld [vmem:[%s1941_s1 + $0x98] sm:$0xf0]  ;;  %v242_v6 = vld [vmem:[%s1731_s26] sm:$0xff]   ;;  %v1427_v9 = vld [vmem:[%s1941_s1 + $0x34] sm:$0xf]  ;;  %v1198_v15 = vor.u32 %v1440_v0, %v1197_v63  ;;  %s1420_s6 = sshll.u32 %s1947_s22, 4 }
  0x1e   : > { %v1747_v7 = vld [vmem:[%s1731_s26] sm:$0xf0]  ;;  %v1494_v8 = vld [vmem:[%s1731_s26] sm:$0xf]   ;;  %v1261_v10 = vld [vmem:[%s1941_s1 + $0x10] sm:$0xf]  ;;  %v1202_v21 = vor.u32 %v1439_v1, %v1199_v5  ;;  %s241_s30 = scalar_lea.vmem %s1945_s5, %s1420_s6 }
  0x1f   : > { %375 = vmatpush.bf16.msra.mxu0 %v1214_v50  ;;  %499 = vmatpush.bf16.msra.mxu3 %v1298_v53  ;;  %v1424_v11 = vld [vmem:[%s1941_s1 + $0x14] sm:$0xf0]  ;;  %v1279_v12 = vld [vmem:[%s1941_s1 + $0x38] sm:$0xf0]  ;;  %v1189_v13 = vld [vmem:[%s1941_s1 + $0x80] sm:$0xf] }
  0x20   : > { %389 = vmatpush.bf16.msra.mxu1 %v1218_v54  ;;  %v1438_v14 = vld [vmem:[%s1941_s1 + $0x84] sm:$0xf0]  ;;  %v1437_v16 = vld [vmem:[%s1941_s1 + $0x84] sm:$0xf]  ;;  %v1191_v17 = vld [vmem:[%s1941_s1 + $0x88] sm:$0xf0]  ;;  %v1282_v20 = vor.u32 %v1427_v9, %v1279_v12  ;;  %v1262_v22 = vor.u32 %v1424_v11, %v1261_v10 }
  0x21   : > { %487 = vmatpush.bf16.msra.mxu2 %v1278_v55  ;;  %v1253_v18 = vld [vmem:[%s1941_s1] sm:$0xf]  ;;  %v1422_v19 = vld [vmem:[%s1941_s1 + $0x4] sm:$0xf0]  ;;  %v1537_v23 = vld [vmem:[%s1731_s26] sm:$0x70]  ;;  %v1190_v32 = vor.u32 %v1438_v14, %v1189_v13  ;;  %v1194_v35 = vor.u32 %v1437_v16, %v1191_v17 }
  0x22   : > { %v1425_v24 = vld [vmem:[%s1941_s1 + $0x24] sm:$0xf]  ;;  %v1271_v25 = vld [vmem:[%s1941_s1 + $0x28] sm:$0xf0]  ;;  %v1389_v26 = vld [vmem:[%s1941_s1 + $0x170] sm:$0xf]  ;;  %v1254_v36 = vor.u32 %v1422_v19, %v1253_v18  ;;  %v1495_v46 = vor.u32 %v1537_v23, %v1494_v8 }
  0x23   : > { %376 = vmatpush.bf16.msra.mxu0 %v1206_v62  ;;  %500 = vmatpush.bf16.msra.mxu3 %v1290_v2  ;;  %v1468_v27 = vld [vmem:[%s1941_s1 + $0x174] sm:$0xf0]  ;;  %v286_v28 = vshll.u32 %v242_v6, 16  ;;  %v1467_v29 = vld [vmem:[%s1941_s1 + $0x174] sm:$0xf]  ;;  %v284_v31 = vshrl.u32 %v242_v6, 16  ;;  %v1274_v33 = vor.u32 %v1425_v24, %v1271_v25 }
  0x24   : > { %390 = vmatpush.bf16.msra.mxu1 %v1210_v3  ;;  %v1391_v30 = vld [vmem:[%s1941_s1 + $0x178] sm:$0xf0]  ;;  %v1423_v37 = vld [vmem:[%s1941_s1 + $0x14] sm:$0xf]  ;;  %v1390_v39 = vor.u32 %v1468_v27, %v1389_v26  ;;  %v1381_v41 = vld [vmem:[%s1941_s1 + $0x160] sm:$0xf] }
  0x25   : > { %488 = vmatpush.bf16.msra.mxu2 %v1270_v4  ;;  %v288_v34 = vrot.slane %v286_v28, 1  ;;  %v1263_v38 = vld [vmem:[%s1941_s1 + $0x18] sm:$0xf0]  ;;  %v1394_v40 = vor.u32 %v1467_v29, %v1391_v30  ;;  %v1466_v42 = vld [vmem:[%s1941_s1 + $0x164] sm:$0xf0]  ;;  %v690_v54 = vld [vmem:[#allocation2 + $0xf0] sm:$0xff] }
  0x26   : > { %v1465_v43 = vld [vmem:[%s1941_s1 + $0x164] sm:$0xf]  ;;  %v1383_v44 = vld [vmem:[%s1941_s1 + $0x168] sm:$0xf0]  ;;  %v1266_v47 = vor.u32 %v1423_v37, %v1263_v38  ;;  %v1382_v50 = vor.u32 %v1466_v42, %v1381_v41  ;;  %v1373_v52 = vld [vmem:[%s1941_s1 + $0x150] sm:$0xf] }
  0x27   : > { %377 = vmatpush.bf16.msra.mxu0 %v1198_v15  ;;  %501 = vmatpush.bf16.msra.mxu3 %v1282_v20  ;;  %v289_v45 = vor.u32 %v288_v34, %v284_v31  ;;  %v1421_v48 = vld [vmem:[%s1941_s1 + $0x4] sm:$0xf]  ;;  %v1255_v49 = vld [vmem:[%s1941_s1 + $0x8] sm:$0xf0]  ;;  %v1386_v51 = vor.u32 %v1465_v43, %v1383_v44  ;;  %v1464_v53 = vld [vmem:[%s1941_s1 + $0x154] sm:$0xf0] }
  0x28   : > { %391 = vmatpush.bf16.msra.mxu1 %v1202_v21  ;;  %v1463_v55 = vld [vmem:[%s1941_s1 + $0x154] sm:$0xf]  ;;  %v1375_v56 = vld [vmem:[%s1941_s1 + $0x158] sm:$0xf0]  ;;  %v688_v57 = vld [vmem:[#allocation2 + $0xe0] sm:$0xff]  ;;  %v1258_v58 = vor.u32 %v1421_v48, %v1255_v49  ;;  %v1374_v60 = vor.u32 %v1464_v53, %v1373_v52 }
  0x29   : > { %489 = vmatpush.bf16.msra.mxu2 %v1262_v22  ;;  %v686_v59 = vld [vmem:[#allocation2 + $0xd0] sm:$0xff]  ;;  %v1378_v61 = vor.u32 %v1463_v55, %v1375_v56  ;;  %v1365_v62 = vld [vmem:[%s1941_s1 + $0x140] sm:$0xf]  ;;  %v1462_v1 = vld [vmem:[%s1941_s1 + $0x144] sm:$0xf0] }
  0x2a   : > { %v684_v63 = vld [vmem:[#allocation2 + $0xc0] sm:$0xff]  ;;  %v714_v0 = vld [vmem:[#allocation2 + $0x1b0] sm:$0xff]  ;;  %v1367_v3 = vld [vmem:[%s1941_s1 + $0x148] sm:$0xf0]  ;;  %v1366_v6 = vor.u32 %v1462_v1, %v1365_v62 }
  0x2b   : > { %378 = vmatpush.bf16.msra.mxu0 %v1190_v32  ;;  %502 = vmatpush.bf16.msra.mxu3 %v1274_v33  ;;  %v1461_v2 = vld [vmem:[%s1941_s1 + $0x144] sm:$0xf]  ;;  %v682_v4 = vld [vmem:[#allocation2 + $0xb0] sm:$0xff]  ;;  %v1460_v11 = vld [vmem:[%s1941_s1 + $0x134] sm:$0xf0] }
  0x2c   : > { %392 = vmatpush.bf16.msra.mxu1 %v1194_v35  ;;  %v712_v5 = vld [vmem:[#allocation2 + $0x1a0] sm:$0xff]  ;;  %v1370_v8 = vor.u32 %v1461_v2, %v1367_v3  ;;  %v1357_v9 = vld [vmem:[%s1941_s1 + $0x130] sm:$0xf]  ;;  %v1459_v12 = vld [vmem:[%s1941_s1 + $0x134] sm:$0xf] }
  0x2d   : > { %490 = vmatpush.bf16.msra.mxu2 %v1254_v36  ;;  %v680_v10 = vld [vmem:[#allocation2 + $0xa0] sm:$0xff]  ;;  %v1359_v13 = vld [vmem:[%s1941_s1 + $0x138] sm:$0xf0]  ;;  %v710_v14 = vld [vmem:[#allocation2 + $0x190] sm:$0xff]  ;;  %v1358_v16 = vor.u32 %v1460_v11, %v1357_v9 }
  0x2e   : > { %379 = vmatmul.bf16.vlgmr.msra.gmra.mxu0 %v289_v45  ;;  %v678_v15 = vld [vmem:[#allocation2 + $0x90] sm:$0xff]  ;;  %v1362_v17 = vor.u32 %v1459_v12, %v1359_v13  ;;  %v1349_v18 = vld [vmem:[%s1941_s1 + $0x120] sm:$0xf]  ;;  %v1458_v20 = vld [vmem:[%s1941_s1 + $0x124] sm:$0xf0] }
  0x2f   : > { %614 = vmatpush.bf16.msrb.mxu0 %v1390_v39  ;;  %503 = vmatpush.bf16.msra.mxu3 %v1266_v47  ;;  %v708_v19 = vld [vmem:[#allocation2 + $0x180] sm:$0xff]  ;;  %v1351_v22 = vld [vmem:[%s1941_s1 + $0x128] sm:$0xf0]  ;;  %v1350_v23 = vor.u32 %v1458_v20, %v1349_v18  ;;  %v1341_v25 = vld [vmem:[%s1941_s1 + $0x110] sm:$0xf] }
  0x30   : > { %628 = vmatpush.bf16.msrb.mxu1 %v1394_v40  ;;  %491 = vmatmul.bf16.vlgmr.msra.gmra.mxu2 %v1495_v46  ;;  %v1457_v21 = vld [vmem:[%s1941_s1 + $0x124] sm:$0xf]  ;;  %v1497_v26 = vld [vmem:[%s1731_s26] sm:$0xe]  ;;  %v1456_v27 = vld [vmem:[%s1941_s1 + $0x114] sm:$0xf0] }
  0x31   : > { %723 = vmatpush.msrb.mxu2 %v690_v54  ;;  %393 = vmatmul.bf16.vlgmr.msra.gmra.mxu1 %v289_v45  ;;  %v1354_v24 = vor.u32 %v1457_v21, %v1351_v22  ;;  %v1455_v28 = vld [vmem:[%s1941_s1 + $0x114] sm:$0xf]  ;;  %v1343_v29 = vld [vmem:[%s1941_s1 + $0x118] sm:$0xf0]  ;;  %v1342_v30 = vor.u32 %v1456_v27, %v1341_v25  ;;  %v1333_v32 = vld [vmem:[%s1941_s1 + $0x100] sm:$0xf]  ;;  %v1498_v36 = vor.u32 %v1497_v26, %v1747_v7 }
  0x32   : > { %v1346_v31 = vor.u32 %v1455_v28, %v1343_v29  ;;  %v1454_v33 = vld [vmem:[%s1941_s1 + $0x104] sm:$0xf0]  ;;  %v1453_v34 = vld [vmem:[%s1941_s1 + $0x104] sm:$0xf]  ;;  %v1335_v35 = vld [vmem:[%s1941_s1 + $0x108] sm:$0xf0] }
  0x33   : > { %724 = vmatpush.msrb.mxu2 %v688_v57  ;;  %615 = vmatpush.bf16.msrb.mxu0 %v1382_v50  ;;  %v1334_v37 = vor.u32 %v1454_v33, %v1333_v32  ;;  %v1338_v38 = vor.u32 %v1453_v34, %v1335_v35  ;;  %v715_v39 = vld [vmem:[#allocation2 + $0x1b8] sm:$0xff]  ;;  %v532_v40 = vrot.slane %v1498_v36, 1  ;;  %v713_v41 = vld [vmem:[#allocation2 + $0x1a8] sm:$0xff]  ;;  %v676_v44 = vld [vmem:[#allocation2 + $0x80] sm:$0xff] }
  0x34   : > { %629 = vmatpush.bf16.msrb.mxu1 %v1386_v51  ;;  %504 = vmatpush.bf16.msra.mxu3 %v1258_v58  ;;  %v711_v42 = vld [vmem:[#allocation2 + $0x198] sm:$0xff]  ;;  %v709_v43 = vld [vmem:[#allocation2 + $0x188] sm:$0xff]  ;;  %v846_v45 = vld [vmem:[#allocation2 + $0x2b0] sm:$0xff] }
  0x35   : > { %725 = vmatpush.msrb.mxu2 %v686_v59  ;;  %v706_v7 = vld [vmem:[#allocation2 + $0x170] sm:$0xff]  ;;  %v844_v48 = vld [vmem:[#allocation2 + $0x2a0] sm:$0xff]  ;;  %v705_v50 = vld [vmem:[#allocation2 + $0x168] sm:$0xff] }
  0x36   : > { %v674_v47 = vld [vmem:[#allocation2 + $0x70] sm:$0xff]  ;;  %v704_v49 = vld [vmem:[#allocation2 + $0x160] sm:$0xff]  ;;  %v703_v54 = vld [vmem:[#allocation2 + $0x158] sm:$0xff] }
  0x37   : > { %726 = vmatpush.msrb.mxu2 %v684_v63  ;;  %616 = vmatpush.bf16.msrb.mxu0 %v1374_v60  ;;  %v672_v51 = vld [vmem:[#allocation2 + $0x60] sm:$0xff]  ;;  %v842_v52 = vld [vmem:[#allocation2 + $0x290] sm:$0xff]  ;;  %v701_v58 = vld [vmem:[#allocation2 + $0x148] sm:$0xff] }
  0x38   : > { %750 = vmatpush.msrb.mxu3 %v714_v0  ;;  %630 = vmatpush.bf16.msrb.mxu1 %v1378_v61  ;;  %v702_v53 = vld [vmem:[#allocation2 + $0x150] sm:$0xff]  ;;  %v840_v56 = vld [vmem:[#allocation2 + $0x280] sm:$0xff]  ;;  %v699_v62 = vld [vmem:[#allocation2 + $0x138] sm:$0xff] }
  0x39   : > { %505 = vmatmul.bf16.vlgmr.msra.gmra.mxu3 %v1495_v46  ;;  %727 = vmatpush.msrb.mxu2 %v682_v4  ;;  %v707_v46 = vld [vmem:[#allocation2 + $0x178] sm:$0xff]  ;;  %v670_v55 = vld [vmem:[#allocation2 + $0x50] sm:$0xff]  ;;  %v700_v57 = vld [vmem:[#allocation2 + $0x140] sm:$0xff] }
  0x3a   : > { %751 = vmatpush.msrb.mxu3 %v712_v5  ;;  %v668_v59 = vld [vmem:[#allocation2 + $0x40] sm:$0xff]  ;;  %v838_v60 = vld [vmem:[#allocation2 + $0x270] sm:$0xff]  ;;  %v697_v2 = vld [vmem:[#allocation2 + $0x128] sm:$0xff] }
  0x3b   : > { %728 = vmatpush.msrb.mxu2 %v680_v10  ;;  %617 = vmatpush.bf16.msrb.mxu0 %v1366_v6  ;;  %v698_v61 = vld [vmem:[#allocation2 + $0x130] sm:$0xff]  ;;  %v836_v0 = vld [vmem:[#allocation2 + $0x260] sm:$0xff]  ;;  %v695_v6 = vld [vmem:[#allocation2 + $0x118] sm:$0xff] }
  0x3c   : > { %631 = vmatpush.bf16.msrb.mxu1 %v1370_v8  ;;  %752 = vmatpush.msrb.mxu3 %v710_v14  ;;  %v666_v63 = vld [vmem:[#allocation2 + $0x30] sm:$0xff]  ;;  %v696_v1 = vld [vmem:[#allocation2 + $0x120] sm:$0xff]  ;;  %v693_v11 = vld [vmem:[#allocation2 + $0x108] sm:$0xff] }
  0x3d   : > { %729 = vmatpush.msrb.mxu2 %v678_v15  ;;  %v664_v3 = vld [vmem:[#allocation2 + $0x20] sm:$0xff]  ;;  %v834_v4 = vld [vmem:[#allocation2 + $0x250] sm:$0xff]  ;;  %v691_v13 = vld [vmem:[#allocation2 + $0xf8] sm:$0xff] }
  0x3e   : > { %753 = vmatpush.msrb.mxu3 %v708_v19  ;;  %v694_v5 = vld [vmem:[#allocation2 + $0x110] sm:$0xff]  ;;  %v832_v9 = vld [vmem:[#allocation2 + $0x240] sm:$0xff]  ;;  %v847_v15 = vld [vmem:[#allocation2 + $0x2b8] sm:$0xff] }
  0x3f   : > { %618 = vmatpush.bf16.msrb.mxu0 %v1358_v16  ;;  %730 = vmatpush.msrb.mxu2 %v676_v44  ;;  %v662_v8 = vld [vmem:[#allocation2 + $0x10] sm:$0xff]  ;;  %v692_v10 = vld [vmem:[#allocation2 + $0x100] sm:$0xff]  ;;  %v845_v19 = vld [vmem:[#allocation2 + $0x2a8] sm:$0xff] }
  0x40   : > { %632 = vmatpush.bf16.msrb.mxu1 %v1362_v17  ;;  %754 = vmatpush.msrb.mxu3 %v706_v7  ;;  %v660_v12 = vld [vmem:[#allocation2] sm:$0xff]  ;;  %v830_v14 = vld [vmem:[#allocation2 + $0x230] sm:$0xff]  ;;  %v689_v17 = vld [vmem:[#allocation2 + $0xe8] sm:$0xff] }
  0x41   : > { %731 = vmatpush.msrb.mxu2 %v674_v47  ;;  %v870_v16 = vld [vmem:[#allocation2 + $0x370] sm:$0xff]  ;;  %v828_v18 = vld [vmem:[#allocation2 + $0x220] sm:$0xff]  ;;  %v687_v21 = vld [vmem:[#allocation2 + $0xd8] sm:$0xff] }
  0x42   : > { %755 = vmatpush.msrb.mxu3 %v704_v49  ;;  %v868_v20 = vld [vmem:[#allocation2 + $0x360] sm:$0xff]  ;;  %v826_v22 = vld [vmem:[#allocation2 + $0x210] sm:$0xff]  ;;  %v685_v25 = vld [vmem:[#allocation2 + $0xc8] sm:$0xff] }
  0x43   : > { %619 = vmatpush.bf16.msrb.mxu0 %v1350_v23  ;;  %732 = vmatpush.msrb.mxu2 %v672_v51  ;;  %v843_v23 = vld [vmem:[#allocation2 + $0x298] sm:$0xff]  ;;  %v824_v26 = vld [vmem:[#allocation2 + $0x200] sm:$0xff]  ;;  %v841_v27 = vld [vmem:[#allocation2 + $0x288] sm:$0xff] }
  0x44   : > { %633 = vmatpush.bf16.msrb.mxu1 %v1354_v24  ;;  %756 = vmatpush.msrb.mxu3 %v702_v53  ;;  %v866_v24 = vld [vmem:[#allocation2 + $0x350] sm:$0xff]  ;;  %v864_v28 = vld [vmem:[#allocation2 + $0x340] sm:$0xff]  ;;  %v683_v29 = vld [vmem:[#allocation2 + $0xb8] sm:$0xff] }
  0x45   : > { %733 = vmatpush.msrb.mxu2 %v670_v55  ;;  %v862_v32 = vld [vmem:[#allocation2 + $0x330] sm:$0xff]  ;;  %v681_v33 = vld [vmem:[#allocation2 + $0xa8] sm:$0xff]  ;;  %v820_v34 = vld [vmem:[#allocation2 + $0x1e0] sm:$0xff] }
  0x46   : > { %757 = vmatpush.msrb.mxu3 %v700_v57  ;;  %v837_v35 = vld [vmem:[#allocation2 + $0x268] sm:$0xff]  ;;  %v860_v36 = vld [vmem:[#allocation2 + $0x320] sm:$0xff]  ;;  %v831_v7 = vld [vmem:[#allocation2 + $0x238] sm:$0xff] }
  0x47   : > { %620 = vmatpush.bf16.msrb.mxu0 %v1342_v30  ;;  %734 = vmatpush.msrb.mxu2 %v668_v59  ;;  %v822_v30 = vld [vmem:[#allocation2 + $0x1f0] sm:$0xff]  ;;  %v856_v44 = vld [vmem:[#allocation2 + $0x300] sm:$0xff]  ;;  %v673_v47 = vld [vmem:[#allocation2 + $0x68] sm:$0xff] }
  0x48   : > { %634 = vmatpush.bf16.msrb.mxu1 %v1346_v31  ;;  %758 = vmatpush.msrb.mxu3 %v698_v61  ;;  %v839_v31 = vld [vmem:[#allocation2 + $0x278] sm:$0xff]  ;;  %v852_v49 = vld [vmem:[#allocation2 + $0x2e0] sm:$0xff]  ;;  %v850_v53 = vld [vmem:[#allocation2 + $0x2d0] sm:$0xff] }
  0x49   : > { %735 = vmatpush.msrb.mxu2 %v666_v63  ;;  %v671_v51 = vld [vmem:[#allocation2 + $0x58] sm:$0xff]  ;;  %v825_v55 = vld [vmem:[#allocation2 + $0x208] sm:$0xff]  ;;  %v848_v57 = vld [vmem:[#allocation2 + $0x2c0] sm:$0xff] }
  0x4a   : > { %759 = vmatpush.msrb.mxu3 %v696_v1  ;;  %v823_v59 = vld [vmem:[#allocation2 + $0x1f8] sm:$0xff]  ;;  %v821_v61 = vld [vmem:[#allocation2 + $0x1e8] sm:$0xff] }
  0x4b   : > { %621 = vmatpush.bf16.msrb.mxu0 %v1334_v37  ;;  %736 = vmatpush.msrb.mxu2 %v664_v3  ;;  %v679_v37 = vld [vmem:[#allocation2 + $0x98] sm:$0xff]  ;;  %v817_v1 = vld [vmem:[#allocation2 + $0x1c8] sm:$0xff] }
  0x4c   : > { %635 = vmatpush.bf16.msrb.mxu1 %v1338_v38  ;;  %760 = vmatpush.msrb.mxu3 %v694_v5  ;;  %v818_v38 = vld [vmem:[#allocation2 + $0x1d0] sm:$0xff]  ;;  %v819_v63 = vld [vmem:[#allocation2 + $0x1d8] sm:$0xff] }
  0x4d   : > { %737 = vmatpush.msrb.mxu2 %v662_v8 }
  0x4e   : > { %622 = vmatmul.bf16.vlgmr.msrb.gmra.mxu0 %v532_v40  ;;  %761 = vmatpush.msrb.mxu3 %v692_v10 }
  0x4f   : > { %796 = vmatpush.msra.mxu0 %v715_v39  ;;  %636 = vmatmul.bf16.vlgmr.msrb.gmra.mxu1 %v532_v40  ;;  %v835_v39 = vld [vmem:[#allocation2 + $0x258] sm:$0xff]  ;;  %v858_v40 = vld [vmem:[#allocation2 + $0x310] sm:$0xff] }
  0x50   : > { %872 = vmatpush.msra.mxu1 %v846_v45  ;;  %738 = vmatpush.msrb.mxu2 %v660_v12  ;;  %v675_v45 = vld [vmem:[#allocation2 + $0x78] sm:$0xff] }
  0x51   : > { %797 = vmatpush.msra.mxu0 %v713_v41  ;;  %769 = vmatpush.msra.mxu3 %v691_v13  ;;  %v677_v41 = vld [vmem:[#allocation2 + $0x88] sm:$0xff] }
  0x52   : > { %873 = vmatpush.msra.mxu1 %v844_v48  ;;  %899 = vmatpush.msra.mxu2 %v870_v16  ;;  %v829_v48 = vld [vmem:[#allocation2 + $0x228] sm:$0xff] }
  0x53   : > { %798 = vmatpush.msra.mxu0 %v711_v42  ;;  %770 = vmatpush.msra.mxu3 %v689_v17  ;;  %v816_v42 = vld [vmem:[#allocation2 + $0x1c0] sm:$0xff] }
  0x54   : > { %874 = vmatpush.msra.mxu1 %v842_v52  ;;  %900 = vmatpush.msra.mxu2 %v868_v20  ;;  %v827_v52 = vld [vmem:[#allocation2 + $0x218] sm:$0xff] }
  0x55   : > { %799 = vmatpush.msra.mxu0 %v709_v43  ;;  %771 = vmatpush.msra.mxu3 %v687_v21  ;;  %v833_v43 = vld [vmem:[#allocation2 + $0x248] sm:$0xff] }
  0x56   : > { %875 = vmatpush.msra.mxu1 %v840_v56  ;;  %901 = vmatpush.msra.mxu2 %v866_v24 }
  0x57   : > { %800 = vmatpush.msra.mxu0 %v707_v46  ;;  %772 = vmatpush.msra.mxu3 %v685_v25  ;;  %v854_v46 = vld [vmem:[#allocation2 + $0x2f0] sm:$0xff] }
  0x58   : > { %876 = vmatpush.msra.mxu1 %v838_v60  ;;  %902 = vmatpush.msra.mxu2 %v864_v28  ;;  %v665_v60 = vld [vmem:[#allocation2 + $0x28] sm:$0xff] }
  0x59   : > { %801 = vmatpush.msra.mxu0 %v705_v50  ;;  %773 = vmatpush.msra.mxu3 %v683_v29 }
  0x5a   : > { %877 = vmatpush.msra.mxu1 %v836_v0  ;;  %903 = vmatpush.msra.mxu2 %v862_v32  ;;  %v661_v0 = vld [vmem:[#allocation2 + $0x8] sm:$0xff] }
  0x5b   : > { %802 = vmatpush.msra.mxu0 %v703_v54  ;;  %774 = vmatpush.msra.mxu3 %v681_v33  ;;  %v669_v54 = vld [vmem:[#allocation2 + $0x48] sm:$0xff] }
  0x5c   : > { %878 = vmatpush.msra.mxu1 %v834_v4  ;;  %904 = vmatpush.msra.mxu2 %v860_v36  ;;  %v863_v36 = vld [vmem:[#allocation2 + $0x338] sm:$0xff] }
  0x5d   : > { %803 = vmatpush.msra.mxu0 %v701_v58  ;;  %775 = vmatpush.msra.mxu3 %v679_v37  ;;  %v667_v58 = vld [vmem:[#allocation2 + $0x38] sm:$0xff]  ;;  %v861_v37 = vld [vmem:[#allocation2 + $0x328] sm:$0xff] }
  0x5e   : > { %879 = vmatpush.msra.mxu1 %v832_v9  ;;  %905 = vmatpush.msra.mxu2 %v858_v40  ;;  %v855_v40 = vld [vmem:[#allocation2 + $0x2f8] sm:$0xff] }
  0x5f   : > { %804 = vmatpush.msra.mxu0 %v699_v62  ;;  %776 = vmatpush.msra.mxu3 %v677_v41  ;;  %v663_v62 = vld [vmem:[#allocation2 + $0x18] sm:$0xff]  ;;  %v853_v41 = vld [vmem:[#allocation2 + $0x2e8] sm:$0xff] }
  0x60   : > { %880 = vmatpush.msra.mxu1 %v830_v14  ;;  %906 = vmatpush.msra.mxu2 %v856_v44 }
  0x61   : > { %805 = vmatpush.msra.mxu0 %v697_v2  ;;  %777 = vmatpush.msra.mxu3 %v675_v45 }
  0x62   : > { %881 = vmatpush.msra.mxu1 %v828_v18  ;;  %907 = vmatpush.msra.mxu2 %v854_v46 }
  0x63   : > { %806 = vmatpush.msra.mxu0 %v695_v6  ;;  %778 = vmatpush.msra.mxu3 %v673_v47  ;;  %v646_v6 = vld [vmem:[%s1942_s2] sm:$0x3] }
  0x64   : > { %882 = vmatpush.msra.mxu1 %v826_v22  ;;  %908 = vmatpush.msra.mxu2 %v852_v49  ;;  %v648_v10 = vperm.slane %v646_v6, 0  ;;  %v871_v22 = vld [vmem:[#allocation2 + $0x378] sm:$0xff] }
  0x65   : > { %807 = vmatpush.msra.mxu0 %v693_v11  ;;  %779 = vmatpush.msra.mxu3 %v671_v51  ;;  %v649_v11 = vperm.slane %v646_v6, 1 }
  0x66   : > { %883 = vmatpush.msra.mxu1 %v824_v26  ;;  %909 = vmatpush.msra.mxu2 %v850_v53 }
  0x67   : > { %918 = vmatpush.msrb.mxu0 %v847_v15  ;;  %780 = vmatpush.msra.mxu3 %v669_v54 }
  0x68   : > { %884 = vmatpush.msra.mxu1 %v822_v30  ;;  %910 = vmatpush.msra.mxu2 %v848_v57  ;;  %v867_v30 = vld [vmem:[#allocation2 + $0x358] sm:$0xff] }
  0x69   : > { %919 = vmatpush.msrb.mxu0 %v845_v19  ;;  %781 = vmatpush.msra.mxu3 %v667_v58 }
  0x6a   : > { %885 = vmatpush.msra.mxu1 %v820_v34 }
  0x6b   : > { %920 = vmatpush.msrb.mxu0 %v843_v23  ;;  %782 = vmatpush.msra.mxu3 %v665_v60  ;;  %v968_v60 = vld [vmem:[%s1944_s4] sm:$0xff] }
  0x6c   : > { %886 = vmatpush.msra.mxu1 %v818_v38  ;;  %v859_v38 = vld [vmem:[#allocation2 + $0x318] sm:$0xff] }
  0x6d   : > { %921 = vmatpush.msrb.mxu0 %v841_v27  ;;  %783 = vmatpush.msra.mxu3 %v663_v62  ;;  %v869_v27 = vld [vmem:[#allocation2 + $0x368] sm:$0xff] }
  0x6e   : > { %887 = vmatpush.msra.mxu1 %v816_v42  ;;  %v851_v42 = vld [vmem:[#allocation2 + $0x2d8] sm:$0xff] }
  0x6f   : > { %922 = vmatpush.msrb.mxu0 %v839_v31  ;;  %784 = vmatpush.msra.mxu3 %v661_v0 }
  0x71   : > { %923 = vmatpush.msrb.mxu0 %v837_v35  ;;  %v865_v35 = vld [vmem:[#allocation2 + $0x348] sm:$0xff] }
  0x73   : > { %924 = vmatpush.msrb.mxu0 %v835_v39  ;;  %v857_v39 = vld [vmem:[#allocation2 + $0x308] sm:$0xff] }
  0x75   : > { %925 = vmatpush.msrb.mxu0 %v833_v43  ;;  %v849_v43 = vld [vmem:[#allocation2 + $0x2c8] sm:$0xff] }
  0x77   : > { %926 = vmatpush.msrb.mxu0 %v831_v7 }
  0x79   : > { %927 = vmatpush.msrb.mxu0 %v829_v48 }
  0x7b   : > { %928 = vmatpush.msrb.mxu0 %v827_v52 }
  0x7d   : > { %929 = vmatpush.msrb.mxu0 %v825_v55 }
  0x7f   : > { %930 = vmatpush.msrb.mxu0 %v823_v59 }
  0x81   : > { %931 = vmatpush.msrb.mxu0 %v821_v61 }
  0x83   : > { %932 = vmatpush.msrb.mxu0 %v819_v63  ;;  %v969_v63 = vld [vmem:[%s1944_s4 + $0x8] sm:$0xff] }
  0x85   : > { %933 = vmatpush.msrb.mxu0 %v817_v1 }
  0xab   : > { %v380_v56 = vpop.f32.mrf.mxu0 }
  0xae   : > { %v394_v50 = vpop.f32.mrf.mxu1 }
  0xb3   : > { %v382_v3 = vpop.f32.mrf.mxu0  ;;  %v492_v4 = vpop.f32.mrf.mxu2 }
  0xb4   : > { %v493_v9 = vadd.f32 %v492_v4, %v380_v56 }
  0xb6   : > { %v396_v2 = vpop.f32.mrf.mxu1 }
  0xbb   : > { %v494_v18 = vpop.f32.mrf.mxu2 }
  0xbc   : > { %v506_v5 = vpop.f32.mrf.mxu3  ;;  %v495_v23 = vadd.f32 %v494_v18, %v382_v3 }
  0xbd   : > { %v507_v8 = vadd.f32 %v506_v5, %v394_v50 }
  0xc4   : > { %v508_v19 = vpop.f32.mrf.mxu3 }
  0xc5   : > { %v509_v24 = vadd.f32 %v508_v19, %v396_v2 }
  0xcb   : > { %v623_v12 = vpop.f32.mrf.mxu0 }
  0xcc   : > { %v637_v13 = vpop.f32.mrf.mxu1  ;;  %v642_v14 = vadd.f32 %v623_v12, %v493_v9 }
  0xcd   : > { %v643_v15 = vadd.f32 %v637_v13, %v507_v8 }
  0xce   : > { %v652_v16 = vadd.f32 %v648_v10, %v642_v14 }
  0xcf   : > { %v653_v17 = vadd.f32 %v649_v11, %v643_v15 }
  0xd0   : > { %v656_v20 = vmax.f32 %v652_v16, 0.0 }
  0xd1   : > { %v657_v21 = vmax.f32 %v653_v17, 0.0 }
  0xd2   : > { %739 = vmatmul.f32.vlgmr.msrb.gmra.mxu2 %v656_v20  ;;  %888 = vmatmul.f32.vlgmr.msra.gmra.mxu1 %v656_v20 }
  0xd3   : > { %1395 = vmatmul.msk.f32.vlgmr.msrb.gmra.mxu3 %vm716_vm0, %v657_v21  ;;  %1397 = vmatmul.msk.f32.vlgmr.msra.gmra.mxu0 %vm716_vm0, %v657_v21  ;;  %v625_v25 = vpop.f32.mrf.mxu0 }
  0xd4   : > { %v639_v26 = vpop.f32.mrf.mxu1  ;;  %v644_v28 = vadd.f32 %v625_v25, %v495_v23  ;;  %945 = vmatpush.msrb.mxu2 %v871_v22 }
  0xd5   : > { %v645_v29 = vadd.f32 %v639_v26, %v509_v24 }
  0xd6   : > { %v654_v31 = vadd.f32 %v648_v10, %v644_v28  ;;  %946 = vmatpush.msrb.mxu2 %v869_v27  ;;  %v1409_v10 = vld [vmem:[%s1944_s4 + $0x10] sm:$0xff] }
  0xd7   : > { %v655_v32 = vadd.f32 %v649_v11, %v645_v29  ;;  %v1410_v11 = vld [vmem:[%s1944_s4 + $0x18] sm:$0xff] }
  0xd8   : > { %v658_v33 = vmax.f32 %v654_v31, 0.0  ;;  %947 = vmatpush.msrb.mxu2 %v867_v30 }
  0xd9   : > { %v659_v34 = vmax.f32 %v655_v32, 0.0 }
  0xda   : > { %742 = vmatmul.f32.gmra.mxu2 %v658_v33  ;;  %891 = vmatmul.f32.gmra.mxu1 %v658_v33 }
  0xdb   : > { %1396 = vmatmul.msk.f32.gmra.mxu3 %vm716_vm0, %v659_v34  ;;  %1398 = vmatmul.msk.f32.gmra.mxu0 %vm716_vm0, %v659_v34 }
  0xdc   : > { %948 = vmatpush.msrb.mxu2 %v865_v35 }
  0xde   : > { %949 = vmatpush.msrb.mxu2 %v863_v36 }
  0xe0   : > { %950 = vmatpush.msrb.mxu2 %v861_v37 }
  0xe2   : > { %1399 = vmatmul.msk.f32.vlgmr.msra.gmra.mxu2 %vm716_vm0, %v657_v21 }
  0xe3   : > { %785 = vmatmul.f32.vlgmr.msra.gmra.mxu3 %v656_v20  ;;  %934 = vmatmul.f32.vlgmr.msrb.gmra.mxu0 %v656_v20 }
  0xe4   : > { %951 = vmatpush.msrb.mxu2 %v859_v38 }
  0xe6   : > { %952 = vmatpush.msrb.mxu2 %v857_v39 }
  0xe8   : > { %953 = vmatpush.msrb.mxu2 %v855_v40 }
  0xea   : > { %954 = vmatpush.msrb.mxu2 %v853_v41 }
  0xeb   : > { %788 = vmatmul.f32.gmra.mxu3 %v658_v33  ;;  %1400 = vmatmul.msk.f32.gmra.mxu2 %vm716_vm0, %v659_v34 }
  0xec   : > { %937 = vmatmul.f32.gmra.mxu0 %v658_v33  ;;  %955 = vmatpush.msrb.mxu2 %v851_v42 }
  0xee   : > { %956 = vmatpush.msrb.mxu2 %v849_v43 }
  0xf3   : > { %1401 = vmatmul.msk.f32.vlgmr.msrb.gmra.mxu2 %vm716_vm0, %v657_v21 }
  0xfb   : > { %1402 = vmatmul.msk.f32.gmra.mxu2 %vm716_vm0, %v659_v34 }
 0x14f   : > { %v889_v47 = vpop.f32.mrf.mxu1 }
 0x150   : > { %v809_v46 = vpop.f32.mrf.mxu0 }
 0x155   : > { %v740_v44 = vpop.f32.mrf.mxu2 }
 0x156   : > { %v763_v45 = vpop.f32.mrf.mxu3 }
 0x157   : > { %v892_v51 = vpop.f32.mrf.mxu1  ;;  %v764_v56 = vadd.f32 %v763_v45, %v740_v44 }
 0x158   : > { %v812_v50 = vpop.f32.mrf.mxu0 }
 0x15d   : > { %v743_v7 = vpop.f32.mrf.mxu2 }
 0x15e   : > { %v766_v49 = vpop.f32.mrf.mxu3 }
 0x15f   : > { %v767_v53 = vadd.f32 %v766_v49, %v743_v7 }
 0x160   : > { %v935_v61 = vpop.f32.mrf.mxu0 }
 0x165   : > { %v912_v48 = vpop.f32.mrf.mxu2 }
 0x166   : > { %v913_v54 = vadd.f32 %v912_v48, %v889_v47  ;;  %v786_v58 = vpop.f32.mrf.mxu3 }
 0x167   : > { %v810_v6 = vadd.f32 %v809_v46, %v786_v58 }
 0x168   : > { %v964_v59 = vmax.f32 %v764_v56, %v913_v54 }
 0x169   : > { %v938_v1 = vpop.f32.mrf.mxu0 }
 0x16e   : > { %v915_v52 = vpop.f32.mrf.mxu2  ;;  %v789_v0 = vpop.f32.mrf.mxu3 }
 0x16f   : > { %v916_v55 = vadd.f32 %v915_v52, %v892_v51  ;;  %v813_v3 = vadd.f32 %v812_v50, %v789_v0 }
 0x171   : > { %v966_v57 = vmax.f32 %v767_v53, %v916_v55 }
 0x173   : > { %1403 = vmatpush.msk.msrb.mxu3 %vm977_vm1, %v966_v57 }
 0x175   : > { %999 = vmatpush.msrb.mxu3 %v964_v59 }
 0x176   : > { %v958_v62 = vpop.f32.mrf.mxu2  ;;  %1404 = vmatmul.msk.f32.vlgmr.msrb.gmra.mxu3 %vm970_vm2, %v968_v60 }
 0x177   : > { %1411 = vmatpush.msk.msra.mxu3 %vm977_vm1, %v966_v57  ;;  %v959_v4 = vadd.f32 %v958_v62, %v935_v61 }
 0x179   : > { %1054 = vmatpush.msra.mxu3 %v964_v59  ;;  %v965_v9 = vmax.f32 %v810_v6, %v959_v4 }
 0x17e   : > { %v961_v2 = vpop.f32.mrf.mxu2  ;;  %1405 = vmatmul.msk.f32.gmra.mxu3 %vm970_vm2, %v969_v63 }
 0x17f   : > { %v962_v5 = vadd.f32 %v961_v2, %v938_v1 }
 0x181   : > { %v967_v8 = vmax.f32 %v813_v3, %v962_v5 }
 0x183   : > { %1406 = vmatpush.msk.msrb.mxu1 %vm977_vm1, %v967_v8  ;;  %1469 = vmatpush.msk.msra.mxu2 %vm977_vm1, %v967_v8 }
 0x185   : > { %1022 = vmatpush.msrb.mxu1 %v965_v9  ;;  %1470 = vmatpush.msra.mxu2 %v965_v9 }
 0x186   : > { %1407 = vmatmul.msk.f32.vlgmr.msrb.gmra.mxu1 %vm970_vm2, %v968_v60  ;;  %1412 = vmatmul.msk.f32.vlgmr.msra.gmra.mxu3 %vm970_vm2, %v1409_v10 }
 0x187   : > { %1414 = vmatpush.msk.msra.mxu1 %vm977_vm1, %v967_v8  ;;  %1408 = vmatmul.msk.f32.vlgmr.msra.gmra.mxu2 %vm970_vm2, %v969_v63 }
 0x189   : > { %1077 = vmatpush.msra.mxu1 %v965_v9 }
 0x18e   : > { %1413 = vmatmul.msk.f32.gmra.mxu3 %vm970_vm2, %v1410_v11  ;;  %1415 = vmatmul.msk.f32.vlgmr.msra.gmra.mxu1 %vm970_vm2, %v1409_v10 }
 0x196   : > { %1416 = vmatmul.msk.f32.gmra.mxu1 %vm970_vm2, %v1410_v11 }
 0x1f9   : > { %v1001_v12 = vpop.f32.mrf.mxu3 }
 0x201   : > { %v1004_v13 = vpop.f32.mrf.mxu3 }
 0x203   : > { %v1024_v14 = vpop.f32.mrf.mxu1 }
 0x209   : > { %v1056_v15 = vpop.f32.mrf.mxu3 }
 0x20a   : > { %v1085_v17 = vmax.f32 %v1001_v12, %v1056_v15  ;;  %v1027_v21 = vpop.f32.mrf.mxu2 }
 0x20b   : > { %v1079_v16 = vpop.f32.mrf.mxu1 }
 0x20c   : > { %v1086_v18 = vmax.f32 %v1024_v14, %v1079_v16 }
 0x20e   : > { %v1089_v19 = vpack.c.bf16 %v1086_v18, %v1085_v17 }
 0x210   : > { %1091 = vst [vmem:[%s241_s30] sm:$0xff] %v1089_v19 }
 0x211   : > { %v1059_v20 = vpop.f32.mrf.mxu3 }
 0x212   : > { %v1087_v23 = vmax.f32 %v1004_v13, %v1059_v20 }
 0x213   : > { %v1082_v22 = vpop.f32.mrf.mxu1 }
 0x214   : > { %v1088_v24 = vmax.f32 %v1027_v21, %v1082_v22 }
 0x216   : > { %v1090_v25 = vpack.c.bf16 %v1088_v24, %v1087_v23 }
 0x218   : > { %1092 = vst [vmem:[%s241_s30 + $0x8] sm:$0xff] %v1090_v25 }
 0x219 PF: > { %s16_s18 = sadd.s32 1, %s1540_s18  }
 0x21a   : > { %p13_p7 = scmp.ge.s32.totalorder %s16_s18, 4  }
 0x21c   :  { %15 = sbr.rel (!%p13_p7) target bundleno = 1 (0x1), region = 79 }
 0x221   :  { %1114 = vsyncpa [#allocation3], 1 }
 0x222   :  { %1116 = vsyncpa [#allocation3 + $0x1], 1 }

// kernel: model_reducing_params_forward.11
= control target key start
LH: loop header
LB: loop body
LE: loop exit
PB: predicated region body
PF: predicated region fallthrough
CT: control target
= control target key end

     0   :  { %s1023_s18 = smov 0   ;;  %s1228_s0 = inlined_call_operand.vmem [shape: bf16[2,9,144], index: 0, kind: input, shape index: {}]   ;;  %s1229_s1 = inlined_call_operand.vmem [shape: bf16[3,144,112], index: 1, kind: input, shape index: {}]   ;;  %s1230_s2 = inlined_call_operand.vmem [shape: f32[1,112], index: 2, kind: input, shape index: {}]   ;;  %s1231_s3 = inlined_call_operand.vmem [shape: f32[2,112,112], index: 3, kind: input, shape index: {}]   ;;  %s1232_s4 = inlined_call_operand.vmem [shape: f32[2,7,7], index: 4, kind: input, shape index: {}]   ;;  %s1233_s5 = inlined_call_operand.vmem [shape: bf16[2,7,112], index: 5, kind: output, shape index: {}]  }
   0x1 LB: > { %s760_s19 = sadd.s32 4294967295, %s991_s18   ;;  %p764_p0 = scmp.ge.s32.totalorder %s991_s18, 1  ;;  %s991_s18 = sphi %s1023_s18, %s15_s18  }
   0x2   : > { %p187_p1 = scmp.lt.s32.totalorder %s991_s18, 3 }
   0x4   : > { %p188_p2 = pnand %p764_p0, %p187_p1 }
   0x5   : > { %p214_p3 = scmp.lt.s32.totalorder (!%p188_p2), %s760_s19, 1 }
   0x6   : > { %191 = sbr.rel (%p188_p2) target bundleno = 459 (0x1cb), region = 40 }
   0xb   : > { %v963_v0 = vld [vmem:[%s1229_s1 + $0x80] sm:$0xff]  ;;  %v964_v1 = vld [vmem:[%s1229_s1 + $0x88] sm:$0xff]  ;;  %v954_v2 = vld [vmem:[%s1229_s1 + $0x38] sm:$0xff]  ;;  %s1235_s19 = smov (!%p214_p3, %s760_s19), 1  ;;  %vm336_vm0 = vcmask 130048   ;;  %vm585_vm1 = vcmask 916480  }
   0xc   : > { %v974_v3 = vld [vmem:[%s1229_s1 + $0xc8] sm:$0xff]  ;;  %340 = vmatpush.bf16.msra.mxu0 %v963_v0  ;;  %360 = vmatpush.bf16.msra.mxu1 %v964_v1  ;;  %v962_v4 = vld [vmem:[%s1229_s1 + $0x78] sm:$0xff]  ;;  %v955_v5 = vld [vmem:[%s1229_s1 + $0x40] sm:$0xff]  ;;  %s946_s11 = sshll.u32 %s1235_s19, 4  ;;  %vm650_vm2 = vcmask 1046528   ;;  %vm646_vm3 = vcmask 56320  }
   0xd   : > { %423 = vmatpush.bf16.msra.mxu2 %v954_v2  ;;  %v953_v6 = vld [vmem:[%s1229_s1 + $0x30] sm:$0xff]  ;;  %v973_v7 = vld [vmem:[%s1229_s1 + $0xc0] sm:$0xff]  ;;  %443 = vmatpush.bf16.msra.mxu3 %v955_v5  ;;  %s1061_s14 = scalar_lea.vmem %s1228_s0, %s946_s11  ;;  %v952_v10 = vld [vmem:[%s1229_s1 + $0x28] sm:$0xff]  ;;  %s767_s26 = sshll.u32 %s1235_s19, 2  ;;  %vm701_vm4 = vcmask 912384  }
   0xe   : > { %v961_v8 = vld [vmem:[%s1229_s1 + $0x70] sm:$0xff]  ;;  %v224_v9 = vld [vmem:[%s1061_s14] sm:$0xff]  ;;  %v972_v13 = vld [vmem:[%s1229_s1 + $0xb8] sm:$0xff]  ;;  %s222_s29 = scalar_lea.vmem %s1233_s5, %s767_s26  ;;  %vm702_vm5 = vsmask.f32 3328 }
   0xf   : > { %v264_v11 = vunpack.c.h.b16 %v224_v9  ;;  %v975_v12 = vld [vmem:[%s1229_s1 + $0xd0] sm:$0xff]  ;;  %v960_v15 = vld [vmem:[%s1229_s1 + $0x68] sm:$0xff]  ;;  %v951_v16 = vld [vmem:[%s1229_s1 + $0x20] sm:$0xff]  ;;  %v263_v20 = vunpack.c.l.b16 %v224_v9 }
  0x10   : > { %538 = vmatpush.bf16.msrb.mxu1 %v974_v3  ;;  %341 = vmatpush.bf16.msra.mxu0 %v962_v4  ;;  %v971_v19 = vld [vmem:[%s1229_s1 + $0xb0] sm:$0xff]  ;;  %v959_v22 = vld [vmem:[%s1229_s1 + $0x60] sm:$0xff]  ;;  %v950_v24 = vld [vmem:[%s1229_s1 + $0x18] sm:$0xff] }
  0x11   : > { %424 = vmatpush.bf16.msra.mxu2 %v953_v6  ;;  %v266_v14 = vpack.c.b16 %v264_v11, %v264_v11  ;;  %558 = vmatpush.bf16.msrb.mxu3 %v975_v12  ;;  %v970_v25 = vld [vmem:[%s1229_s1 + $0xa8] sm:$0xff]  ;;  %v965_v26 = vld [vmem:[%s1061_s14 + $0x4] sm:$0xe]  ;;  %v265_v28 = vpack.c.b16 %v263_v20, %v263_v20  ;;  %v958_v29 = vld [vmem:[%s1229_s1 + $0x58] sm:$0xff] }
  0x12   : > { %v882_v27 = vld [vmem:[%s1061_s14 + $0x8] sm:$0x10]  ;;  %v949_v30 = vld [vmem:[%s1229_s1 + $0x10] sm:$0xff]  ;;  %v969_v32 = vld [vmem:[%s1229_s1 + $0xa0] sm:$0xff] }
  0x13   : > { %859 = vmatmul.msk.bf16.vlgmr.msra.gmra.mxu3 %vm336_vm0, %v266_v14  ;;  %v275_v17 = vshrl.u32 %v266_v14, 16  ;;  %v277_v18 = vshll.u32 %v266_v14, 16  ;;  %v885_v31 = vor.u32 %v965_v26, %v882_v27  ;;  %v270_v33 = vshll.u32 %v265_v28, 16  ;;  %v957_v34 = vld [vmem:[%s1229_s1 + $0x50] sm:$0xff]  ;;  %v948_v35 = vld [vmem:[%s1229_s1 + $0x8] sm:$0xff]  ;;  %v968_v37 = vld [vmem:[%s1229_s1 + $0x98] sm:$0xff] }
  0x14   : > { %539 = vmatpush.bf16.msrb.mxu1 %v973_v7  ;;  %342 = vmatpush.bf16.msra.mxu0 %v961_v8  ;;  %v880_v38 = vld [vmem:[%s1061_s14] sm:$0xe]  ;;  %v966_v39 = vld [vmem:[%s1061_s14 + $0x4] sm:$0x10]  ;;  %v268_v40 = vshrl.u32 %v265_v28, 16  ;;  %v967_v45 = vld [vmem:[%s1229_s1 + $0x90] sm:$0xff] }
  0x15   : > { %425 = vmatpush.bf16.msra.mxu2 %v952_v10  ;;  %v279_v21 = vrot.slane %v277_v18, 1  ;;  %v479_v36 = vrot.slane %v885_v31, 1  ;;  %v272_v41 = vrot.slane %v270_v33, 1  ;;  %v956_v42 = vld [vmem:[%s1229_s1 + $0x48] sm:$0xff]  ;;  %v947_v43 = vld [vmem:[%s1229_s1] sm:$0xff]  ;;  %v881_v44 = vor.u32 %v966_v39, %v880_v38  ;;  %v937_v49 = vld [vmem:[%s1231_s3 + $0xd8] sm:$0xff] }
  0x16   : > { %v584_v48 = vld [vmem:[%s1231_s3 + $0x68] sm:$0xff]  ;;  %v583_v50 = vld [vmem:[%s1231_s3 + $0x60] sm:$0xff]  ;;  %v936_v51 = vld [vmem:[%s1231_s3 + $0xd0] sm:$0xff] }
  0x17   : > { %v280_v23 = vor.u32 %v279_v21, %v275_v17  ;;  %v273_v46 = vor.u32 %v272_v41, %v268_v40  ;;  %v478_v47 = vrot.slane %v881_v44, 1  ;;  %591 = vmatpush.msra.mxu3 %v584_v48  ;;  %v582_v52 = vld [vmem:[%s1231_s3 + $0x58] sm:$0xff]  ;;  %v935_v53 = vld [vmem:[%s1231_s3 + $0xc8] sm:$0xff]  ;;  %v581_v54 = vld [vmem:[%s1231_s3 + $0x50] sm:$0xff] }
  0x18   : > { %540 = vmatpush.bf16.msrb.mxu1 %v972_v13  ;;  %343 = vmatpush.bf16.msra.mxu0 %v960_v15  ;;  %v934_v55 = vld [vmem:[%s1231_s3 + $0xc0] sm:$0xff]  ;;  %v580_v56 = vld [vmem:[%s1231_s3 + $0x48] sm:$0xff]  ;;  %v933_v57 = vld [vmem:[%s1231_s3 + $0xb8] sm:$0xff] }
  0x19   : > { %426 = vmatpush.bf16.msra.mxu2 %v951_v16  ;;  %822 = vmatmul.msk.bf16.vlgmr.msra.gmra.mxu1 %vm336_vm0, %v280_v23  ;;  %v579_v58 = vld [vmem:[%s1231_s3 + $0x40] sm:$0xff]  ;;  %v932_v59 = vld [vmem:[%s1231_s3 + $0xb0] sm:$0xff]  ;;  %v578_v60 = vld [vmem:[%s1231_s3 + $0x38] sm:$0xff] }
  0x1a   : > { %592 = vmatpush.msra.mxu3 %v583_v50  ;;  %v931_v61 = vld [vmem:[%s1231_s3 + $0xa8] sm:$0xff]  ;;  %v577_v62 = vld [vmem:[%s1231_s3 + $0x30] sm:$0xff]  ;;  %v930_v63 = vld [vmem:[%s1231_s3 + $0xa0] sm:$0xff] }
  0x1b   : > { %v576_v0 = vld [vmem:[%s1231_s3 + $0x28] sm:$0xff]  ;;  %v929_v1 = vld [vmem:[%s1231_s3 + $0x98] sm:$0xff]  ;;  %v575_v2 = vld [vmem:[%s1231_s3 + $0x20] sm:$0xff] }
  0x1c   : > { %541 = vmatpush.bf16.msrb.mxu1 %v971_v19  ;;  %344 = vmatpush.bf16.msra.mxu0 %v959_v22  ;;  %v928_v3 = vld [vmem:[%s1231_s3 + $0x90] sm:$0xff]  ;;  %v574_v4 = vld [vmem:[%s1231_s3 + $0x18] sm:$0xff]  ;;  %v927_v5 = vld [vmem:[%s1231_s3 + $0x88] sm:$0xff] }
  0x1d   : > { %427 = vmatpush.bf16.msra.mxu2 %v950_v24  ;;  %593 = vmatpush.msra.mxu3 %v582_v52  ;;  %v573_v6 = vld [vmem:[%s1231_s3 + $0x10] sm:$0xff]  ;;  %v926_v7 = vld [vmem:[%s1231_s3 + $0x80] sm:$0xff]  ;;  %v572_v8 = vld [vmem:[%s1231_s3 + $0x8] sm:$0xff] }
  0x1e   : > { %v925_v9 = vld [vmem:[%s1231_s3 + $0x78] sm:$0xff]  ;;  %v571_v12 = vld [vmem:[%s1231_s3] sm:$0xff]  ;;  %v924_v13 = vld [vmem:[%s1231_s3 + $0x70] sm:$0xff] }
  0x1f   : > { %594 = vmatpush.msra.mxu3 %v581_v54  ;;  %v984_v26 = vld [vmem:[%s1230_s2] ss:$0 sm:$0xff]  ;;  %vm703_vm6 = vmand %vm701_vm4, %vm702_vm5 }
  0x20   : > { %542 = vmatpush.bf16.msrb.mxu1 %v970_v25  ;;  %345 = vmatpush.bf16.msra.mxu0 %v958_v29  ;;  %v704_v40 = vld [vmem:[%s222_s29] sm:$0xf] }
  0x21   : > { %428 = vmatpush.bf16.msra.mxu2 %v949_v30  ;;  %595 = vmatpush.msra.mxu3 %v580_v56 }
  0x23   : > { %922 = vmatmul.msk.bf16.vlgmr.msrb.gmra.mxu3 %vm336_vm0, %v479_v36  ;;  %v941_v36 = vld [vmem:[%s1232_s4 + $0x8] sm:$0x7f] }
  0x24   : > { %543 = vmatpush.bf16.msrb.mxu1 %v969_v32  ;;  %346 = vmatpush.bf16.msra.mxu0 %v957_v34 }
  0x25   : > { %429 = vmatpush.bf16.msra.mxu2 %v948_v35  ;;  %596 = vmatpush.msra.mxu3 %v579_v58  ;;  %v645_v35 = vld [vmem:[%s1232_s4] sm:$0x7f] }
  0x27   : > { %597 = vmatpush.msra.mxu3 %v578_v60 }
  0x28   : > { %544 = vmatpush.bf16.msrb.mxu1 %v968_v37  ;;  %347 = vmatpush.bf16.msra.mxu0 %v956_v42 }
  0x29   : > { %430 = vmatpush.bf16.msra.mxu2 %v947_v43  ;;  %598 = vmatpush.msra.mxu3 %v577_v62 }
  0x2b   : > { %348 = vmatmul.bf16.vlgmr.msra.gmra.mxu0 %v273_v46  ;;  %599 = vmatpush.msra.mxu3 %v576_v0 }
  0x2c   : > { %545 = vmatpush.bf16.msrb.mxu1 %v967_v45  ;;  %431 = vmatmul.bf16.vlgmr.msra.gmra.mxu2 %v265_v28 }
  0x2d   : > { %626 = vmatpush.msrb.mxu0 %v937_v49  ;;  %600 = vmatpush.msra.mxu3 %v575_v2 }
  0x2f   : > { %546 = vmatmul.bf16.vlgmr.msrb.gmra.mxu1 %v478_v47  ;;  %627 = vmatpush.msrb.mxu0 %v936_v51 }
  0x30   : > { %601 = vmatpush.msra.mxu3 %v574_v4 }
  0x31   : > { %628 = vmatpush.msrb.mxu0 %v935_v53 }
  0x32   : > { %602 = vmatpush.msra.mxu3 %v573_v6 }
  0x33   : > { %629 = vmatpush.msrb.mxu0 %v934_v55 }
  0x34   : > { %603 = vmatpush.msra.mxu3 %v572_v8 }
  0x35   : > { %630 = vmatpush.msrb.mxu0 %v933_v57 }
  0x36   : > { %604 = vmatpush.msra.mxu3 %v571_v12 }
  0x37   : > { %631 = vmatpush.msrb.mxu0 %v932_v59 }
  0x39   : > { %632 = vmatpush.msrb.mxu0 %v931_v61 }
  0x3b   : > { %633 = vmatpush.msrb.mxu0 %v930_v63 }
  0x3d   : > { %634 = vmatpush.msrb.mxu0 %v929_v1 }
  0x3f   : > { %635 = vmatpush.msrb.mxu0 %v928_v3 }
  0x41   : > { %636 = vmatpush.msrb.mxu0 %v927_v5 }
  0x43   : > { %637 = vmatpush.msrb.mxu0 %v926_v7 }
  0x45   : > { %638 = vmatpush.msrb.mxu0 %v925_v9 }
  0x47   : > { %639 = vmatpush.msrb.mxu0 %v924_v13 }
  0x96   : > { %v362_v10 = vpop.f32.mrf.mxu1  ;;  %v445_v11 = vpop.f32.mrf.mxu3 }
  0x9e   : > { %v364_v14 = vpop.f32.mrf.mxu1  ;;  %v447_v15 = vpop.f32.mrf.mxu3 }
  0xa6   : > { %v560_v17 = vpop.f32.mrf.mxu3 }
  0xa8   : > { %v349_v16 = vpop.f32.mrf.mxu0 }
  0xa9   : > { %v363_v19 = vadd.f32 %v362_v10, %v349_v16 }
  0xac   : > { %v547_v18 = vpop.f32.mrf.mxu1 }
  0xad   : > { %v561_v21 = vadd.f32 %v560_v17, %v547_v18 }
  0xae   : > { %v562_v24 = vpop.f32.mrf.mxu3 }
  0xaf   : > { %v432_v20 = vpop.f32.mrf.mxu2 }
  0xb0   : > { %v433_v22 = vadd.f32 %v432_v20, %v363_v19  ;;  %v351_v23 = vpop.f32.mrf.mxu0 }
  0xb2   : > { %v446_v25 = vadd.f32 %v445_v11, %v433_v22 }
  0xb4   : > { %v549_v27 = vpop.f32.mrf.mxu1  ;;  %v564_v28 = vadd.f32 %v561_v21, %v446_v25 }
  0xb6   : > { %v569_v29 = vadd.f32 %v984_v26, %v564_v28 }
  0xb7   : > { %v434_v30 = vpop.f32.mrf.mxu2 }
  0xb8   : > { %v570_v31 = vmax.f32 %v569_v29, 0.0 }
  0xba   : > { %923 = vmatmul.msk.f32.vlgmr.msra.gmra.mxu3 %vm585_vm1, %v570_v31  ;;  %938 = vmatmul.msk.f32.vlgmr.msrb.gmra.mxu0 %vm585_vm1, %v570_v31 }
 0x137   : > { %v641_v32 = vpop.f32.mrf.mxu0 }
 0x13d   : > { %v606_v33 = vpop.f32.mrf.mxu3 }
 0x13e   : > { %v644_v34 = vmax.f32 %v606_v33, %v641_v32 }
 0x140   : > { %939 = vmatpush.msk.msrb.mxu2 %vm650_vm2, %v644_v34  ;;  %942 = vmatpush.msk.msra.mxu1 %vm650_vm2, %v644_v34 }
 0x141   : > { %940 = vmatmul.msk.f32.vlgmr.msrb.gmra.mxu2 %vm646_vm3, %v645_v35  ;;  %943 = vmatmul.msk.f32.vlgmr.msra.gmra.mxu1 %vm646_vm3, %v941_v36 }
 0x1be   : > { %v696_v37 = vpop.f32.mrf.mxu1 }
 0x1c4   : > { %v671_v38 = vpop.f32.mrf.mxu2 }
 0x1c5   : > { %v699_v39 = vmax.f32 %v671_v38, %v696_v37 }
 0x1c7   : > { %v700_v41 = vpack.c.bf16 %v699_v39, %v699_v39 }
 0x1c9   : > { %v705_v42 = vsel %vm703_vm6, %v700_v41, %v704_v40 }
 0x1ca   : > { %706 = vst [vmem:[%s222_s29] sm:$0xf] %v705_v42 }
 0x1cb PF: > { %s15_s18 = sadd.s32 1, %s991_s18  }
 0x1cc   : > { %p12_p4 = scmp.ge.s32.totalorder %s15_s18, 4  }
 0x1ce   :  { %14 = sbr.rel (!%p12_p4) target bundleno = 1 (0x1), region = 74 }

// kernel: model_reducing_params_forward.12
= control target key start
LH: loop header
LB: loop body
LE: loop exit
PB: predicated region body
PF: predicated region fallthrough
CT: control target
= control target key end

     0   :  { %s601_s18 = smov 0   ;;  %s743_s0 = inlined_call_operand.vmem [shape: bf16[2,7,112], index: 0, kind: input, shape index: {}]   ;;  %s744_s1 = inlined_call_operand.vmem [shape: bf16[1,112,112], index: 1, kind: input, shape index: {}]   ;;  %s745_s2 = inlined_call_operand.vmem [shape: f32[1,112], index: 2, kind: input, shape index: {}]   ;;  %s746_s3 = inlined_call_operand.vmem [shape: f32[2,112,48], index: 3, kind: input, shape index: {}]   ;;  %s747_s4 = inlined_call_operand.vmem [shape: f32[2,3,7], index: 4, kind: input, shape index: {}]   ;;  %s748_s5 = inlined_call_operand.vmem [shape: bf16[2,3,48], index: 5, kind: output, shape index: {}]  }
   0x1 LB: > { %s488_s19 = sadd.s32 4294967295, %s569_s18   ;;  %p492_p0 = scmp.ge.s32.totalorder %s569_s18, 1  ;;  %s569_s18 = sphi %s601_s18, %s15_s18  }
   0x2   : > { %p186_p1 = scmp.lt.s32.totalorder %s569_s18, 3 }
   0x4   : > { %p187_p2 = pnand %p492_p0, %p186_p1 }
   0x5   : > { %p212_p3 = scmp.lt.s32.totalorder (!%p187_p2), %s488_s19, 1 }
   0x6   : > { %190 = sbr.rel (%p187_p2) target bundleno = 450 (0x1c2), region = 40 }
   0xb   : > { %v553_v0 = vld [vmem:[%s744_s1 + $0x30] sm:$0xff]  ;;  %v552_v1 = vld [vmem:[%s744_s1 + $0x28] sm:$0xff]  ;;  %v538_v3 = vld [vmem:[%s746_s3 + $0xd8] sm:$0xff]  ;;  %s750_s19 = smov (!%p212_p3, %s488_s19), 1  ;;  %vm282_vm0 = vcmask 916480   ;;  %vm378_vm1 = vcmask 1046528  }
   0xc   : > { %287 = vmatpush.bf16.msra.mxu0 %v553_v0  ;;  %v313_v2 = vld [vmem:[%s746_s3 + $0x68] sm:$0xff]  ;;  %354 = vmatpush.msra.mxu2 %v538_v3  ;;  %v312_v4 = vld [vmem:[%s746_s3 + $0x60] sm:$0xff]  ;;  %v537_v5 = vld [vmem:[%s746_s3 + $0xd0] sm:$0xff]  ;;  %s493_s26 = sshll.u32 %s750_s19, 2  ;;  %vm374_vm2 = vcmask 56320   ;;  %s494_s6 = sshll.u32 %s750_s19, 1 }
   0xd   : > { %319 = vmatpush.msra.mxu1 %v313_v2  ;;  %v311_v6 = vld [vmem:[%s746_s3 + $0x58] sm:$0xff]  ;;  %v536_v7 = vld [vmem:[%s746_s3 + $0xc8] sm:$0xff]  ;;  %v551_v8 = vld [vmem:[%s744_s1 + $0x20] sm:$0xff]  ;;  %s215_s10 = scalar_lea.vmem %s743_s0, %s493_s26  ;;  %s219_s9 = scalar_lea.vmem %s748_s5, %s494_s6  ;;  %vm429_vm3 = vcmask 386048   ;;  %vm430_vm4 = vsmask.f32 1280 }
   0xe   : > { %355 = vmatpush.msra.mxu2 %v537_v5  ;;  %v310_v9 = vld [vmem:[%s746_s3 + $0x50] sm:$0xff]  ;;  %v535_v10 = vld [vmem:[%s746_s3 + $0xc0] sm:$0xff]  ;;  %v309_v11 = vld [vmem:[%s746_s3 + $0x48] sm:$0xff] }
   0xf   : > { %320 = vmatpush.msra.mxu1 %v312_v4  ;;  %v534_v12 = vld [vmem:[%s746_s3 + $0xb8] sm:$0xff]  ;;  %v308_v14 = vld [vmem:[%s746_s3 + $0x40] sm:$0xff]  ;;  %v533_v15 = vld [vmem:[%s746_s3 + $0xb0] sm:$0xff] }
  0x10   : > { %288 = vmatpush.bf16.msra.mxu0 %v552_v1  ;;  %356 = vmatpush.msra.mxu2 %v536_v7  ;;  %v550_v13 = vld [vmem:[%s744_s1 + $0x18] sm:$0xff]  ;;  %v532_v17 = vld [vmem:[%s746_s3 + $0xa8] sm:$0xff]  ;;  %v549_v18 = vld [vmem:[%s744_s1 + $0x10] sm:$0xff] }
  0x11   : > { %321 = vmatpush.msra.mxu1 %v311_v6  ;;  %v307_v16 = vld [vmem:[%s746_s3 + $0x38] sm:$0xff]  ;;  %v306_v19 = vld [vmem:[%s746_s3 + $0x30] sm:$0xff]  ;;  %v531_v20 = vld [vmem:[%s746_s3 + $0xa0] sm:$0xff] }
  0x12   : > { %357 = vmatpush.msra.mxu2 %v535_v10  ;;  %v305_v21 = vld [vmem:[%s746_s3 + $0x28] sm:$0xff]  ;;  %v530_v22 = vld [vmem:[%s746_s3 + $0x98] sm:$0xff]  ;;  %v304_v24 = vld [vmem:[%s746_s3 + $0x20] sm:$0xff] }
  0x13   : > { %322 = vmatpush.msra.mxu1 %v310_v9  ;;  %v548_v23 = vld [vmem:[%s744_s1 + $0x8] sm:$0xff]  ;;  %v529_v25 = vld [vmem:[%s746_s3 + $0x90] sm:$0xff]  ;;  %v303_v26 = vld [vmem:[%s746_s3 + $0x18] sm:$0xff] }
  0x14   : > { %289 = vmatpush.bf16.msra.mxu0 %v551_v8  ;;  %358 = vmatpush.msra.mxu2 %v534_v12  ;;  %v528_v27 = vld [vmem:[%s746_s3 + $0x88] sm:$0xff]  ;;  %v547_v28 = vld [vmem:[%s744_s1] sm:$0xff]  ;;  %v302_v30 = vld [vmem:[%s746_s3 + $0x10] sm:$0xff] }
  0x15   : > { %323 = vmatpush.msra.mxu1 %v309_v11  ;;  %v221_v29 = vld [vmem:[%s215_s10] sm:$0xf]  ;;  %v301_v32 = vld [vmem:[%s746_s3 + $0x8] sm:$0xff]  ;;  %v526_v33 = vld [vmem:[%s746_s3 + $0x78] sm:$0xff] }
  0x16   : > { %359 = vmatpush.msra.mxu2 %v533_v15  ;;  %v527_v31 = vld [vmem:[%s746_s3 + $0x80] sm:$0xff]  ;;  %v525_v35 = vld [vmem:[%s746_s3 + $0x70] sm:$0xff]  ;;  %vm431_vm5 = vmand %vm429_vm3, %vm430_vm4 }
  0x17   : > { %324 = vmatpush.msra.mxu1 %v308_v14  ;;  %v300_v34 = vld [vmem:[%s746_s3] sm:$0xff] }
  0x18   : > { %290 = vmatpush.bf16.msra.mxu0 %v550_v13  ;;  %360 = vmatpush.msra.mxu2 %v532_v17  ;;  %v562_v36 = vld [vmem:[%s745_s2] ss:$0 sm:$0xff]  ;;  %v542_v45 = vld [vmem:[%s747_s4 + $0x4] sm:$0x7] }
  0x19   : > { %325 = vmatpush.msra.mxu1 %v307_v16  ;;  %v373_v44 = vld [vmem:[%s747_s4] sm:$0x7] }
  0x1a   : > { %361 = vmatpush.msra.mxu2 %v531_v20  ;;  %v432_v49 = vld [vmem:[%s219_s9] sm:$0x3] }
  0x1b   : > { %326 = vmatpush.msra.mxu1 %v306_v19 }
  0x1c   : > { %291 = vmatpush.bf16.msra.mxu0 %v549_v18  ;;  %362 = vmatpush.msra.mxu2 %v530_v22 }
  0x1d   : > { %327 = vmatpush.msra.mxu1 %v305_v21 }
  0x1e   : > { %363 = vmatpush.msra.mxu2 %v529_v25 }
  0x1f   : > { %328 = vmatpush.msra.mxu1 %v304_v24 }
  0x20   : > { %292 = vmatpush.bf16.msra.mxu0 %v548_v23  ;;  %364 = vmatpush.msra.mxu2 %v528_v27 }
  0x21   : > { %329 = vmatpush.msra.mxu1 %v303_v26 }
  0x22   : > { %365 = vmatpush.msra.mxu2 %v527_v31 }
  0x23   : > { %330 = vmatpush.msra.mxu1 %v302_v30 }
  0x24   : > { %293 = vmatpush.bf16.msra.mxu0 %v547_v28  ;;  %366 = vmatpush.msra.mxu2 %v526_v33 }
  0x25   : > { %331 = vmatpush.msra.mxu1 %v301_v32 }
  0x26   : > { %367 = vmatpush.msra.mxu2 %v525_v35 }
  0x27   : > { %523 = vmatmul.msk.bf16.vlgmr.msra.gmra.mxu0 %vm282_vm0, %v221_v29  ;;  %332 = vmatpush.msra.mxu1 %v300_v34 }
  0xa4   : > { %v295_v37 = vpop.f32.mrf.mxu0 }
  0xa5   : > { %v296_v38 = vadd.f32 %v562_v36, %v295_v37 }
  0xa7   : > { %v299_v39 = vmax.f32 %v296_v38, 0.0 }
  0xa9   : > { %524 = vmatmul.msk.f32.vlgmr.msra.gmra.mxu1 %vm282_vm0, %v299_v39  ;;  %539 = vmatmul.msk.f32.vlgmr.msra.gmra.mxu2 %vm282_vm0, %v299_v39 }
  0xac   : > { %v297_v40 = vpop.f32.mrf.mxu0 }
 0x126   : > { %v334_v41 = vpop.f32.mrf.mxu1 }
 0x12c   : > { %v369_v42 = vpop.f32.mrf.mxu2 }
 0x12d   : > { %v372_v43 = vmax.f32 %v334_v41, %v369_v42 }
 0x12f   : > { %540 = vmatpush.msk.msra.mxu3 %vm378_vm1, %v372_v43 }
 0x130   : > { %541 = vmatmul.msk.f32.vlgmr.msra.gmra.mxu3 %vm374_vm2, %v373_v44 }
 0x131   : > { %543 = vmatpush.msk.msrb.mxu3 %vm378_vm1, %v372_v43 }
 0x138   : > { %544 = vmatmul.msk.f32.vlgmr.msrb.gmra.mxu3 %vm374_vm2, %v542_v45 }
 0x1b3   : > { %v399_v46 = vpop.f32.mrf.mxu3 }
 0x1bb   : > { %v424_v47 = vpop.f32.mrf.mxu3 }
 0x1bc   : > { %v427_v48 = vmax.f32 %v399_v46, %v424_v47 }
 0x1be   : > { %v428_v50 = vpack.c.bf16 %v427_v48, %v427_v48 }
 0x1c0   : > { %v433_v51 = vsel %vm431_vm5, %v428_v50, %v432_v49 }
 0x1c1   : > { %434 = vst [vmem:[%s219_s9] sm:$0x3] %v433_v51 }
 0x1c2 PF: > { %s15_s18 = sadd.s32 1, %s569_s18  }
 0x1c3   : > { %p12_p4 = scmp.ge.s32.totalorder %s15_s18, 4  }
 0x1c5   :  { %14 = sbr.rel (!%p12_p4) target bundleno = 1 (0x1), region = 72 }

// kernel: model_reducing_params_forward.10
= control target key start
LH: loop header
LB: loop body
LE: loop exit
PB: predicated region body
PF: predicated region fallthrough
CT: control target
= control target key end

     0   :  { %s2216_s18 = smov 0   ;;  %s3252_s0 = inlined_call_operand.vmem [shape: bf16[2,16,256], index: 0, kind: input, shape index: {}]   ;;  %s3253_s1 = inlined_call_operand.vmem [shape: bf16[3,256,224], index: 1, kind: input, shape index: {}]   ;;  %s3254_s2 = inlined_call_operand.vmem [shape: f32[1,224], index: 2, kind: input, shape index: {}]   ;;  %s3255_s3 = inlined_call_operand.vmem [shape: f32[2,224,144], index: 3, kind: input, shape index: {}]   ;;  %s3256_s4 = inlined_call_operand.vmem [shape: f32[2,9,14], index: 4, kind: input, shape index: {}]   ;;  %s3257_s5 = inlined_call_operand.vmem [shape: bf16[2,9,144], index: 5, kind: output, shape index: {}]  }
   0x1 LB: > { %s1533_s19 = sadd.s32 4294967295, %s2184_s18   ;;  %p1537_p0 = scmp.ge.s32.totalorder %s2184_s18, 1  ;;  %s2184_s18 = sphi %s2216_s18, %s15_s18  }
   0x2   : > { %p187_p1 = scmp.lt.s32.totalorder %s2184_s18, 3 }
   0x4   : > { %p188_p2 = pnand %p1537_p0, %p187_p1 }
   0x5   : > { %p215_p3 = scmp.lt.s32.totalorder (!%p188_p2), %s1533_s19, 1 }
   0x6   : > { %191 = sbr.rel (%p188_p2) target bundleno = 568 (0x238), region = 40 }
   0xb   : > { %v1632_v0 = vld [vmem:[%s3253_s1 + $0x170] sm:$0xf]  ;;  %v2119_v1 = vld [vmem:[%s3253_s1 + $0x174] sm:$0xf0]  ;;  %v2118_v5 = vld [vmem:[%s3253_s1 + $0x174] sm:$0xf] }
   0xc   : > { %v1696_v2 = vld [vmem:[%s3253_s1 + $0x1f0] sm:$0xf]  ;;  %v1633_v3 = vor.u32 %v2119_v1, %v1632_v0  ;;  %v2135_v4 = vld [vmem:[%s3253_s1 + $0x1f4] sm:$0xf0]  ;;  %v1634_v6 = vld [vmem:[%s3253_s1 + $0x178] sm:$0xf0] }
   0xd   : > { %v1697_v7 = vor.u32 %v2135_v4, %v1696_v2  ;;  %v1637_v8 = vor.u32 %v2118_v5, %v1634_v6  ;;  %v2134_v9 = vld [vmem:[%s3253_s1 + $0x1f4] sm:$0xf]  ;;  %v1698_v10 = vld [vmem:[%s3253_s1 + $0x1f8] sm:$0xf0]  ;;  %v1624_v11 = vld [vmem:[%s3253_s1 + $0x160] sm:$0xf] }
   0xe   : > { %477 = vmatpush.bf16.msra.mxu0 %v1633_v3  ;;  %v1701_v12 = vor.u32 %v2134_v9, %v1698_v10  ;;  %v2117_v13 = vld [vmem:[%s3253_s1 + $0x164] sm:$0xf0]  ;;  %v1688_v14 = vld [vmem:[%s3253_s1 + $0x1e0] sm:$0xf]  ;;  %v2116_v18 = vld [vmem:[%s3253_s1 + $0x164] sm:$0xf] }
   0xf   : > { %v2133_v15 = vld [vmem:[%s3253_s1 + $0x1e4] sm:$0xf0]  ;;  %491 = vmatpush.bf16.msra.mxu1 %v1697_v7  ;;  %505 = vmatpush.bf16.msra.mxu2 %v1637_v8  ;;  %v1625_v16 = vor.u32 %v2117_v13, %v1624_v11  ;;  %v1626_v19 = vld [vmem:[%s3253_s1 + $0x168] sm:$0xf0]  ;;  %v2132_v20 = vld [vmem:[%s3253_s1 + $0x1e4] sm:$0xf] }
  0x10   : > { %v1689_v17 = vor.u32 %v2133_v15, %v1688_v14  ;;  %519 = vmatpush.bf16.msra.mxu3 %v1701_v12  ;;  %v1629_v21 = vor.u32 %v2116_v18, %v1626_v19  ;;  %v1690_v22 = vld [vmem:[%s3253_s1 + $0x1e8] sm:$0xf0]  ;;  %v1616_v23 = vld [vmem:[%s3253_s1 + $0x150] sm:$0xf]  ;;  %v2115_v24 = vld [vmem:[%s3253_s1 + $0x154] sm:$0xf0] }
  0x11   : > { %v1693_v25 = vor.u32 %v2132_v20, %v1690_v22  ;;  %v1680_v26 = vld [vmem:[%s3253_s1 + $0x1d0] sm:$0xf]  ;;  %v2131_v27 = vld [vmem:[%s3253_s1 + $0x1d4] sm:$0xf0]  ;;  %v2114_v28 = vld [vmem:[%s3253_s1 + $0x154] sm:$0xf]  ;;  %v1617_v29 = vor.u32 %v2115_v24, %v1616_v23 }
  0x12   : > { %478 = vmatpush.bf16.msra.mxu0 %v1625_v16  ;;  %v1618_v30 = vld [vmem:[%s3253_s1 + $0x158] sm:$0xf0]  ;;  %v2130_v31 = vld [vmem:[%s3253_s1 + $0x1d4] sm:$0xf]  ;;  %v1681_v33 = vor.u32 %v2131_v27, %v1680_v26  ;;  %v1608_v35 = vld [vmem:[%s3253_s1 + $0x140] sm:$0xf] }
  0x13   : > { %v1682_v32 = vld [vmem:[%s3253_s1 + $0x1d8] sm:$0xf0]  ;;  %492 = vmatpush.bf16.msra.mxu1 %v1689_v17  ;;  %506 = vmatpush.bf16.msra.mxu2 %v1629_v21  ;;  %v1621_v34 = vor.u32 %v2114_v28, %v1618_v30  ;;  %v2113_v36 = vld [vmem:[%s3253_s1 + $0x144] sm:$0xf0]  ;;  %v1672_v37 = vld [vmem:[%s3253_s1 + $0x1c0] sm:$0xf] }
  0x14   : > { %520 = vmatpush.bf16.msra.mxu3 %v1693_v25  ;;  %v1685_v38 = vor.u32 %v2130_v31, %v1682_v32  ;;  %v2129_v39 = vld [vmem:[%s3253_s1 + $0x1c4] sm:$0xf0]  ;;  %v2112_v40 = vld [vmem:[%s3253_s1 + $0x144] sm:$0xf]  ;;  %v1610_v41 = vld [vmem:[%s3253_s1 + $0x148] sm:$0xf0]  ;;  %v1609_v44 = vor.u32 %v2113_v36, %v1608_v35 }
  0x15   : > { %v2128_v42 = vld [vmem:[%s3253_s1 + $0x1c4] sm:$0xf]  ;;  %v1674_v43 = vld [vmem:[%s3253_s1 + $0x1c8] sm:$0xf0]  ;;  %v1673_v45 = vor.u32 %v2129_v39, %v1672_v37  ;;  %v1613_v46 = vor.u32 %v2112_v40, %v1610_v41  ;;  %v1600_v47 = vld [vmem:[%s3253_s1 + $0x130] sm:$0xf] }
  0x16   : > { %479 = vmatpush.bf16.msra.mxu0 %v1617_v29  ;;  %v2111_v48 = vld [vmem:[%s3253_s1 + $0x134] sm:$0xf0]  ;;  %v1664_v49 = vld [vmem:[%s3253_s1 + $0x1b0] sm:$0xf]  ;;  %v1677_v50 = vor.u32 %v2128_v42, %v1674_v43  ;;  %v2110_v52 = vld [vmem:[%s3253_s1 + $0x134] sm:$0xf] }
  0x17   : > { %493 = vmatpush.bf16.msra.mxu1 %v1681_v33  ;;  %507 = vmatpush.bf16.msra.mxu2 %v1621_v34  ;;  %v2127_v51 = vld [vmem:[%s3253_s1 + $0x1b4] sm:$0xf0]  ;;  %v1602_v53 = vld [vmem:[%s3253_s1 + $0x138] sm:$0xf0]  ;;  %v2126_v54 = vld [vmem:[%s3253_s1 + $0x1b4] sm:$0xf]  ;;  %v1601_v56 = vor.u32 %v2111_v48, %v1600_v47 }
  0x18   : > { %521 = vmatpush.bf16.msra.mxu3 %v1685_v38  ;;  %v1666_v55 = vld [vmem:[%s3253_s1 + $0x1b8] sm:$0xf0]  ;;  %v1665_v57 = vor.u32 %v2127_v51, %v1664_v49  ;;  %v1605_v58 = vor.u32 %v2110_v52, %v1602_v53  ;;  %v1592_v59 = vld [vmem:[%s3253_s1 + $0x120] sm:$0xf]  ;;  %v2109_v60 = vld [vmem:[%s3253_s1 + $0x124] sm:$0xf0] }
  0x19   : > { %v1656_v61 = vld [vmem:[%s3253_s1 + $0x1a0] sm:$0xf]  ;;  %v1669_v62 = vor.u32 %v2126_v54, %v1666_v55  ;;  %v2125_v63 = vld [vmem:[%s3253_s1 + $0x1a4] sm:$0xf0]  ;;  %v2108_v0 = vld [vmem:[%s3253_s1 + $0x124] sm:$0xf]  ;;  %v1593_v4 = vor.u32 %v2109_v60, %v1592_v59 }
  0x1a   : > { %480 = vmatpush.bf16.msra.mxu0 %v1609_v44  ;;  %v1594_v1 = vld [vmem:[%s3253_s1 + $0x128] sm:$0xf0]  ;;  %v2124_v2 = vld [vmem:[%s3253_s1 + $0x1a4] sm:$0xf]  ;;  %v1657_v5 = vor.u32 %v2125_v63, %v1656_v61  ;;  %v1584_v7 = vld [vmem:[%s3253_s1 + $0x110] sm:$0xf] }
  0x1b   : > { %494 = vmatpush.bf16.msra.mxu1 %v1673_v45  ;;  %508 = vmatpush.bf16.msra.mxu2 %v1613_v46  ;;  %v1658_v3 = vld [vmem:[%s3253_s1 + $0x1a8] sm:$0xf0]  ;;  %v1597_v6 = vor.u32 %v2108_v0, %v1594_v1  ;;  %v2107_v8 = vld [vmem:[%s3253_s1 + $0x114] sm:$0xf0]  ;;  %v1648_v9 = vld [vmem:[%s3253_s1 + $0x190] sm:$0xf] }
  0x1c   : > { %522 = vmatpush.bf16.msra.mxu3 %v1677_v50  ;;  %v1661_v10 = vor.u32 %v2124_v2, %v1658_v3  ;;  %v2123_v11 = vld [vmem:[%s3253_s1 + $0x194] sm:$0xf0]  ;;  %v2106_v12 = vld [vmem:[%s3253_s1 + $0x114] sm:$0xf]  ;;  %v1586_v13 = vld [vmem:[%s3253_s1 + $0x118] sm:$0xf0]  ;;  %v1585_v16 = vor.u32 %v2107_v8, %v1584_v7 }
  0x1d   : > { %v2122_v14 = vld [vmem:[%s3253_s1 + $0x194] sm:$0xf]  ;;  %v1650_v15 = vld [vmem:[%s3253_s1 + $0x198] sm:$0xf0]  ;;  %v1576_v17 = vld [vmem:[%s3253_s1 + $0x100] sm:$0xf]  ;;  %v1649_v19 = vor.u32 %v2123_v11, %v1648_v9  ;;  %v1589_v20 = vor.u32 %v2106_v12, %v1586_v13 }
  0x1e   : > { %481 = vmatpush.bf16.msra.mxu0 %v1601_v56  ;;  %v2105_v18 = vld [vmem:[%s3253_s1 + $0x104] sm:$0xf0]  ;;  %v1640_v21 = vld [vmem:[%s3253_s1 + $0x180] sm:$0xf]  ;;  %v2104_v23 = vld [vmem:[%s3253_s1 + $0x104] sm:$0xf]  ;;  %v1653_v24 = vor.u32 %v2122_v14, %v1650_v15 }
  0x1f   : > { %495 = vmatpush.bf16.msra.mxu1 %v1665_v57  ;;  %509 = vmatpush.bf16.msra.mxu2 %v1605_v58  ;;  %v2121_v22 = vld [vmem:[%s3253_s1 + $0x184] sm:$0xf0]  ;;  %v1578_v25 = vld [vmem:[%s3253_s1 + $0x108] sm:$0xf0]  ;;  %v2120_v26 = vld [vmem:[%s3253_s1 + $0x184] sm:$0xf]  ;;  %v1577_v31 = vor.u32 %v2105_v18, %v1576_v17 }
  0x20   : > { %523 = vmatpush.bf16.msra.mxu3 %v1669_v62  ;;  %v1642_v27 = vld [vmem:[%s3253_s1 + $0x188] sm:$0xf0]  ;;  %v1760_v28 = vld [vmem:[%s3253_s1 + $0x70] sm:$0xf]  ;;  %v2087_v29 = vld [vmem:[%s3253_s1 + $0x74] sm:$0xf0]  ;;  %v1641_v35 = vor.u32 %v2121_v22, %v1640_v21  ;;  %v1581_v36 = vor.u32 %v2104_v23, %v1578_v25 }
  0x21   : > { %v1824_v30 = vld [vmem:[%s3253_s1 + $0xf0] sm:$0xf]  ;;  %v2103_v32 = vld [vmem:[%s3253_s1 + $0xf4] sm:$0xf0]  ;;  %v2086_v33 = vld [vmem:[%s3253_s1 + $0x74] sm:$0xf]  ;;  %v1645_v39 = vor.u32 %v2120_v26, %v1642_v27  ;;  %v1761_v40 = vor.u32 %v2087_v29, %v1760_v28 }
  0x22   : > { %482 = vmatpush.bf16.msra.mxu0 %v1593_v4  ;;  %v1762_v34 = vld [vmem:[%s3253_s1 + $0x78] sm:$0xf0]  ;;  %v2102_v37 = vld [vmem:[%s3253_s1 + $0xf4] sm:$0xf]  ;;  %v1825_v41 = vor.u32 %v2103_v32, %v1824_v30  ;;  %v1752_v43 = vld [vmem:[%s3253_s1 + $0x60] sm:$0xf] }
  0x23   : > { %496 = vmatpush.bf16.msra.mxu1 %v1657_v5  ;;  %510 = vmatpush.bf16.msra.mxu2 %v1597_v6  ;;  %v1826_v38 = vld [vmem:[%s3253_s1 + $0xf8] sm:$0xf0]  ;;  %v1765_v42 = vor.u32 %v2086_v33, %v1762_v34  ;;  %v2085_v44 = vld [vmem:[%s3253_s1 + $0x64] sm:$0xf0]  ;;  %v1816_v45 = vld [vmem:[%s3253_s1 + $0xe0] sm:$0xf] }
  0x24   : > { %524 = vmatpush.bf16.msra.mxu3 %v1661_v10  ;;  %v1829_v46 = vor.u32 %v2102_v37, %v1826_v38  ;;  %v2101_v47 = vld [vmem:[%s3253_s1 + $0xe4] sm:$0xf0]  ;;  %v2084_v48 = vld [vmem:[%s3253_s1 + $0x64] sm:$0xf]  ;;  %v1754_v49 = vld [vmem:[%s3253_s1 + $0x68] sm:$0xf0]  ;;  %v1753_v52 = vor.u32 %v2085_v44, %v1752_v43 }
  0x25   : > { %v2100_v50 = vld [vmem:[%s3253_s1 + $0xe4] sm:$0xf]  ;;  %v1818_v51 = vld [vmem:[%s3253_s1 + $0xe8] sm:$0xf0]  ;;  %v1744_v53 = vld [vmem:[%s3253_s1 + $0x50] sm:$0xf]  ;;  %v1817_v56 = vor.u32 %v2101_v47, %v1816_v45  ;;  %v1757_v57 = vor.u32 %v2084_v48, %v1754_v49 }
  0x26   : > { %483 = vmatpush.bf16.msra.mxu0 %v1585_v16  ;;  %v2083_v54 = vld [vmem:[%s3253_s1 + $0x54] sm:$0xf0]  ;;  %v1808_v55 = vld [vmem:[%s3253_s1 + $0xd0] sm:$0xf]  ;;  %v2082_v59 = vld [vmem:[%s3253_s1 + $0x54] sm:$0xf]  ;;  %v1821_v60 = vor.u32 %v2100_v50, %v1818_v51 }
  0x27   : > { %497 = vmatpush.bf16.msra.mxu1 %v1649_v19  ;;  %511 = vmatpush.bf16.msra.mxu2 %v1589_v20  ;;  %v2099_v58 = vld [vmem:[%s3253_s1 + $0xd4] sm:$0xf0]  ;;  %s3259_s19 = smov (!%p215_p3, %s1533_s19), 1  ;;  %v1746_v61 = vld [vmem:[%s3253_s1 + $0x58] sm:$0xf0]  ;;  %v1745_v0 = vor.u32 %v2083_v54, %v1744_v53  ;;  %vm1089_vm0 = vcmask 785408  }
  0x28   : > { %525 = vmatpush.bf16.msra.mxu3 %v1653_v24  ;;  %v2098_v62 = vld [vmem:[%s3253_s1 + $0xd4] sm:$0xf]  ;;  %v1810_v63 = vld [vmem:[%s3253_s1 + $0xd8] sm:$0xf0]  ;;  %s2070_s10 = sshll.u32 %s3259_s19, 4  ;;  %v1809_v3 = vor.u32 %v2099_v58, %v1808_v55  ;;  %v1749_v4 = vor.u32 %v2082_v59, %v1746_v61  ;;  %vm1350_vm1 = vcmask 1045504  }
  0x29   : > { %v1736_v1 = vld [vmem:[%s3253_s1 + $0x40] sm:$0xf]  ;;  %v2081_v2 = vld [vmem:[%s3253_s1 + $0x44] sm:$0xf0]  ;;  %s2506_s17 = scalar_lea.vmem %s3252_s0, %s2070_s10  ;;  %v1813_v5 = vor.u32 %v2098_v62, %v1810_v63  ;;  %v2080_v10 = vld [vmem:[%s3253_s1 + $0x44] sm:$0xf]  ;;  %s224_s28 = scalar_lea.vmem %s3257_s5, %s2070_s10 }
  0x2a   : > { %484 = vmatpush.bf16.msra.mxu0 %v1577_v31  ;;  %v1800_v6 = vld [vmem:[%s3253_s1 + $0xc0] sm:$0xf]  ;;  %v2515_v8 = vld [vmem:[%s2506_s17 + $0x8] sm:$0xff]  ;;  %v2096_v16 = vld [vmem:[%s3253_s1 + $0xc4] sm:$0xf]  ;;  %v1737_v18 = vor.u32 %v2081_v2, %v1736_v1  ;;  %vm1343_vm2 = vcmask 113664  }
  0x2b   : > { %498 = vmatpush.bf16.msra.mxu1 %v1641_v35  ;;  %512 = vmatpush.bf16.msra.mxu2 %v1581_v36  ;;  %v2512_v7 = vld [vmem:[%s2506_s17] sm:$0xff]  ;;  %v2097_v9 = vld [vmem:[%s3253_s1 + $0xc4] sm:$0xf0]  ;;  %v1738_v11 = vld [vmem:[%s3253_s1 + $0x48] sm:$0xf0]  ;;  %v297_v13 = vunpack.c.l.b16 %v2515_v8  ;;  %v298_v15 = vunpack.c.h.b16 %v2515_v8  ;;  %vm1464_vm3 = vcmask 1043456  }
  0x2c   : > { %526 = vmatpush.bf16.msra.mxu3 %v1645_v39  ;;  %v295_v12 = vunpack.c.l.b16 %v2512_v7  ;;  %v296_v14 = vunpack.c.h.b16 %v2512_v7  ;;  %v1802_v17 = vld [vmem:[%s3253_s1 + $0xc8] sm:$0xf0]  ;;  %v1728_v20 = vld [vmem:[%s3253_s1 + $0x30] sm:$0xf]  ;;  %v2079_v21 = vld [vmem:[%s3253_s1 + $0x34] sm:$0xf0]  ;;  %v1801_v23 = vor.u32 %v2097_v9, %v1800_v6  ;;  %v1741_v24 = vor.u32 %v2080_v10, %v1738_v11 }
  0x2d   : > { %v1792_v25 = vld [vmem:[%s3253_s1 + $0xb0] sm:$0xf]  ;;  %v2095_v26 = vld [vmem:[%s3253_s1 + $0xb4] sm:$0xf0]  ;;  %v2078_v27 = vld [vmem:[%s3253_s1 + $0x34] sm:$0xf]  ;;  %v1805_v28 = vor.u32 %v2096_v16, %v1802_v17  ;;  %v1729_v37 = vor.u32 %v2079_v21, %v1728_v20 }
  0x2e   : > { %700 = vmatpush.bf16.msrb.mxu0 %v1761_v40  ;;  %v299_v19 = vpack.c.b16 %v297_v13, %v295_v12  ;;  %v300_v22 = vpack.c.b16 %v298_v15, %v296_v14  ;;  %v1730_v31 = vld [vmem:[%s3253_s1 + $0x38] sm:$0xf0]  ;;  %v2094_v33 = vld [vmem:[%s3253_s1 + $0xb4] sm:$0xf]  ;;  %v1793_v39 = vor.u32 %v2095_v26, %v1792_v25  ;;  %v1784_v43 = vld [vmem:[%s3253_s1 + $0xa0] sm:$0xf] }
  0x2f   : > { %714 = vmatpush.bf16.msrb.mxu1 %v1825_v41  ;;  %728 = vmatpush.bf16.msrb.mxu2 %v1765_v42  ;;  %v1794_v34 = vld [vmem:[%s3253_s1 + $0xb8] sm:$0xf0]  ;;  %v1733_v40 = vor.u32 %v2078_v27, %v1730_v31  ;;  %v1720_v41 = vld [vmem:[%s3253_s1 + $0x20] sm:$0xf]  ;;  %v2077_v42 = vld [vmem:[%s3253_s1 + $0x24] sm:$0xf0] }
  0x30   : > { %742 = vmatpush.bf16.msrb.mxu3 %v1829_v46  ;;  %v302_v29 = vshrl.u32 %v299_v19, 16  ;;  %v304_v30 = vshll.u32 %v299_v19, 16  ;;  %v311_v32 = vshll.u32 %v300_v22, 16  ;;  %v309_v35 = vshrl.u32 %v300_v22, 16  ;;  %v2093_v46 = vld [vmem:[%s3253_s1 + $0xa4] sm:$0xf0] }
  0x31   : > { %v1797_v45 = vor.u32 %v2094_v33, %v1794_v34  ;;  %v2076_v47 = vld [vmem:[%s3253_s1 + $0x24] sm:$0xf]  ;;  %v1722_v48 = vld [vmem:[%s3253_s1 + $0x28] sm:$0xf0]  ;;  %v1785_v53 = vor.u32 %v2093_v46, %v1784_v43  ;;  %v1712_v55 = vld [vmem:[%s3253_s1 + $0x10] sm:$0xf] }
  0x32   : > { %701 = vmatpush.bf16.msrb.mxu0 %v1753_v52  ;;  %v306_v36 = vrot.slane %v304_v30, 1  ;;  %v313_v38 = vrot.slane %v311_v32, 1  ;;  %v2092_v50 = vld [vmem:[%s3253_s1 + $0xa4] sm:$0xf]  ;;  %v1786_v51 = vld [vmem:[%s3253_s1 + $0xa8] sm:$0xf0]  ;;  %v1721_v52 = vor.u32 %v2077_v42, %v1720_v41  ;;  %v1725_v54 = vor.u32 %v2076_v47, %v1722_v48 }
  0x33   : > { %715 = vmatpush.bf16.msrb.mxu1 %v1817_v56  ;;  %729 = vmatpush.bf16.msrb.mxu2 %v1757_v57  ;;  %v2075_v56 = vld [vmem:[%s3253_s1 + $0x14] sm:$0xf0]  ;;  %v1776_v57 = vld [vmem:[%s3253_s1 + $0x90] sm:$0xf]  ;;  %v1789_v58 = vor.u32 %v2092_v50, %v1786_v51  ;;  %v1714_v61 = vld [vmem:[%s3253_s1 + $0x18] sm:$0xf0] }
  0x34   : > { %743 = vmatpush.bf16.msrb.mxu3 %v1821_v60  ;;  %v307_v44 = vor.u32 %v306_v36, %v302_v29  ;;  %v314_v49 = vor.u32 %v313_v38, %v309_v35  ;;  %v2091_v59 = vld [vmem:[%s3253_s1 + $0x94] sm:$0xf0]  ;;  %v2074_v60 = vld [vmem:[%s3253_s1 + $0x14] sm:$0xf]  ;;  %v1778_v63 = vld [vmem:[%s3253_s1 + $0x98] sm:$0xf0] }
  0x35   : > { %v2090_v62 = vld [vmem:[%s3253_s1 + $0x94] sm:$0xf]  ;;  %v1704_v1 = vld [vmem:[%s3253_s1] sm:$0xf]  ;;  %v2073_v2 = vld [vmem:[%s3253_s1 + $0x4] sm:$0xf0] }
  0x36   : > { %702 = vmatpush.bf16.msrb.mxu0 %v1745_v0  ;;  %513 = vmatmul.bf16.vlgmr.msra.gmra.mxu2 %v307_v44  ;;  %v1713_v0 = vor.u32 %v2075_v56, %v1712_v55  ;;  %v2089_v6 = vld [vmem:[%s3253_s1 + $0x84] sm:$0xf0]  ;;  %v2072_v9 = vld [vmem:[%s3253_s1 + $0x4] sm:$0xf]  ;;  %v1781_v11 = vor.u32 %v2090_v62, %v1778_v63  ;;  %v1706_v16 = vld [vmem:[%s3253_s1 + $0x8] sm:$0xf0]  ;;  %v1705_v22 = vor.u32 %v2073_v2, %v1704_v1 }
  0x37   : > { %716 = vmatpush.bf16.msrb.mxu1 %v1809_v3  ;;  %730 = vmatpush.bf16.msrb.mxu2 %v1749_v4  ;;  %v1768_v3 = vld [vmem:[%s3253_s1 + $0x80] sm:$0xf]  ;;  %v1777_v4 = vor.u32 %v2091_v59, %v1776_v57  ;;  %v226_v10 = vld [vmem:[%s2506_s17 + $0x8] sm:$0x77]  ;;  %v2088_v17 = vld [vmem:[%s3253_s1 + $0x84] sm:$0xf] }
  0x38   : > { %744 = vmatpush.bf16.msrb.mxu3 %v1813_v5  ;;  %485 = vmatmul.bf16.vlgmr.msra.gmra.mxu0 %v307_v44  ;;  %v1717_v5 = vor.u32 %v2074_v60, %v1714_v61  ;;  %v1920_v19 = vld [vmem:[%s3253_s1 + $0x270] sm:$0xf]  ;;  %v2151_v20 = vld [vmem:[%s3253_s1 + $0x274] sm:$0xf0]  ;;  %v1922_v25 = vld [vmem:[%s3253_s1 + $0x278] sm:$0xf0]  ;;  %v534_v26 = vunpack.c.l.b16 %v226_v10  ;;  %v1769_v27 = vor.u32 %v2089_v6, %v1768_v3  ;;  %v535_v35 = vunpack.c.h.b16 %v226_v10 }
  0x39   : > { %527 = vmatmul.bf16.vlgmr.msra.gmra.mxu3 %v314_v49  ;;  %499 = vmatmul.bf16.vlgmr.msra.gmra.mxu1 %v314_v49  ;;  %v1984_v21 = vld [vmem:[%s3253_s1 + $0x2f0] sm:$0xf]  ;;  %v2166_v29 = vld [vmem:[%s3253_s1 + $0x2f4] sm:$0xf]  ;;  %v1986_v30 = vld [vmem:[%s3253_s1 + $0x2f8] sm:$0xf0]  ;;  %v1921_v32 = vor.u32 %v2151_v20, %v1920_v19 }
  0x3a   : > { %703 = vmatpush.bf16.msrb.mxu0 %v1737_v18  ;;  %v1770_v18 = vld [vmem:[%s3253_s1 + $0x88] sm:$0xf0]  ;;  %v1912_v36 = vld [vmem:[%s3253_s1 + $0x260] sm:$0xf]  ;;  %v1989_v38 = vor.u32 %v2166_v29, %v1986_v30  ;;  %v2165_v41 = vld [vmem:[%s3253_s1 + $0x2e4] sm:$0xf0]  ;;  %v537_v46 = vpack.c.b16 %v535_v35, %v296_v14 }
  0x3b   : > { %717 = vmatpush.bf16.msrb.mxu1 %v1801_v23  ;;  %731 = vmatpush.bf16.msrb.mxu2 %v1741_v24  ;;  %v2167_v23 = vld [vmem:[%s3253_s1 + $0x2f4] sm:$0xf0]  ;;  %v2150_v24 = vld [vmem:[%s3253_s1 + $0x274] sm:$0xf]  ;;  %v1773_v31 = vor.u32 %v2088_v17, %v1770_v18  ;;  %v2148_v42 = vld [vmem:[%s3253_s1 + $0x264] sm:$0xf] }
  0x3c   : > { %745 = vmatpush.bf16.msrb.mxu3 %v1805_v28  ;;  %v1709_v28 = vor.u32 %v2072_v9, %v1706_v16  ;;  %v1985_v33 = vor.u32 %v2167_v23, %v1984_v21  ;;  %v1925_v34 = vor.u32 %v2150_v24, %v1922_v25  ;;  %v1914_v43 = vld [vmem:[%s3253_s1 + $0x268] sm:$0xf0]  ;;  %v1904_v48 = vld [vmem:[%s3253_s1 + $0x250] sm:$0xf]  ;;  %v2147_v49 = vld [vmem:[%s3253_s1 + $0x254] sm:$0xf0] }
  0x3d   : > { %v1978_v44 = vld [vmem:[%s3253_s1 + $0x2e8] sm:$0xf0]  ;;  %v1917_v50 = vor.u32 %v2148_v42, %v1914_v43  ;;  %v2163_v7 = vld [vmem:[%s3253_s1 + $0x2d4] sm:$0xf0]  ;;  %v2146_v14 = vld [vmem:[%s3253_s1 + $0x254] sm:$0xf]  ;;  %v1905_v56 = vor.u32 %v2147_v49, %v1904_v48 }
  0x3e   : > { %704 = vmatpush.bf16.msrb.mxu0 %v1729_v37  ;;  %v2149_v37 = vld [vmem:[%s3253_s1 + $0x264] sm:$0xf0]  ;;  %v1970_v55 = vld [vmem:[%s3253_s1 + $0x2d8] sm:$0xf0]  ;;  %v1960_v62 = vld [vmem:[%s3253_s1 + $0x2c0] sm:$0xf] }
  0x3f   : > { %718 = vmatpush.bf16.msrb.mxu1 %v1793_v39  ;;  %732 = vmatpush.bf16.msrb.mxu2 %v1733_v40  ;;  %v536_v39 = vpack.c.b16 %v534_v26, %v295_v12  ;;  %v1976_v40 = vld [vmem:[%s3253_s1 + $0x2e0] sm:$0xf]  ;;  %v2164_v12 = vld [vmem:[%s3253_s1 + $0x2e4] sm:$0xf]  ;;  %v2145_v59 = vld [vmem:[%s3253_s1 + $0x244] sm:$0xf0] }
  0x40   : > { %746 = vmatpush.bf16.msrb.mxu3 %v1797_v45  ;;  %v1913_v45 = vor.u32 %v2149_v37, %v1912_v36  ;;  %v1977_v47 = vor.u32 %v2165_v41, %v1976_v40  ;;  %v1981_v51 = vor.u32 %v2164_v12, %v1978_v44  ;;  %v2161_v63 = vld [vmem:[%s3253_s1 + $0x2c4] sm:$0xf0]  ;;  %v1898_v1 = vld [vmem:[%s3253_s1 + $0x248] sm:$0xf0]  ;;  %v2160_v2 = vld [vmem:[%s3253_s1 + $0x2c4] sm:$0xf] }
  0x41   : > { %v1962_v3 = vld [vmem:[%s3253_s1 + $0x2c8] sm:$0xf0]  ;;  %v1888_v6 = vld [vmem:[%s3253_s1 + $0x230] sm:$0xf]  ;;  %v2143_v9 = vld [vmem:[%s3253_s1 + $0x234] sm:$0xf0] }
  0x42   : > { %705 = vmatpush.bf16.msrb.mxu0 %v1721_v52  ;;  %v1968_v52 = vld [vmem:[%s3253_s1 + $0x2d0] sm:$0xf]  ;;  %v2159_v17 = vld [vmem:[%s3253_s1 + $0x2b4] sm:$0xf0]  ;;  %v2142_v18 = vld [vmem:[%s3253_s1 + $0x234] sm:$0xf] }
  0x43   : > { %719 = vmatpush.bf16.msrb.mxu1 %v1785_v53  ;;  %733 = vmatpush.bf16.msrb.mxu2 %v1725_v54  ;;  %v1906_v53 = vld [vmem:[%s3253_s1 + $0x258] sm:$0xf0]  ;;  %v2162_v54 = vld [vmem:[%s3253_s1 + $0x2d4] sm:$0xf]  ;;  %v1969_v57 = vor.u32 %v2163_v7, %v1968_v52  ;;  %v1952_v16 = vld [vmem:[%s3253_s1 + $0x2b0] sm:$0xf] }
  0x44   : > { %747 = vmatpush.bf16.msrb.mxu3 %v1789_v58  ;;  %v1896_v58 = vld [vmem:[%s3253_s1 + $0x240] sm:$0xf]  ;;  %v1909_v60 = vor.u32 %v2146_v14, %v1906_v53  ;;  %v1973_v61 = vor.u32 %v2162_v54, %v1970_v55  ;;  %v1890_v19 = vld [vmem:[%s3253_s1 + $0x238] sm:$0xf0]  ;;  %v2158_v20 = vld [vmem:[%s3253_s1 + $0x2b4] sm:$0xf]  ;;  %v1953_v23 = vor.u32 %v2159_v17, %v1952_v16 }
  0x45   : > { %v1954_v21 = vld [vmem:[%s3253_s1 + $0x2b8] sm:$0xf0]  ;;  %v1880_v24 = vld [vmem:[%s3253_s1 + $0x220] sm:$0xf]  ;;  %v2141_v25 = vld [vmem:[%s3253_s1 + $0x224] sm:$0xf0]  ;;  %v1893_v26 = vor.u32 %v2142_v18, %v1890_v19 }
  0x46   : > { %706 = vmatpush.bf16.msrb.mxu0 %v1713_v0  ;;  %v2144_v0 = vld [vmem:[%s3253_s1 + $0x244] sm:$0xf]  ;;  %v2157_v29 = vld [vmem:[%s3253_s1 + $0x2a4] sm:$0xf0]  ;;  %v1872_v37 = vld [vmem:[%s3253_s1 + $0x210] sm:$0xf] }
  0x47   : > { %720 = vmatpush.bf16.msrb.mxu1 %v1777_v4  ;;  %734 = vmatpush.bf16.msrb.mxu2 %v1717_v5  ;;  %v1897_v4 = vor.u32 %v2145_v59, %v1896_v58  ;;  %v1961_v5 = vor.u32 %v2161_v63, %v1960_v62  ;;  %v1901_v10 = vor.u32 %v2144_v0, %v1898_v1  ;;  %v2140_v30 = vld [vmem:[%s3253_s1 + $0x224] sm:$0xf]  ;;  %v1936_v41 = vld [vmem:[%s3253_s1 + $0x290] sm:$0xf]  ;;  %v2155_v42 = vld [vmem:[%s3253_s1 + $0x294] sm:$0xf0] }
  0x48   : > { %748 = vmatpush.bf16.msrb.mxu3 %v1781_v11  ;;  %v1965_v11 = vor.u32 %v2160_v2, %v1962_v3  ;;  %v756_v35 = vld [vmem:[%s2506_s17] sm:$0xee]  ;;  %v2138_v43 = vld [vmem:[%s3253_s1 + $0x214] sm:$0xf]  ;;  %v1874_v12 = vld [vmem:[%s3253_s1 + $0x218] sm:$0xf0]  ;;  %v1937_v49 = vor.u32 %v2155_v42, %v1936_v41 }
  0x49   : > { %v2154_v44 = vld [vmem:[%s3253_s1 + $0x294] sm:$0xf]  ;;  %v792_v48 = vunpack.c.h.b16 %v756_v35  ;;  %v1877_v52 = vor.u32 %v2138_v43, %v1874_v12  ;;  %v1928_v14 = vld [vmem:[%s3253_s1 + $0x280] sm:$0xf]  ;;  %v2153_v53 = vld [vmem:[%s3253_s1 + $0x284] sm:$0xf0] }
  0x4a   : > { %707 = vmatpush.bf16.msrb.mxu0 %v1705_v22  ;;  %v1889_v22 = vor.u32 %v2143_v9, %v1888_v6  ;;  %v2136_v54 = vld [vmem:[%s3253_s1 + $0x204] sm:$0xf]  ;;  %v1866_v55 = vld [vmem:[%s3253_s1 + $0x208] sm:$0xf0]  ;;  %v1063_v8 = vld [vmem:[%s3255_s3 + $0xf0] sm:$0xff]  ;;  %vm1465_vm4 = vcmask 130052  }
  0x4b   : > { %721 = vmatpush.bf16.msrb.mxu1 %v1769_v27  ;;  %735 = vmatpush.bf16.msrb.mxu2 %v1709_v28  ;;  %v1957_v27 = vor.u32 %v2158_v20, %v1954_v21  ;;  %v1944_v28 = vld [vmem:[%s3253_s1 + $0x2a0] sm:$0xf]  ;;  %v1869_v62 = vor.u32 %v2136_v54, %v1866_v55  ;;  %v1055_v3 = vld [vmem:[%s3255_s3 + $0xb0] sm:$0xff]  ;;  %v1062_v6 = vld [vmem:[%s3255_s3 + $0xe8] sm:$0xff]  ;;  %vm1468_vm6 = vcmask 1040384   ;;  %vm1471_vm8 = vcmask 126980  }
  0x4c   : > { %749 = vmatpush.bf16.msrb.mxu3 %v1773_v31  ;;  %v1882_v31 = vld [vmem:[%s3253_s1 + $0x228] sm:$0xf0]  ;;  %v1945_v36 = vor.u32 %v2157_v29, %v1944_v28  ;;  %v1057_v2 = vld [vmem:[%s3255_s3 + $0xc0] sm:$0xff]  ;;  %v1051_v9 = vld [vmem:[%s3255_s3 + $0x90] sm:$0xff]  ;;  %vm1469_vm7 = vsmask.f32 256 }
  0x4d   : > { %708 = vmatmul.bf16.vlgmr.msrb.gmra.mxu0 %v536_v39  ;;  %v1087_v16 = vld [vmem:[%s3255_s3 + $0x1b0] sm:$0xff]  ;;  %v1058_v17 = vld [vmem:[%s3255_s3 + $0xc8] sm:$0xff]  ;;  %v1085_v19 = vld [vmem:[%s3255_s3 + $0x1a0] sm:$0xff]  ;;  %vm1472_vm9 = vsmask.f32 4352 }
  0x4e   : > { %959 = vmatpush.bf16.msra.mxu0 %v1921_v32  ;;  %736 = vmatmul.bf16.vlgmr.msrb.gmra.mxu2 %v536_v39  ;;  %v2156_v32 = vld [vmem:[%s3253_s1 + $0x2a4] sm:$0xf]  ;;  %v1885_v39 = vor.u32 %v2140_v30, %v1882_v31  ;;  %v1047_v18 = vld [vmem:[%s3255_s3 + $0x70] sm:$0xff]  ;;  %v1056_v20 = vld [vmem:[%s3255_s3 + $0xb8] sm:$0xff] }
  0x4f   : > { %973 = vmatpush.bf16.msra.mxu1 %v1985_v33  ;;  %987 = vmatpush.bf16.msra.mxu2 %v1925_v34  ;;  %v1946_v33 = vld [vmem:[%s3253_s1 + $0x2a8] sm:$0xf0]  ;;  %v1881_v34 = vor.u32 %v2141_v25, %v1880_v24  ;;  %v1045_v21 = vld [vmem:[%s3255_s3 + $0x60] sm:$0xff]  ;;  %v1043_v24 = vld [vmem:[%s3255_s3 + $0x50] sm:$0xff] }
  0x50   : > { %1001 = vmatpush.bf16.msra.mxu3 %v1989_v38  ;;  %722 = vmatmul.bf16.vlgmr.msrb.gmra.mxu1 %v537_v46  ;;  %v2139_v38 = vld [vmem:[%s3253_s1 + $0x214] sm:$0xf0]  ;;  %v1949_v40 = vor.u32 %v2156_v32, %v1946_v33  ;;  %v1081_v25 = vld [vmem:[%s3255_s3 + $0x180] sm:$0xff]  ;;  %v1079_v28 = vld [vmem:[%s3255_s3 + $0x170] sm:$0xff] }
  0x51   : > { %750 = vmatmul.bf16.vlgmr.msrb.gmra.mxu3 %v537_v46  ;;  %v791_v46 = vunpack.c.l.b16 %v756_v35  ;;  %v1050_v29 = vld [vmem:[%s3255_s3 + $0x88] sm:$0xff]  ;;  %v1088_v30 = vld [vmem:[%s3255_s3 + $0x1b8] sm:$0xff]  ;;  %v1039_v31 = vld [vmem:[%s3255_s3 + $0x30] sm:$0xff] }
  0x52   : > { %960 = vmatpush.bf16.msra.mxu0 %v1913_v45  ;;  %v1938_v45 = vld [vmem:[%s3253_s1 + $0x298] sm:$0xf0]  ;;  %v1077_v32 = vld [vmem:[%s3255_s3 + $0x160] sm:$0xff]  ;;  %v1082_v42 = vld [vmem:[%s3255_s3 + $0x188] sm:$0xff] }
  0x53   : > { %974 = vmatpush.bf16.msra.mxu1 %v1977_v47  ;;  %988 = vmatpush.bf16.msra.mxu2 %v1917_v50  ;;  %v1873_v47 = vor.u32 %v2139_v38, %v1872_v37  ;;  %v1864_v50 = vld [vmem:[%s3253_s1 + $0x200] sm:$0xf]  ;;  %v1941_v7 = vor.u32 %v2154_v44, %v1938_v45  ;;  %v793_v58 = vpack.c.b16 %v297_v13, %v791_v46  ;;  %v1048_v33 = vld [vmem:[%s3255_s3 + $0x78] sm:$0xff]  ;;  %v1046_v37 = vld [vmem:[%s3255_s3 + $0x68] sm:$0xff] }
  0x54   : > { %1002 = vmatpush.bf16.msra.mxu3 %v1981_v51  ;;  %v2137_v51 = vld [vmem:[%s3253_s1 + $0x204] sm:$0xf0]  ;;  %v1061_v13 = vld [vmem:[%s3255_s3 + $0xe0] sm:$0xff]  ;;  %v1084_v38 = vld [vmem:[%s3255_s3 + $0x198] sm:$0xff] }
  0x55   : > { %v1865_v59 = vor.u32 %v2137_v51, %v1864_v50  ;;  %v795_v0 = vrot.slane %v793_v58, 1  ;;  %v1037_v35 = vld [vmem:[%s3255_s3 + $0x20] sm:$0xff]  ;;  %v1044_v41 = vld [vmem:[%s3255_s3 + $0x58] sm:$0xff]  ;;  %v1071_v12 = vld [vmem:[%s3255_s3 + $0x130] sm:$0xff] }
  0x56   : > { %961 = vmatpush.bf16.msra.mxu0 %v1905_v56  ;;  %v2152_v56 = vld [vmem:[%s3253_s1 + $0x284] sm:$0xf]  ;;  %v1042_v45 = vld [vmem:[%s3255_s3 + $0x48] sm:$0xff]  ;;  %v1080_v46 = vld [vmem:[%s3255_s3 + $0x178] sm:$0xff] }
  0x57   : > { %975 = vmatpush.bf16.msra.mxu1 %v1969_v57  ;;  %989 = vmatpush.bf16.msra.mxu2 %v1909_v60  ;;  %v1930_v57 = vld [vmem:[%s3253_s1 + $0x288] sm:$0xf0]  ;;  %v794_v60 = vpack.c.b16 %v298_v15, %v792_v48  ;;  %v1059_v15 = vld [vmem:[%s3255_s3 + $0xd0] sm:$0xff]  ;;  %v1033_v43 = vld [vmem:[%s3255_s3] sm:$0xff] }
  0x58   : > { %1003 = vmatpush.bf16.msra.mxu3 %v1973_v61  ;;  %v1929_v61 = vor.u32 %v2153_v53, %v1928_v14  ;;  %v1933_v63 = vor.u32 %v2152_v56, %v1930_v57  ;;  %v2025_v48 = vld [vmem:[%s3255_s3 + $0x2b8] sm:$0xff]  ;;  %v1078_v51 = vld [vmem:[%s3255_s3 + $0x168] sm:$0xff]  ;;  %v1065_v55 = vld [vmem:[%s3255_s3 + $0x100] sm:$0xff] }
  0x59   : > { %v796_v1 = vrot.slane %v794_v60, 1  ;;  %v1040_v50 = vld [vmem:[%s3255_s3 + $0x38] sm:$0xff]  ;;  %v1038_v14 = vld [vmem:[%s3255_s3 + $0x28] sm:$0xff]  ;;  %vm1466_vm5 = vmor %vm1465_vm4, %vm1464_vm3 }
  0x5a   : > { %962 = vmatpush.bf16.msra.mxu0 %v1897_v4  ;;  %v1064_v4 = vld [vmem:[%s3255_s3 + $0xf8] sm:$0xff]  ;;  %v1074_v57 = vld [vmem:[%s3255_s3 + $0x148] sm:$0xff]  ;;  %vm1470_vm10 = vmand %vm1468_vm6, %vm1469_vm7 }
  0x5b   : > { %976 = vmatpush.bf16.msra.mxu1 %v1961_v5  ;;  %990 = vmatpush.bf16.msra.mxu2 %v1901_v10  ;;  %v1053_v5 = vld [vmem:[%s3255_s3 + $0xa0] sm:$0xff]  ;;  %v1060_v10 = vld [vmem:[%s3255_s3 + $0xd8] sm:$0xff]  ;;  %v2019_v60 = vld [vmem:[%s3255_s3 + $0x288] sm:$0xff] }
  0x5c   : > { %1004 = vmatpush.bf16.msra.mxu3 %v1965_v11  ;;  %v1049_v11 = vld [vmem:[%s3255_s3 + $0x80] sm:$0xff]  ;;  %v1076_v53 = vld [vmem:[%s3255_s3 + $0x158] sm:$0xff]  ;;  %vm1473_vm11 = vmand %vm1471_vm8, %vm1472_vm9 }
  0x5d   : > { %v2021_v54 = vld [vmem:[%s3255_s3 + $0x298] sm:$0xff]  ;;  %vm1474_vm12 = vmor %vm1473_vm11, %vm1470_vm10 }
  0x5e   : > { %963 = vmatpush.bf16.msra.mxu0 %v1889_v22  ;;  %v1083_v22 = vld [vmem:[%s3255_s3 + $0x190] sm:$0xff]  ;;  %v1036_v56 = vld [vmem:[%s3255_s3 + $0x18] sm:$0xff] }
  0x5f   : > { %977 = vmatpush.bf16.msra.mxu1 %v1953_v23  ;;  %991 = vmatpush.bf16.msra.mxu2 %v1893_v26  ;;  %v1054_v23 = vld [vmem:[%s3255_s3 + $0xa8] sm:$0xff]  ;;  %v1052_v26 = vld [vmem:[%s3255_s3 + $0x98] sm:$0xff] }
  0x60   : > { %1005 = vmatpush.bf16.msra.mxu3 %v1957_v27  ;;  %v1041_v27 = vld [vmem:[%s3255_s3 + $0x40] sm:$0xff] }
  0x62   : > { %964 = vmatpush.bf16.msra.mxu0 %v1881_v34  ;;  %v1086_v34 = vld [vmem:[%s3255_s3 + $0x1a8] sm:$0xff] }
  0x63   : > { %978 = vmatpush.bf16.msra.mxu1 %v1945_v36  ;;  %992 = vmatpush.bf16.msra.mxu2 %v1885_v39  ;;  %v1075_v36 = vld [vmem:[%s3255_s3 + $0x150] sm:$0xff] }
  0x64   : > { %1006 = vmatpush.bf16.msra.mxu3 %v1949_v40  ;;  %v1035_v39 = vld [vmem:[%s3255_s3 + $0x10] sm:$0xff]  ;;  %v1073_v40 = vld [vmem:[%s3255_s3 + $0x140] sm:$0xff] }
  0x66   : > { %965 = vmatpush.bf16.msra.mxu0 %v1873_v47 }
  0x67   : > { %979 = vmatpush.bf16.msra.mxu1 %v1937_v49  ;;  %993 = vmatpush.bf16.msra.mxu2 %v1877_v52  ;;  %v1069_v49 = vld [vmem:[%s3255_s3 + $0x120] sm:$0xff]  ;;  %v2023_v52 = vld [vmem:[%s3255_s3 + $0x2a8] sm:$0xff] }
  0x68   : > { %1007 = vmatpush.bf16.msra.mxu3 %v1941_v7  ;;  %v1067_v7 = vld [vmem:[%s3255_s3 + $0x110] sm:$0xff] }
  0x6a   : > { %966 = vmatpush.bf16.msra.mxu0 %v1865_v59  ;;  %v2024_v59 = vld [vmem:[%s3255_s3 + $0x2b0] sm:$0xff] }
  0x6b   : > { %980 = vmatpush.bf16.msra.mxu1 %v1929_v61  ;;  %994 = vmatpush.bf16.msra.mxu2 %v1869_v62  ;;  %v1034_v62 = vld [vmem:[%s3255_s3 + $0x8] sm:$0xff] }
  0x6c   : > { %1008 = vmatpush.bf16.msra.mxu3 %v1933_v63  ;;  %v1072_v63 = vld [vmem:[%s3255_s3 + $0x138] sm:$0xff] }
  0x6d   : > { %967 = vmatmul.bf16.vlgmr.msra.gmra.mxu0 %v795_v0 }
  0x6e   : > { %981 = vmatmul.bf16.vlgmr.msra.gmra.mxu1 %v796_v1  ;;  %995 = vmatmul.bf16.vlgmr.msra.gmra.mxu2 %v795_v0 }
  0x6f   : > { %1009 = vmatmul.bf16.vlgmr.msra.gmra.mxu3 %v796_v1  ;;  %1096 = vmatpush.msrb.mxu0 %v1063_v8  ;;  %v2022_v1 = vld [vmem:[%s3255_s3 + $0x2a0] sm:$0xff]  ;;  %v2017_v8 = vld [vmem:[%s3255_s3 + $0x278] sm:$0xff] }
  0x70   : > { %1142 = vmatpush.msrb.mxu2 %v1064_v4  ;;  %1123 = vmatpush.msrb.mxu1 %v1087_v16  ;;  %v2015_v4 = vld [vmem:[%s3255_s3 + $0x268] sm:$0xff] }
  0x71   : > { %1097 = vmatpush.msrb.mxu0 %v1061_v13  ;;  %1169 = vmatpush.msrb.mxu3 %v1088_v30  ;;  %v2049_v13 = vld [vmem:[%s3255_s3 + $0x378] sm:$0xff]  ;;  %v1066_v16 = vld [vmem:[%s3255_s3 + $0x108] sm:$0xff] }
  0x72   : > { %1143 = vmatpush.msrb.mxu2 %v1062_v6  ;;  %1124 = vmatpush.msrb.mxu1 %v1085_v19  ;;  %v1068_v6 = vld [vmem:[%s3255_s3 + $0x118] sm:$0xff]  ;;  %v2011_v19 = vld [vmem:[%s3255_s3 + $0x248] sm:$0xff] }
  0x73   : > { %1098 = vmatpush.msrb.mxu0 %v1059_v15  ;;  %1170 = vmatpush.msrb.mxu3 %v1086_v34  ;;  %v2007_v30 = vld [vmem:[%s3255_s3 + $0x228] sm:$0xff]  ;;  %v2042_v34 = vld [vmem:[%s3255_s3 + $0x340] sm:$0xff] }
  0x74   : > { %1144 = vmatpush.msrb.mxu2 %v1060_v10  ;;  %1125 = vmatpush.msrb.mxu1 %v1083_v22  ;;  %v2013_v10 = vld [vmem:[%s3255_s3 + $0x258] sm:$0xff]  ;;  %v2014_v22 = vld [vmem:[%s3255_s3 + $0x260] sm:$0xff] }
  0x75   : > { %1099 = vmatpush.msrb.mxu0 %v1057_v2  ;;  %1171 = vmatpush.msrb.mxu3 %v1084_v38  ;;  %v1070_v2 = vld [vmem:[%s3255_s3 + $0x128] sm:$0xff]  ;;  %v2040_v38 = vld [vmem:[%s3255_s3 + $0x330] sm:$0xff] }
  0x76   : > { %1145 = vmatpush.msrb.mxu2 %v1058_v17  ;;  %1126 = vmatpush.msrb.mxu1 %v1081_v25  ;;  %v2016_v17 = vld [vmem:[%s3255_s3 + $0x270] sm:$0xff] }
  0x77   : > { %1100 = vmatpush.msrb.mxu0 %v1055_v3  ;;  %1172 = vmatpush.msrb.mxu3 %v1082_v42  ;;  %v2020_v3 = vld [vmem:[%s3255_s3 + $0x290] sm:$0xff]  ;;  %v2038_v42 = vld [vmem:[%s3255_s3 + $0x320] sm:$0xff] }
  0x78   : > { %1146 = vmatpush.msrb.mxu2 %v1056_v20  ;;  %1127 = vmatpush.msrb.mxu1 %v1079_v28  ;;  %v2043_v20 = vld [vmem:[%s3255_s3 + $0x348] sm:$0xff]  ;;  %v2012_v28 = vld [vmem:[%s3255_s3 + $0x250] sm:$0xff] }
  0x79   : > { %1101 = vmatpush.msrb.mxu0 %v1053_v5  ;;  %1173 = vmatpush.msrb.mxu3 %v1080_v46  ;;  %v2047_v5 = vld [vmem:[%s3255_s3 + $0x368] sm:$0xff]  ;;  %v2004_v46 = vld [vmem:[%s3255_s3 + $0x210] sm:$0xff] }
  0x7a   : > { %1147 = vmatpush.msrb.mxu2 %v1054_v23  ;;  %1128 = vmatpush.msrb.mxu1 %v1077_v32  ;;  %v2046_v23 = vld [vmem:[%s3255_s3 + $0x360] sm:$0xff]  ;;  %v2039_v32 = vld [vmem:[%s3255_s3 + $0x328] sm:$0xff] }
  0x7b   : > { %1102 = vmatpush.msrb.mxu0 %v1051_v9  ;;  %1174 = vmatpush.msrb.mxu3 %v1078_v51  ;;  %v2018_v9 = vld [vmem:[%s3255_s3 + $0x280] sm:$0xff]  ;;  %v2031_v51 = vld [vmem:[%s3255_s3 + $0x2e8] sm:$0xff] }
  0x7c   : > { %1148 = vmatpush.msrb.mxu2 %v1052_v26  ;;  %1129 = vmatpush.msrb.mxu1 %v1075_v36  ;;  %v2041_v26 = vld [vmem:[%s3255_s3 + $0x338] sm:$0xff] }
  0x7d   : > { %1103 = vmatpush.msrb.mxu0 %v1049_v11  ;;  %1175 = vmatpush.msrb.mxu3 %v1076_v53  ;;  %v2045_v11 = vld [vmem:[%s3255_s3 + $0x358] sm:$0xff] }
  0x7e   : > { %1149 = vmatpush.msrb.mxu2 %v1050_v29  ;;  %1130 = vmatpush.msrb.mxu1 %v1073_v40  ;;  %v2044_v29 = vld [vmem:[%s3255_s3 + $0x350] sm:$0xff]  ;;  %v2037_v36 = vld [vmem:[%s3255_s3 + $0x318] sm:$0xff]  ;;  %v2035_v40 = vld [vmem:[%s3255_s3 + $0x308] sm:$0xff] }
  0x7f   : > { %1104 = vmatpush.msrb.mxu0 %v1047_v18  ;;  %1176 = vmatpush.msrb.mxu3 %v1074_v57  ;;  %v2048_v18 = vld [vmem:[%s3255_s3 + $0x370] sm:$0xff]  ;;  %v1997_v53 = vld [vmem:[%s3255_s3 + $0x1d8] sm:$0xff] }
  0x80   : > { %1150 = vmatpush.msrb.mxu2 %v1048_v33  ;;  %1131 = vmatpush.msrb.mxu1 %v1071_v12  ;;  %v2010_v33 = vld [vmem:[%s3255_s3 + $0x240] sm:$0xff]  ;;  %v2033_v12 = vld [vmem:[%s3255_s3 + $0x2f8] sm:$0xff]  ;;  %v2032_v57 = vld [vmem:[%s3255_s3 + $0x2f0] sm:$0xff] }
  0x81   : > { %1105 = vmatpush.msrb.mxu0 %v1045_v21  ;;  %1177 = vmatpush.msrb.mxu3 %v1072_v63  ;;  %v1998_v63 = vld [vmem:[%s3255_s3 + $0x1e0] sm:$0xff] }
  0x82   : > { %1151 = vmatpush.msrb.mxu2 %v1046_v37  ;;  %1132 = vmatpush.msrb.mxu1 %v1069_v49  ;;  %v2008_v37 = vld [vmem:[%s3255_s3 + $0x230] sm:$0xff]  ;;  %v1999_v49 = vld [vmem:[%s3255_s3 + $0x1e8] sm:$0xff] }
  0x83   : > { %1106 = vmatpush.msrb.mxu0 %v1043_v24  ;;  %1178 = vmatpush.msrb.mxu3 %v1070_v2  ;;  %v2009_v24 = vld [vmem:[%s3255_s3 + $0x238] sm:$0xff]  ;;  %v2026_v2 = vld [vmem:[%s3255_s3 + $0x2c0] sm:$0xff] }
  0x84   : > { %1152 = vmatpush.msrb.mxu2 %v1044_v41  ;;  %1133 = vmatpush.msrb.mxu1 %v1067_v7  ;;  %v2006_v41 = vld [vmem:[%s3255_s3 + $0x220] sm:$0xff] }
  0x85   : > { %1107 = vmatpush.msrb.mxu0 %v1041_v27  ;;  %1179 = vmatpush.msrb.mxu3 %v1068_v6  ;;  %v2002_v7 = vld [vmem:[%s3255_s3 + $0x200] sm:$0xff] }
  0x86   : > { %1153 = vmatpush.msrb.mxu2 %v1042_v45  ;;  %1134 = vmatpush.msrb.mxu1 %v1065_v55  ;;  %v2029_v55 = vld [vmem:[%s3255_s3 + $0x2d8] sm:$0xff] }
  0x87   : > { %1108 = vmatpush.msrb.mxu0 %v1039_v31  ;;  %1180 = vmatpush.msrb.mxu3 %v1066_v16 }
  0x88   : > { %1154 = vmatpush.msrb.mxu2 %v1040_v50  ;;  %1245 = vmatpush.msra.mxu1 %v2024_v59  ;;  %v1995_v59 = vld [vmem:[%s3255_s3 + $0x1c8] sm:$0xff] }
  0x89   : > { %1109 = vmatpush.msrb.mxu0 %v1037_v35  ;;  %1272 = vmatpush.msra.mxu3 %v2048_v18  ;;  %v2005_v35 = vld [vmem:[%s3255_s3 + $0x218] sm:$0xff] }
  0x8a   : > { %1155 = vmatpush.msrb.mxu2 %v1038_v14  ;;  %1246 = vmatpush.msra.mxu1 %v2022_v1  ;;  %v2034_v14 = vld [vmem:[%s3255_s3 + $0x300] sm:$0xff] }
  0x8b   : > { %1110 = vmatpush.msrb.mxu0 %v1035_v39  ;;  %1273 = vmatpush.msra.mxu3 %v2046_v23  ;;  %v2003_v39 = vld [vmem:[%s3255_s3 + $0x208] sm:$0xff]  ;;  %v2030_v1 = vld [vmem:[%s3255_s3 + $0x2e0] sm:$0xff] }
  0x8c   : > { %1156 = vmatpush.msrb.mxu2 %v1036_v56  ;;  %1247 = vmatpush.msra.mxu1 %v2020_v3  ;;  %v2000_v56 = vld [vmem:[%s3255_s3 + $0x1f0] sm:$0xff] }
  0x8d   : > { %1111 = vmatpush.msrb.mxu0 %v1033_v43  ;;  %1274 = vmatpush.msra.mxu3 %v2044_v29  ;;  %v2001_v43 = vld [vmem:[%s3255_s3 + $0x1f8] sm:$0xff] }
  0x8e   : > { %1157 = vmatpush.msrb.mxu2 %v1034_v62  ;;  %1248 = vmatpush.msra.mxu1 %v2018_v9  ;;  %v2027_v62 = vld [vmem:[%s3255_s3 + $0x2c8] sm:$0xff] }
  0x8f   : > { %1291 = vmatpush.msra.mxu0 %v2025_v48  ;;  %1275 = vmatpush.msra.mxu3 %v2042_v34  ;;  %v2036_v48 = vld [vmem:[%s3255_s3 + $0x310] sm:$0xff] }
  0x90   : > { %1318 = vmatpush.msra.mxu2 %v2049_v13  ;;  %1249 = vmatpush.msra.mxu1 %v2016_v17  ;;  %v1994_v13 = vld [vmem:[%s3255_s3 + $0x1c0] sm:$0xff] }
  0x91   : > { %1292 = vmatpush.msra.mxu0 %v2023_v52  ;;  %1276 = vmatpush.msra.mxu3 %v2040_v38 }
  0x92   : > { %1319 = vmatpush.msra.mxu2 %v2047_v5  ;;  %1250 = vmatpush.msra.mxu1 %v2014_v22 }
  0x93   : > { %1293 = vmatpush.msra.mxu0 %v2021_v54  ;;  %1277 = vmatpush.msra.mxu3 %v2038_v42 }
  0x94   : > { %1320 = vmatpush.msra.mxu2 %v2045_v11  ;;  %1251 = vmatpush.msra.mxu1 %v2012_v28 }
  0x95   : > { %1294 = vmatpush.msra.mxu0 %v2019_v60  ;;  %1278 = vmatpush.msra.mxu3 %v2036_v48 }
  0x96   : > { %1321 = vmatpush.msra.mxu2 %v2043_v20  ;;  %1252 = vmatpush.msra.mxu1 %v2010_v33 }
  0x97   : > { %1295 = vmatpush.msra.mxu0 %v2017_v8  ;;  %1279 = vmatpush.msra.mxu3 %v2034_v14 }
  0x98   : > { %1322 = vmatpush.msra.mxu2 %v2041_v26  ;;  %1253 = vmatpush.msra.mxu1 %v2008_v37 }
  0x99   : > { %1296 = vmatpush.msra.mxu0 %v2015_v4  ;;  %1280 = vmatpush.msra.mxu3 %v2032_v57  ;;  %v1019_v4 = vld [vmem:[%s3254_s2] sm:$0x3] }
  0x9a   : > { %1323 = vmatpush.msra.mxu2 %v2039_v32  ;;  %1254 = vmatpush.msra.mxu1 %v2006_v41  ;;  %v1021_v18 = vperm.slane %v1019_v4, 0 }
  0x9b   : > { %1297 = vmatpush.msra.mxu0 %v2013_v10  ;;  %1281 = vmatpush.msra.mxu3 %v2030_v1 }
  0x9c   : > { %1324 = vmatpush.msra.mxu2 %v2037_v36  ;;  %1255 = vmatpush.msra.mxu1 %v2004_v46 }
  0x9d   : > { %1298 = vmatpush.msra.mxu0 %v2011_v19 }
  0x9e   : > { %1325 = vmatpush.msra.mxu2 %v2035_v40  ;;  %1256 = vmatpush.msra.mxu1 %v2002_v7 }
  0x9f   : > { %1299 = vmatpush.msra.mxu0 %v2009_v24 }
  0xa0   : > { %1326 = vmatpush.msra.mxu2 %v2033_v12  ;;  %1257 = vmatpush.msra.mxu1 %v2000_v56 }
  0xa1   : > { %1300 = vmatpush.msra.mxu0 %v2007_v30 }
  0xa2   : > { %1327 = vmatpush.msra.mxu2 %v2031_v51  ;;  %1258 = vmatpush.msra.mxu1 %v1998_v63 }
  0xa3   : > { %1301 = vmatpush.msra.mxu0 %v2005_v35 }
  0xa4   : > { %1328 = vmatpush.msra.mxu2 %v2029_v55 }
  0xa5   : > { %1302 = vmatpush.msra.mxu0 %v2003_v39 }
  0xa6   : > { %1329 = vmatpush.msra.mxu2 %v2027_v62 }
  0xa7   : > { %1303 = vmatpush.msra.mxu0 %v2001_v43 }
  0xa9   : > { %1304 = vmatpush.msra.mxu0 %v1999_v49 }
  0xab   : > { %1305 = vmatpush.msra.mxu0 %v1997_v53 }
  0xad   : > { %1306 = vmatpush.msra.mxu0 %v1995_v59 }
  0xb5   : > { %v2970_v47 = vpop.f32.mrf.mxu0 }
  0xb6   : > { %v2962_v44 = vpop.f32.mrf.mxu1 }
  0xb7   : > { %v501_v60 = vadd.f32 %v2962_v44, %v2970_v47  ;;  %v1996_v44 = vld [vmem:[%s3255_s3 + $0x1d0] sm:$0xff] }
  0xb8   : > { %v2028_v47 = vld [vmem:[%s3255_s3 + $0x2d0] sm:$0xff]  ;;  %1259 = vmatpush.msra.mxu1 %v1996_v44 }
  0xb9   : > { %v3008_v58 = vpop.f32.mrf.mxu2  ;;  %1282 = vmatpush.msra.mxu3 %v2028_v47 }
  0xba   : > { %1260 = vmatpush.msra.mxu1 %v1994_v13  ;;  %v2060_v13 = vld [vmem:[%s3256_s4 + $0x10] sm:$0xff] }
  0xbb   : > { %1283 = vmatpush.msra.mxu3 %v2026_v2 }
  0xbc   : > { %v3016_v61 = vpop.f32.mrf.mxu3 }
  0xbd   : > { %v3035_v15 = vpop.f32.mrf.mxu0  ;;  %v529_v9 = vadd.f32 %v3016_v61, %v3008_v58  ;;  %v1022_v58 = vperm.slane %v1019_v4, 1 }
  0xbe   : > { %v3024_v0 = vpop.f32.mrf.mxu1 }
  0xbf   : > { %v503_v11 = vadd.f32 %v3024_v0, %v3035_v15 }
  0xc1   : > { %v3076_v21 = vpop.f32.mrf.mxu2 }
  0xc4   : > { %v3087_v25 = vpop.f32.mrf.mxu3 }
  0xc5   : > { %v531_v0 = vadd.f32 %v3087_v25, %v3076_v21 }
  0xca   : > { %v3103_v31 = vpop.f32.mrf.mxu0 }
  0xcb   : > { %v710_v8 = vadd.f32 %v3103_v31, %v501_v60 }
  0xcd   : > { %v3092_v27 = vpop.f32.mrf.mxu1 }
  0xce   : > { %v724_v16 = vadd.f32 %v3092_v27, %v710_v8  ;;  %v1341_v8 = vld [vmem:[%s3256_s4] sm:$0xff] }
  0xd1   : > { %v737_v45 = vpop.f32.mrf.mxu2 }
  0xd2   : > { %v711_v54 = vpop.f32.mrf.mxu0  ;;  %v738_v20 = vadd.f32 %v737_v45, %v529_v9 }
  0xd3   : > { %v712_v22 = vadd.f32 %v711_v54, %v503_v11  ;;  %v2061_v11 = vld [vmem:[%s3256_s4 + $0x18] sm:$0x1] }
  0xd4   : > { %v751_v50 = vpop.f32.mrf.mxu3 }
  0xd5   : > { %v725_v52 = vpop.f32.mrf.mxu1  ;;  %v752_v29 = vadd.f32 %v751_v50, %v738_v20 }
  0xd6   : > { %v726_v32 = vadd.f32 %v725_v52, %v712_v22 }
  0xd9   : > { %v739_v3 = vpop.f32.mrf.mxu2 }
  0xda   : > { %v740_v34 = vadd.f32 %v739_v3, %v531_v0 }
  0xdc   : > { %v753_v5 = vpop.f32.mrf.mxu3 }
  0xdd   : > { %v754_v41 = vadd.f32 %v753_v5, %v740_v34 }
  0xea   : > { %v968_v6 = vpop.f32.mrf.mxu0 }
  0xeb   : > { %v982_v10 = vpop.f32.mrf.mxu1 }
  0xec   : > { %v983_v17 = vadd.f32 %v982_v10, %v968_v6  ;;  %v1342_v10 = vld [vmem:[%s3256_s4 + $0x8] sm:$0x1] }
  0xee   : > { %v1015_v19 = vadd.f32 %v983_v17, %v724_v16 }
  0xf0   : > { %v1025_v23 = vadd.f32 %v1021_v18, %v1015_v19 }
  0xf1   : > { %v996_v26 = vpop.f32.mrf.mxu2 }
  0xf2   : > { %v1029_v24 = vmax.f32 %v1025_v23, 0.0  ;;  %v1010_v28 = vpop.f32.mrf.mxu3  ;;  %v970_v61 = vpop.f32.mrf.mxu0 }
  0xf3   : > { %v1011_v30 = vadd.f32 %v1010_v28, %v996_v26  ;;  %v984_v31 = vpop.f32.mrf.mxu1 }
  0xf4   : > { %v985_v33 = vadd.f32 %v984_v31, %v970_v61  ;;  %1112 = vmatmul.f32.vlgmr.msrb.gmra.mxu0 %v1029_v24  ;;  %1158 = vmatmul.f32.vlgmr.msrb.gmra.mxu2 %v1029_v24  ;;  %v1475_v61 = vld [vmem:[%s224_s28 + $0x8] sm:$0x11] }
  0xf5   : > { %v1016_v15 = vadd.f32 %v1011_v30, %v752_v29 }
  0xf6   : > { %v1017_v27 = vadd.f32 %v985_v33, %v726_v32 }
  0xf7   : > { %v1026_v35 = vadd.f32 %v1022_v58, %v1016_v15 }
  0xf8   : > { %v1027_v36 = vadd.f32 %v1021_v18, %v1017_v27 }
  0xf9   : > { %v1030_v37 = vmax.f32 %v1026_v35, 0.0  ;;  %v998_v39 = vpop.f32.mrf.mxu2 }
  0xfa   : > { %v1031_v38 = vmax.f32 %v1027_v36, 0.0  ;;  %v1012_v40 = vpop.f32.mrf.mxu3 }
  0xfb   : > { %v1013_v42 = vadd.f32 %v1012_v40, %v998_v39  ;;  %1990 = vmatmul.msk.f32.vlgmr.msrb.gmra.mxu1 %vm1089_vm0, %v1030_v37  ;;  %1992 = vmatmul.msk.f32.vlgmr.msrb.gmra.mxu3 %vm1089_vm0, %v1030_v37 }
  0xfc   : > { %1115 = vmatmul.f32.gmra.mxu0 %v1031_v38  ;;  %1161 = vmatmul.f32.gmra.mxu2 %v1031_v38 }
  0xfd   : > { %v1018_v43 = vadd.f32 %v1013_v42, %v754_v41 }
  0xff   : > { %v1028_v21 = vadd.f32 %v1022_v58, %v1018_v43 }
 0x101   : > { %v1032_v25 = vmax.f32 %v1028_v21, 0.0 }
 0x103   : > { %1991 = vmatmul.msk.f32.gmra.mxu1 %vm1089_vm0, %v1032_v25  ;;  %1993 = vmatmul.msk.f32.gmra.mxu3 %vm1089_vm0, %v1032_v25 }
 0x104   : > { %1307 = vmatmul.f32.vlgmr.msra.gmra.mxu0 %v1029_v24  ;;  %2052 = vmatmul.msk.f32.vlgmr.msra.gmra.mxu2 %vm1089_vm0, %v1030_v37 }
 0x10b   : > { %1261 = vmatmul.f32.vlgmr.msra.gmra.mxu1 %v1029_v24  ;;  %2050 = vmatmul.msk.f32.vlgmr.msra.gmra.mxu3 %vm1089_vm0, %v1030_v37 }
 0x10c   : > { %1310 = vmatmul.f32.gmra.mxu0 %v1031_v38  ;;  %2053 = vmatmul.msk.f32.gmra.mxu2 %vm1089_vm0, %v1032_v25 }
 0x113   : > { %1264 = vmatmul.f32.gmra.mxu1 %v1031_v38  ;;  %2051 = vmatmul.msk.f32.gmra.mxu3 %vm1089_vm0, %v1032_v25 }
 0x171   : > { %v1113_v12 = vpop.f32.mrf.mxu0 }
 0x177   : > { %v1159_v45 = vpop.f32.mrf.mxu2 }
 0x178   : > { %v1136_v46 = vpop.f32.mrf.mxu1 }
 0x179   : > { %v1116_v48 = vpop.f32.mrf.mxu0  ;;  %v1137_v5 = vadd.f32 %v1136_v46, %v1113_v12 }
 0x17e   : > { %v1182_v49 = vpop.f32.mrf.mxu3 }
 0x17f   : > { %v1162_v50 = vpop.f32.mrf.mxu2  ;;  %v1183_v62 = vadd.f32 %v1182_v49, %v1159_v45 }
 0x180   : > { %v1139_v51 = vpop.f32.mrf.mxu1 }
 0x181   : > { %v1308_v52 = vpop.f32.mrf.mxu0  ;;  %v1140_v2 = vadd.f32 %v1139_v51, %v1116_v48 }
 0x186   : > { %v1185_v7 = vpop.f32.mrf.mxu3 }
 0x187   : > { %v1331_v14 = vpop.f32.mrf.mxu2  ;;  %v1186_v57 = vadd.f32 %v1185_v7, %v1162_v50 }
 0x188   : > { %v1262_v53 = vpop.f32.mrf.mxu1  ;;  %v1332_v59 = vadd.f32 %v1331_v14, %v1308_v52 }
 0x189   : > { %v1311_v55 = vpop.f32.mrf.mxu0 }
 0x18a   : > { %v1338_v1 = vmax.f32 %v1183_v62, %v1332_v59 }
 0x18e   : > { %v1285_v54 = vpop.f32.mrf.mxu3 }
 0x18f   : > { %v1334_v56 = vpop.f32.mrf.mxu2  ;;  %v1286_v3 = vadd.f32 %v1285_v54, %v1262_v53 }
 0x190   : > { %v1335_v60 = vadd.f32 %v1334_v56, %v1311_v55  ;;  %v1265_v44 = vpop.f32.mrf.mxu1 }
 0x191   : > { %v1337_v9 = vmax.f32 %v1137_v5, %v1286_v3 }
 0x192   : > { %v1340_v63 = vmax.f32 %v1186_v57, %v1335_v60 }
 0x194   : > { %2057 = vmatpush.msk.msrb.mxu1 %vm1350_vm1, %v1340_v63  ;;  %2065 = vmatpush.msk.msrb.mxu0 %vm1350_vm1, %v1340_v63 }
 0x196   : > { %v1288_v47 = vpop.f32.mrf.mxu3  ;;  %1395 = vmatpush.msrb.mxu1 %v1338_v1  ;;  %1450 = vmatpush.msrb.mxu0 %v1338_v1 }
 0x197   : > { %v1289_v4 = vadd.f32 %v1288_v47, %v1265_v44  ;;  %2058 = vmatmul.msk.f32.vlgmr.msrb.gmra.mxu1 %vm1343_vm2, %v1341_v8  ;;  %2066 = vmatmul.msk.f32.vlgmr.msrb.gmra.mxu0 %vm1343_vm2, %v2060_v13 }
 0x199   : > { %v1339_v6 = vmax.f32 %v1140_v2, %v1289_v4 }
 0x19b   : > { %2054 = vmatpush.msk.msrb.mxu3 %vm1350_vm1, %v1339_v6  ;;  %2062 = vmatpush.msk.msrb.mxu2 %vm1350_vm1, %v1339_v6 }
 0x19d   : > { %1372 = vmatpush.msrb.mxu3 %v1337_v9  ;;  %1427 = vmatpush.msrb.mxu2 %v1337_v9 }
 0x19e   : > { %2063 = vmatmul.msk.f32.vlgmr.msrb.gmra.mxu2 %vm1343_vm2, %v2060_v13  ;;  %2055 = vmatmul.msk.f32.vlgmr.msrb.gmra.mxu3 %vm1343_vm2, %v1341_v8 }
 0x19f   : > { %2168 = vmatpush.msk.msra.mxu3 %vm1350_vm1, %v1340_v63  ;;  %2059 = vmatmul.msk.f32.gmra.mxu1 %vm1343_vm2, %v1342_v10 }
 0x1a1   : > { %2169 = vmatpush.msra.mxu3 %v1338_v1 }
 0x1a6   : > { %2064 = vmatmul.msk.f32.gmra.mxu2 %vm1343_vm2, %v2061_v11  ;;  %2056 = vmatmul.msk.f32.gmra.mxu3 %vm1343_vm2, %v1342_v10 }
 0x1ae   : > { %2067 = vmatmul.msk.f32.vlgmr.msra.gmra.mxu3 %vm1343_vm2, %v2061_v11 }
 0x214   : > { %v1397_v16 = vpop.f32.mrf.mxu1  ;;  %v1452_v17 = vpop.f32.mrf.mxu0 }
 0x215   : > { %v1459_v19 = vmax.f32 %v1397_v16, %v1452_v17 }
 0x21c   : > { %v1400_v26 = vpop.f32.mrf.mxu1 }
 0x221   : > { %v1429_v18 = vpop.f32.mrf.mxu2  ;;  %v1374_v20 = vpop.f32.mrf.mxu3 }
 0x222   : > { %v1458_v22 = vmax.f32 %v1374_v20, %v1429_v18 }
 0x224   : > { %v1462_v23 = vpack.c.bf16 %v1459_v19, %v1458_v22 }
 0x226   : > { %1467 = vst.msk [vmem:[%s224_s28] sm:$0xff] %vm1466_vm5, %v1462_v23 }
 0x229   : > { %v1377_v24 = vpop.f32.mrf.mxu3  ;;  %v1432_v28 = vpop.f32.mrf.mxu2 }
 0x22a   : > { %v1460_v30 = vmax.f32 %v1377_v24, %v1432_v28 }
 0x231   : > { %v1455_v29 = vpop.f32.mrf.mxu3 }
 0x232   : > { %v1461_v58 = vmax.f32 %v1400_v26, %v1455_v29 }
 0x234   : > { %v1463_v31 = vpack.c.bf16 %v1461_v58, %v1460_v30 }
 0x236   : > { %v1476_v32 = vsel %vm1474_vm12, %v1463_v31, %v1475_v61 }
 0x237   : > { %1477 = vst [vmem:[%s224_s28 + $0x8] sm:$0x11] %v1476_v32 }
 0x238 PF: > { %s15_s18 = sadd.s32 1, %s2184_s18  }
 0x239   : > { %p12_p4 = scmp.ge.s32.totalorder %s15_s18, 4  }
 0x23b   :  { %14 = sbr.rel (!%p12_p4) target bundleno = 1 (0x1), region = 74 }

// kernel: model_reducing_params_forward.13
= control target key start
LH: loop header
LB: loop body
LE: loop exit
PB: predicated region body
PF: predicated region fallthrough
CT: control target
= control target key end

     0   :  { %s238_s0 = inlined_call_operand.vmem [shape: bf16[2,144], index: 0, kind: input, shape index: {}]   ;;  %s239_s1 = inlined_call_operand.vmem [shape: f32[144,10], index: 1, kind: input, shape index: {}]   ;;  %s240_s2 = inlined_call_operand.vmem [shape: f32[1,10], index: 2, kind: input, shape index: {}]   ;;  %s241_s3 = inlined_call_operand.hbm [shape: f32[2,10], index: 3, kind: output, shape index: {}]  }
   0x1   :  { %v32_v0 = vld [vmem:[%s239_s1 + $0x78] sm:$0xff]  ;;  %v31_v1 = vld [vmem:[%s239_s1 + $0x70] sm:$0xff]  ;;  %v30_v2 = vld [vmem:[%s239_s1 + $0x68] sm:$0xff] }
   0x2   :  { %47 = vmatpush.msra.mxu0 %v32_v0  ;;  %v29_v3 = vld [vmem:[%s239_s1 + $0x60] sm:$0xff]  ;;  %v34_v4 = vld [vmem:[%s239_s1 + $0x88] sm:$0xff]  ;;  %v28_v6 = vld [vmem:[%s239_s1 + $0x58] sm:$0xff] }
   0x3   :  { %v15_v5 = vld [vmem:[%s238_s0] sm:$0x3]  ;;  %81 = vmatpush.msra.mxu1 %v34_v4 }
   0x4   :  { %48 = vmatpush.msra.mxu0 %v31_v1  ;;  %v16_v7 = vunpack.c.l.bf16 %v15_v5  ;;  %v33_v8 = vld [vmem:[%s239_s1 + $0x80] sm:$0xff] }
   0x6   :  { %49 = vmatpush.msra.mxu0 %v30_v2 }
   0x8   :  { %50 = vmatpush.msra.mxu0 %v29_v3 }
   0x9   :  { %8 = vsyncpa [#allocation3], 0  ;;  %v27_v9 = vld [vmem:[%s239_s1 + $0x50] sm:$0xff]  ;;  %40 = vst [vmem:[#allocation1] ss:$4 sm:$0xff] %v16_v7  ;;  %82 = vmatpush.msra.mxu1 %v33_v8  ;;  %v26_v10 = vld [vmem:[%s239_s1 + $0x48] sm:$0xff] }
   0xa   :  { %51 = vmatpush.msra.mxu0 %v28_v6  ;;  %v25_v11 = vld [vmem:[%s239_s1 + $0x40] sm:$0xff]  ;;  %vm44_vm0 = vcmask 130048   ;;  %v24_v12 = vld [vmem:[%s239_s1 + $0x38] sm:$0xff]  ;;  %v23_v14 = vld [vmem:[%s239_s1 + $0x30] sm:$0xff]  ;;  %vm87_vm1 = vcmask 74752   ;;  %s109_s26 = sshll.u32 %s241_s3, 4  ;;  %s110_s26 = int_to_ptr.hbm [resolvable:$true] %s109_s26 }
   0xb   :  { %v22_v15 = vld [vmem:[%s239_s1 + $0x28] sm:$0xff]  ;;  %v21_v16 = vld [vmem:[%s239_s1 + $0x20] sm:$0xff]  ;;  %v20_v17 = vld [vmem:[%s239_s1 + $0x18] sm:$0xff] }
   0xc   :  { %52 = vmatpush.msra.mxu0 %v27_v9  ;;  %v19_v18 = vld [vmem:[%s239_s1 + $0x10] sm:$0xff]  ;;  %v18_v19 = vld [vmem:[%s239_s1 + $0x8] sm:$0xff]  ;;  %v17_v20 = vld [vmem:[%s239_s1] sm:$0xff]  ;;  %s151_s1 = smov [#allocation2]  }
   0xd   :  { %v120_v22 = vld [vmem:[%s240_s2] ss:$0 sm:$0xff]  ;;  %s107_s2 = sshll.u32 %s151_s1, 4  ;;  %s108_s2 = int_to_ptr.vmem [resolvable:$true] %s107_s2 }
   0xe   :  { %53 = vmatpush.msra.mxu0 %v26_v10 }
  0x10   :  { %54 = vmatpush.msra.mxu0 %v25_v11  ;;  %v42_v13 = vld.sshfl [vmem:[#allocation1 + $0x8] sm:$0xff pattern:$0x73625140]  ;;  %v41_v21 = vld.sshfl [vmem:[#allocation1] sm:$0xff pattern:$0x73625140] }
  0x11   :  { %118 = vmatmul.msk.f32.vlgmr.msra.gmra.mxu1 %vm44_vm0, %v42_v13 }
  0x12   :  { %55 = vmatpush.msra.mxu0 %v24_v12 }
  0x14   :  { %56 = vmatpush.msra.mxu0 %v23_v14 }
  0x16   :  { %57 = vmatpush.msra.mxu0 %v22_v15 }
  0x18   :  { %58 = vmatpush.msra.mxu0 %v21_v16 }
  0x1a   :  { %59 = vmatpush.msra.mxu0 %v20_v17 }
  0x1c   :  { %60 = vmatpush.msra.mxu0 %v19_v18 }
  0x1e   :  { %61 = vmatpush.msra.mxu0 %v18_v19 }
  0x20   :  { %62 = vmatpush.msra.mxu0 %v17_v20 }
  0x21   :  { %63 = vmatmul.f32.vlgmr.msra.gmra.mxu0 %v41_v21 }
  0x8e   :  { %v84_v24 = vpop.f32.mrf.mxu1 }
  0x9e   :  { %v64_v23 = vpop.f32.mrf.mxu0 }
  0x9f   :  { %v65_v25 = vadd.f32 %v120_v22, %v64_v23 }
  0xa1   :  { %v85_v26 = vadd.f32 %v84_v24, %v65_v25 }
  0xa3   :  { %v88_v27 = vsel %vm87_vm1, %v85_v26, -inf }
  0xa4   :  { %89 = vmax.xlane.f32.xlu0 %v88_v27 }
 0x117   :  { %v90_v28 = vpop.xlane.xlu0 %89 }
 0x118   :  { %v91_v29 = vsub.f32 %v85_v26, %v90_v28 }
 0x11a   :  { %v92_v30 = vmul.f32 1.442695, %v91_v29 }
 0x11c   :  { %121 = vpow2.f32 %v92_v30 }
 0x122   :  { %v122_v31 = vpop.eup %121 }
 0x123   :  { %v94_v32 = vsel %vm87_vm1, %v122_v31, 0.0 }
 0x124   :  { %95 = vadd.xlane.f32.xlu0 %v94_v32 }
 0x197   :  { %v96_v33 = vpop.xlane.xlu0 %95 }
 0x198   :  { %123 = vlog2.f32 %v96_v33 }
 0x19e   :  { %v124_v34 = vpop.eup %123 }
 0x19f   :  { %v98_v35 = vmul.f32 0.6931472, %v124_v34 }
 0x1a1   :  { %v99_v36 = vadd.f32 %v98_v35, %v90_v28 }
 0x1a3   :  { %v100_v37 = vsub.f32 %v85_v26, %v99_v36 }
 0x1a5   :  { %101 = vst.msk [vmem:[#allocation2] sm:$0x3] %vm87_vm1, %v100_v37 }
 0x1a6   :  { %112 = dma.vmem_to_hbm [thread:$0]  %s108_s2, 32, %s110_s26, [#allocation3]  }
 0x1a7   :  { %149 = dma.done.wait [#allocation3], 32  }
 0x1a8   :  { %150 = vsyncadd [#allocation3], 4294967264 }
 0x1a9   :  { %117 = vsyncpa [#allocation3], 1 }

</bundles_post_ra>
